<compile_context>
chip_gen: v7x
topology: tpu7x:2x2x1
jax: 0.10.0
libtpu: 0.0.40
codegen_flags: <defaults>
</compile_context>

<pallas_src>
import math
from functools import partial

import jax
import jax.numpy as jnp
from jax.experimental import pallas as pl
from jax.experimental.pallas import tpu as pltpu

_VMEM = pltpu.MemorySpace.VMEM
_LN_EPS = 1e-5


def _vmem_limit_bytes():
    # v5e / v6e have 128 MiB physical VMEM -> raise the scoped limit well above the
    # 16/32 MiB defaults; unknown / v7x-class chips get a conservative 48 MiB (< 64 MiB).
    try:
        kind = jax.devices()[0].device_kind.lower()
    except Exception:
        kind = ""
    if "v5" in kind or "v6" in kind:
        return 96 * 1024 * 1024
    return 48 * 1024 * 1024


def _cparams():
    return pltpu.CompilerParams(dimension_semantics=("parallel",),
                                vmem_limit_bytes=_vmem_limit_bytes())


def _gelu(x):
    # TODO(synk): reference encoder may use exact-erf GELU; tanh approximation kept here.
    return 0.5 * x * (1.0 + jnp.tanh(0.7978845608028654 * (x + 0.044715 * x * x * x)))


def _layernorm(x, g, b):
    mu = jnp.mean(x, axis=-1, keepdims=True)
    var = jnp.mean((x - mu) * (x - mu), axis=-1, keepdims=True)
    return (x - mu) * jax.lax.rsqrt(var + _LN_EPS) * g + b


# ----------------------------- Pallas kernels -----------------------------

def _patch_embed_kernel(p_ref, w_ref, b_ref, cls_ref, pos_ref, o_ref):
    # one batch element per grid step: patches (N, P) -> tokens (N+1, D) with CLS + pos.
    proj = jnp.dot(p_ref[0].astype(jnp.bfloat16), w_ref[...],
                   preferred_element_type=jnp.float32) + b_ref[...]
    pos = pos_ref[...]
    # direct stores instead of a concatenate (avoids an extra (N+1, D) VMEM copy).
    o_ref[0, 0:1, :] = cls_ref[...] + pos[0:1, :]
    o_ref[0, 1:, :] = proj + pos[1:, :]


def _block_kernel(x_ref, g1_ref, b1_ref, wqkv_ref, bqkv_ref, wo_ref, bo_ref,
                  g2_ref, b2_ref, w1_ref, b1m_ref, w2_ref, b2m_ref,
                  o_ref, attn_ref, *, n_batch, seq, n_heads, scale):
    # Whole pre-norm transformer block for `n_batch` flattened batch elements:
    #   LN1 -> fused QKV -> per-head attention -> o-proj -> +res -> LN2 -> MLP -> +res
    # qkv and the attention output stay in VMEM (never touch HBM).
    x = x_ref[...]                                            # (n_batch*seq, D) f32
    d_model = x.shape[-1]
    d_head = d_model // n_heads

    h = _layernorm(x, g1_ref[...], b1_ref[...])
    qkv = jnp.dot(h.astype(jnp.bfloat16), wqkv_ref[...],
                  preferred_element_type=jnp.float32) + bqkv_ref[...]

    # head-major qkv layout: wqkv columns are [q_h | k_h | v_h] per head, so one static
    # slice delivers a whole head and no trailing concatenate is needed.
    for e in range(n_batch):
        r0 = e * seq
        for hd in range(n_heads):
            c0 = hd * 3 * d_head
            slab = qkv[r0:r0 + seq, c0:c0 + 3 * d_head]
            qh = slab[:, :d_head].astype(jnp.bfloat16)
            kh = slab[:, d_head:2 * d_head].astype(jnp.bfloat16)
            vh = slab[:, 2 * d_head:].astype(jnp.bfloat16)
            s = jax.lax.dot_general(qh, kh, (((1,), (1,)), ((), ())),
                                    preferred_element_type=jnp.float32) * scale
            # bf16 exp (EUP bf16 path on v6e/v7x); max-subtraction / row-sum kept in f32.
            p = jnp.exp((s - jnp.max(s, axis=-1, keepdims=True)).astype(jnp.bfloat16))
            l = jnp.sum(p.astype(jnp.float32), axis=-1, keepdims=True)
            oh = jnp.dot(p, vh, preferred_element_type=jnp.float32)
            oh = oh * pl.reciprocal(l, approx=True)
            # per-head write-out into the VMEM scratch: no python-list accumulation.
            attn_ref[r0:r0 + seq, hd * d_head:(hd + 1) * d_head] = oh

    r = x + jnp.dot(attn_ref[...].astype(jnp.bfloat16), wo_ref[...],
                    preferred_element_type=jnp.float32) + bo_ref[...]
    h2 = _layernorm(r, g2_ref[...], b2_ref[...])
    h2 = jnp.dot(h2.astype(jnp.bfloat16), w1_ref[...],
                 preferred_element_type=jnp.float32) + b1m_ref[...]
    h2 = _gelu(h2)
    m = jnp.dot(h2.astype(jnp.bfloat16), w2_ref[...],
                preferred_element_type=jnp.float32) + b2m_ref[...]
    o_ref[...] = r + m


def _clip_head_kernel(img_ref, txt_ref, gi_ref, bi_ref, gt_ref, bt_ref,
                      wm_ref, ls_ref, li_ref):
    # final LN (both towers) + shared multimodal projection + L2 norm + scaled logits.
    img = _layernorm(img_ref[...], gi_ref[...], bi_ref[...])
    txt = _layernorm(txt_ref[...], gt_ref[...], bt_ref[...])
    img = jnp.dot(img.astype(jnp.bfloat16), wm_ref[...],
                  preferred_element_type=jnp.float32)
    txt = jnp.dot(txt.astype(jnp.bfloat16), wm_ref[...],
                  preferred_element_type=jnp.float32)
    img = img * jax.lax.rsqrt(jnp.sum(img * img, axis=-1, keepdims=True))
    txt = txt * jax.lax.rsqrt(jnp.sum(txt * txt, axis=-1, keepdims=True))
    # TODO(synk): reference applies no clamp to logit_scale.exp(); kept identical.
    scale = jnp.exp(ls_ref[...])                       # (1,1) broadcasts
    li_ref[...] = scale * jax.lax.dot_general(
        img, txt, (((1,), (1,)), ((), ())), preferred_element_type=jnp.float32)


# ----------------------------- model (glue + kernels) -----------------------------

def _pick_batch_block(batch, seq, target_rows=256):
    # Pack several batch elements into one grid step so the matmul M dim is ~target_rows
    # (fills the 256-wide MXU on v6e/v7x; 128 already suffices on v5e) and the per-step
    # overhead is amortized; keep block rows (8,)-aligned or equal to the full array.
    want = max(1, min(batch, target_rows // max(seq, 1)))
    for bg in range(want, 0, -1):
        if batch % bg == 0 and (bg == batch or (bg * seq) % 8 == 0):
            return bg
    return batch


def transformer_block(x2d, p, n_heads, seq, batch):
    rows, D = x2d.shape
    Hd = p['w1'].shape[1]
    bg = _pick_batch_block(batch, seq)
    rows_blk = bg * seq

    def wspec(shape):
        return pl.BlockSpec(shape, lambda i: (0, 0))

    # TODO(synk): at production sizes add pipeline_mode=pl.Buffered(1) to these
    #             grid-invariant weight specs (halves their VMEM footprint, needed on v7x).
    return pl.pallas_call(
        partial(_block_kernel, n_batch=bg, seq=seq, n_heads=n_heads,
                scale=1.0 / math.sqrt(D // n_heads)),
        out_shape=jax.ShapeDtypeStruct((rows, D), jnp.float32),
        grid=(batch // bg,),
        in_specs=[pl.BlockSpec((rows_blk, D), lambda i: (i, 0)),
                  wspec((1, D)), wspec((1, D)),
                  wspec((D, 3 * D)), wspec((1, 3 * D)),
                  wspec((D, D)), wspec((1, D)),
                  wspec((1, D)), wspec((1, D)),
                  wspec((D, Hd)), wspec((1, Hd)),
                  wspec((Hd, D)), wspec((1, D))],
        out_specs=pl.BlockSpec((rows_blk, D), lambda i: (i, 0)),
        scratch_shapes=[pltpu.VMEM((rows_blk, D), jnp.float32)],
        compiler_params=_cparams(),
    )(x2d, p['ln1_g'], p['ln1_b'], p['wqkv'], p['bqkv'], p['wo'], p['bo'],
      p['ln2_g'], p['ln2_b'], p['w1'], p['b1'], p['w2'], p['b2'])


def img_encoder(x_img, p, cfg):
    B, C, H, W = x_img.shape
    ph, pw = cfg['patch_height'], cfg['patch_width']
    nh, nw = H // ph, W // pw
    N = nh * nw
    P = C * ph * pw
    D = cfg['embed_dim']

    # TODO(synk): fold this NCHW patchify transpose into the patch-embed kernel
    #             (strided DMA / index_map) to avoid one image-sized HBM round trip.
    patches = x_img.reshape(B, C, nh, ph, nw, pw)
    patches = patches.transpose(0, 2, 4, 1, 3, 5).reshape(B, N, P)

    x = pl.pallas_call(
        _patch_embed_kernel,
        out_shape=jax.ShapeDtypeStruct((B, N + 1, D), jnp.float32),
        grid=(B,),
        in_specs=[pl.BlockSpec((1, N, P), lambda b: (b, 0, 0)),
                  pl.BlockSpec((P, D), lambda b: (0, 0)),
                  pl.BlockSpec((1, D), lambda b: (0, 0)),
                  pl.BlockSpec((1, D), lambda b: (0, 0)),
                  pl.BlockSpec((N + 1, D), lambda b: (0, 0))],
        out_specs=pl.BlockSpec((1, N + 1, D), lambda b: (b, 0, 0)),
        compiler_params=_cparams(),
    )(patches, p['patch_w'], p['patch_b'], p['cls'], p['pos'])

    S = N + 1
    x2d = x.reshape(B * S, D)          # contiguous collapse: no data movement
    for bp in p['blocks']:
        x2d = transformer_block(x2d, bp, cfg['n_attn_heads'], S, B)
    # pool at token 0; the final per-row LN is fused into the CLIP head kernel.
    return x2d.reshape(B, S, D)[:, 0]


def txt_encoder(x_txt, p, cfg):
    B, S = x_txt.shape
    D = cfg['embed_dim']
    # embedding gather + pos add kept as plain-JAX glue.
    x2d = (p['tok_emb'][x_txt] + p['pos'][None, :S]).reshape(B * S, D)
    for bp in p['blocks']:
        x2d = transformer_block(x2d, bp, cfg['n_attn_heads'], S, B)
    # TODO(synk): reference TxtEncoder internals unknown: no causal mask applied and
    #             pooling is at position 0 (EOT/argmax pooling would differ).
    return x2d.reshape(B, S, D)[:, 0]


def clip_forward(params, x_img, x_txt, cfg):
    img_pooled = img_encoder(x_img, params['img'], cfg)   # (Bi, D) pre-final-LN
    txt_pooled = txt_encoder(x_txt, params['txt'], cfg)   # (Bt, D) pre-final-LN
    Bi, Bt = img_pooled.shape[0], txt_pooled.shape[0]

    logits_per_image = pl.pallas_call(
        _clip_head_kernel,
        out_shape=jax.ShapeDtypeStruct((Bi, Bt), jnp.float32),
        in_specs=[pl.BlockSpec(memory_space=_VMEM)] * 8,
        out_specs=pl.BlockSpec(memory_space=_VMEM),
    )(img_pooled, txt_pooled,
      params['img']['lnf_g'], params['img']['lnf_b'],
      params['txt']['lnf_g'], params['txt']['lnf_b'],
      params['mm_w'], params['logit_scale'].reshape(1, 1))

    logits_per_text = logits_per_image.T   # exactly li.T; avoid a second matmul
    return logits_per_image, logits_per_text


# ----------------------------- deterministic init -----------------------------

def init_block(key, D, Hd):
    ks = jax.random.split(key, 4)
    s = 0.02
    bf = jnp.bfloat16
    # NOTE: wqkv / bqkv columns are interpreted HEAD-MAJOR ([q_h|k_h|v_h] per head).
    # Loading PyTorch weights would require the corresponding column permutation; with
    # random init the layouts are statistically identical.
    return dict(
        ln1_g=jnp.ones((1, D), jnp.float32), ln1_b=jnp.zeros((1, D), jnp.float32),
        wqkv=(s * jax.random.normal(ks[0], (D, 3 * D), jnp.float32)).astype(bf),
        bqkv=jnp.zeros((1, 3 * D), jnp.float32),
        wo=(s * jax.random.normal(ks[1], (D, D), jnp.float32)).astype(bf),
        bo=jnp.zeros((1, D), jnp.float32),
        ln2_g=jnp.ones((1, D), jnp.float32), ln2_b=jnp.zeros((1, D), jnp.float32),
        w1=(s * jax.random.normal(ks[2], (D, Hd), jnp.float32)).astype(bf),
        b1=jnp.zeros((1, Hd), jnp.float32),
        w2=(s * jax.random.normal(ks[3], (Hd, D), jnp.float32)).astype(bf),
        b2=jnp.zeros((1, D), jnp.float32),
    )


def init_params(key, cfg):
    D, Hd = cfg['embed_dim'], cfg['hidden_dim']
    nh = cfg['img_height'] // cfg['patch_height']
    nw = cfg['img_width'] // cfg['patch_width']
    N = nh * nw
    P = cfg['img_channels'] * cfg['patch_height'] * cfg['patch_width']
    nb = cfg['num_blocks']
    keys = jax.random.split(key, 6 + 2 * nb)
    s = 0.02
    bf = jnp.bfloat16
    img = dict(
        patch_w=(s * jax.random.normal(keys[0], (P, D), jnp.float32)).astype(bf),
        patch_b=jnp.zeros((1, D), jnp.float32),
        cls=s * jax.random.normal(keys[1], (1, D), jnp.float32),
        pos=s * jax.random.normal(keys[2], (N + 1, D), jnp.float32),
        blocks=[init_block(keys[6 + i], D, Hd) for i in range(nb)],
        lnf_g=jnp.ones((1, D), jnp.float32), lnf_b=jnp.zeros((1, D), jnp.float32),
    )
    txt = dict(
        tok_emb=s * jax.random.normal(keys[3], (cfg['txt_vocab_size'], D), jnp.float32),
        pos=s * jax.random.normal(keys[4], (cfg['txt_max_length'], D), jnp.float32),
        blocks=[init_block(keys[6 + nb + i], D, Hd) for i in range(nb)],
        lnf_g=jnp.ones((1, D), jnp.float32), lnf_b=jnp.zeros((1, D), jnp.float32),
    )
    return dict(
        img=img,
        txt=txt,
        # shared multimodal projection, Linear(D, D, bias=False), stored (in, out)
        mm_w=(s * jax.random.normal(keys[5], (D, D), jnp.float32)).astype(bf),
        logit_scale=jnp.array(math.log(1.0 / 0.07), jnp.float32),
    )


# ----------------------------- main -----------------------------

if __name__ == "__main__":
    cfg = dict(img_height=16, img_width=16, img_channels=4,
               patch_height=4, patch_width=4,
               txt_max_length=8, txt_vocab_size=64,
               embed_dim=32, num_blocks=2, hidden_dim=64,
               n_attn_heads=4, dropout_prob=0.0)   # dropout is identity (eval mode)

    key = jax.random.PRNGKey(0)
    kp, ki, kt = jax.random.split(key, 3)
    params = init_params(kp, cfg)

    x_img = jax.random.normal(
        ki, (2, cfg['img_channels'], cfg['img_height'], cfg['img_width']), jnp.float32)
    x_txt = jax.random.randint(kt, (2, cfg['txt_max_length']), 0, cfg['txt_vocab_size'],
                               dtype=jnp.int32)

    fwd = jax.jit(partial(clip_forward, cfg=cfg))
    logits_per_image, logits_per_text = fwd(params, x_img, x_txt)
    jax.block_until_ready((logits_per_image, logits_per_text))

    assert logits_per_image.shape == (2, 2)
    assert logits_per_text.shape == (2, 2)
    print("KERNEL_OK")
</pallas_src>

<mosaic_0001>
module attributes {stable_mosaic.version = 11 : i64} {
  func.func @_patch_embed_kernel(%arg0: i32, %arg1: memref<1x16x64xf32, #tpu.memory_space<vmem>>, %arg2: memref<64x32xbf16, #tpu.memory_space<vmem>>, %arg3: memref<1x32xf32, #tpu.memory_space<vmem>>, %arg4: memref<1x32xf32, #tpu.memory_space<vmem>>, %arg5: memref<17x32xf32, #tpu.memory_space<vmem>>, %arg6: memref<1x17x32xf32, #tpu.memory_space<vmem>>) attributes {dimension_semantics = [#tpu.dimension_semantics<parallel>], iteration_bounds = array<i64: 2>, scalar_prefetch = 0 : i64, scratch_operands = 0 : i64, tpu.core_type = #tpu.core_type<tc>, window_params = [{transform_indices = @transform_0, window_bounds = array<i64: 1, 16, 64>}, {pipeline_mode = #tpu.pipeline_mode<synchronous>, transform_indices = @transform_1, window_bounds = array<i64: 64, 32>}, {pipeline_mode = #tpu.pipeline_mode<synchronous>, transform_indices = @transform_2, window_bounds = array<i64: 1, 32>}, {pipeline_mode = #tpu.pipeline_mode<synchronous>, transform_indices = @transform_3, window_bounds = array<i64: 1, 32>}, {pipeline_mode = #tpu.pipeline_mode<synchronous>, transform_indices = @transform_4, window_bounds = array<i64: 17, 32>}, {transform_indices = @transform_5, window_bounds = array<i64: 1, 17, 32>}]} {
    %c0 = arith.constant 0 : index
    %c0_0 = arith.constant 0 : index
    %c0_1 = arith.constant 0 : index
    %0 = vector.load %arg1[%c0, %c0_0, %c0_1] : memref<1x16x64xf32, #tpu.memory_space<vmem>>, vector<1x16x64xf32>
    %1 = vector.shape_cast %0 : vector<1x16x64xf32> to vector<16x64xf32>
    %2 = arith.truncf %1 : vector<16x64xf32> to vector<16x64xbf16>
    %c0_2 = arith.constant 0 : index
    %c0_3 = arith.constant 0 : index
    %3 = vector.load %arg2[%c0_2, %c0_3] : memref<64x32xbf16, #tpu.memory_space<vmem>>, vector<64x32xbf16>
    %cst = arith.constant dense<0.000000e+00> : vector<16x32xf32>
    %4 = tpu.matmul %2, %3, %cst {dimension_numbers = #tpu.dot_dimension_numbers<[1], [0], [0], [1], [0, 0, 1, 1], [], []>} : vector<16x64xbf16>, vector<64x32xbf16>, vector<16x32xf32> -> vector<16x32xf32>
    %c0_4 = arith.constant 0 : index
    %c0_5 = arith.constant 0 : index
    %5 = vector.load %arg3[%c0_4, %c0_5] : memref<1x32xf32, #tpu.memory_space<vmem>>, vector<1x32xf32>
    %6 = vector.broadcast %5 : vector<1x32xf32> to vector<16x32xf32>
    %7 = arith.addf %4, %6 : vector<16x32xf32>
    %c0_6 = arith.constant 0 : index
    %c0_7 = arith.constant 0 : index
    %8 = vector.load %arg5[%c0_6, %c0_7] : memref<17x32xf32, #tpu.memory_space<vmem>>, vector<17x32xf32>
    %c0_8 = arith.constant 0 : index
    %c0_9 = arith.constant 0 : index
    %9 = vector.load %arg4[%c0_8, %c0_9] : memref<1x32xf32, #tpu.memory_space<vmem>>, vector<1x32xf32>
    %10 = vector.extract_strided_slice %8 {offsets = [0, 0], sizes = [1, 32], strides = [1, 1]} : vector<17x32xf32> to vector<1x32xf32>
    %11 = arith.addf %9, %10 : vector<1x32xf32>
    %c0_10 = arith.constant 0 : index
    %c0_11 = arith.constant 0 : index
    %c0_12 = arith.constant 0 : index
    %12 = vector.load %arg6[%c0_10, %c0_11, %c0_12] : memref<1x17x32xf32, #tpu.memory_space<vmem>>, vector<1x1x32xf32>
    %13 = vector.shape_cast %12 : vector<1x1x32xf32> to vector<1x32xf32>
    %14 = vector.shape_cast %11 : vector<1x32xf32> to vector<1x1x32xf32>
    tpu.vector_store %arg6[%c0_10, %c0_11, %c0_12], %14 {strides = array<i32>} : memref<1x17x32xf32, #tpu.memory_space<vmem>>, vector<1x1x32xf32>,
    %15 = vector.extract_strided_slice %8 {offsets = [1, 0], sizes = [16, 32], strides = [1, 1]} : vector<17x32xf32> to vector<16x32xf32>
    %16 = arith.addf %7, %15 : vector<16x32xf32>
    %c0_13 = arith.constant 0 : index
    %c1 = arith.constant 1 : index
    %c0_14 = arith.constant 0 : index
    %17 = vector.load %arg6[%c0_13, %c1, %c0_14] : memref<1x17x32xf32, #tpu.memory_space<vmem>>, vector<1x16x32xf32>
    %18 = vector.shape_cast %17 : vector<1x16x32xf32> to vector<16x32xf32>
    %19 = vector.shape_cast %16 : vector<16x32xf32> to vector<1x16x32xf32>
    tpu.vector_store %arg6[%c0_13, %c1, %c0_14], %19 {strides = array<i32>} : memref<1x17x32xf32, #tpu.memory_space<vmem>>, vector<1x16x32xf32>,
    return
  }
  func.func @transform_0(%arg0: i32) -> (i32, i32, i32) {
    %c0_i32 = arith.constant 0 : i32
    %c0_i32_0 = arith.constant 0 : i32
    %c0_i32_1 = arith.constant 0 : i32
    return %arg0, %c0_i32, %c0_i32_0 : i32, i32, i32
  }
  func.func @transform_1(%arg0: i32) -> (i32, i32) {
    %c0_i32 = arith.constant 0 : i32
    %c0_i32_0 = arith.constant 0 : i32
    %c0_i32_1 = arith.constant 0 : i32
    return %c0_i32, %c0_i32_0 : i32, i32
  }
  func.func @transform_2(%arg0: i32) -> (i32, i32) {
    %c0_i32 = arith.constant 0 : i32
    %c0_i32_0 = arith.constant 0 : i32
    %c0_i32_1 = arith.constant 0 : i32
    return %c0_i32, %c0_i32_0 : i32, i32
  }
  func.func @transform_3(%arg0: i32) -> (i32, i32) {
    %c0_i32 = arith.constant 0 : i32
    %c0_i32_0 = arith.constant 0 : i32
    %c0_i32_1 = arith.constant 0 : i32
    return %c0_i32, %c0_i32_0 : i32, i32
  }
  func.func @transform_4(%arg0: i32) -> (i32, i32) {
    %c0_i32 = arith.constant 0 : i32
    %c0_i32_0 = arith.constant 0 : i32
    %c0_i32_1 = arith.constant 0 : i32
    return %c0_i32, %c0_i32_0 : i32, i32
  }
  func.func @transform_5(%arg0: i32) -> (i32, i32, i32) {
    %c0_i32 = arith.constant 0 : i32
    %c0_i32_0 = arith.constant 0 : i32
    %c0_i32_1 = arith.constant 0 : i32
    return %arg0, %c0_i32, %c0_i32_0 : i32, i32, i32
  }
}

module attributes {stable_mosaic.version = 11 : i64} {
  func.func @_block_kernel(%arg0: i32, %arg1: memref<34x32xf32, #tpu.memory_space<vmem>>, %arg2: memref<1x32xf32, #tpu.memory_space<vmem>>, %arg3: memref<1x32xf32, #tpu.memory_space<vmem>>, %arg4: memref<32x96xbf16, #tpu.memory_space<vmem>>, %arg5: memref<1x96xf32, #tpu.memory_space<vmem>>, %arg6: memref<32x32xbf16, #tpu.memory_space<vmem>>, %arg7: memref<1x32xf32, #tpu.memory_space<vmem>>, %arg8: memref<1x32xf32, #tpu.memory_space<vmem>>, %arg9: memref<1x32xf32, #tpu.memory_space<vmem>>, %arg10: memref<32x64xbf16, #tpu.memory_space<vmem>>, %arg11: memref<1x64xf32, #tpu.memory_space<vmem>>, %arg12: memref<64x32xbf16, #tpu.memory_space<vmem>>, %arg13: memref<1x32xf32, #tpu.memory_space<vmem>>, %arg14: memref<34x32xf32, #tpu.memory_space<vmem>>, %arg15: memref<34x32xf32, #tpu.memory_space<vmem>>) attributes {dimension_semantics = [#tpu.dimension_semantics<parallel>], iteration_bounds = array<i64: 1>, scalar_prefetch = 0 : i64, scratch_operands = 1 : i64, tpu.core_type = #tpu.core_type<tc>, window_params = [{transform_indices = @transform_0, window_bounds = array<i64: 34, 32>}, {pipeline_mode = #tpu.pipeline_mode<synchronous>, transform_indices = @transform_1, window_bounds = array<i64: 1, 32>}, {pipeline_mode = #tpu.pipeline_mode<synchronous>, transform_indices = @transform_2, window_bounds = array<i64: 1, 32>}, {pipeline_mode = #tpu.pipeline_mode<synchronous>, transform_indices = @transform_3, window_bounds = array<i64: 32, 96>}, {pipeline_mode = #tpu.pipeline_mode<synchronous>, transform_indices = @transform_4, window_bounds = array<i64: 1, 96>}, {pipeline_mode = #tpu.pipeline_mode<synchronous>, transform_indices = @transform_5, window_bounds = array<i64: 32, 32>}, {pipeline_mode = #tpu.pipeline_mode<synchronous>, transform_indices = @transform_6, window_bounds = array<i64: 1, 32>}, {pipeline_mode = #tpu.pipeline_mode<synchronous>, transform_indices = @transform_7, window_bounds = array<i64: 1, 32>}, {pipeline_mode = #tpu.pipeline_mode<synchronous>, transform_indices = @transform_8, window_bounds = array<i64: 1, 32>}, {pipeline_mode = #tpu.pipeline_mode<synchronous>, transform_indices = @transform_9, window_bounds = array<i64: 32, 64>}, {pipeline_mode = #tpu.pipeline_mode<synchronous>, transform_indices = @transform_10, window_bounds = array<i64: 1, 64>}, {pipeline_mode = #tpu.pipeline_mode<synchronous>, transform_indices = @transform_11, window_bounds = array<i64: 64, 32>}, {pipeline_mode = #tpu.pipeline_mode<synchronous>, transform_indices = @transform_12, window_bounds = array<i64: 1, 32>}, {transform_indices = @transform_13, window_bounds = array<i64: 34, 32>}]} {
    %c0 = arith.constant 0 : index
    %c0_0 = arith.constant 0 : index
    %0 = vector.load %arg1[%c0, %c0_0] : memref<34x32xf32, #tpu.memory_space<vmem>>, vector<34x32xf32>
    %c0_1 = arith.constant 0 : index
    %c0_2 = arith.constant 0 : index
    %1 = vector.load %arg2[%c0_1, %c0_2] : memref<1x32xf32, #tpu.memory_space<vmem>>, vector<1x32xf32>
    %c0_3 = arith.constant 0 : index
    %c0_4 = arith.constant 0 : index
    %2 = vector.load %arg3[%c0_3, %c0_4] : memref<1x32xf32, #tpu.memory_space<vmem>>, vector<1x32xf32>
    %cst = arith.constant dense<0.000000e+00> : vector<34xf32>
    %3 = vector.multi_reduction <add>, %0, %cst [1] : vector<34x32xf32> to vector<34xf32>
    %4 = vector.shape_cast %3 : vector<34xf32> to vector<34x1xf32>
    %cst_5 = arith.constant 3.200000e+01 : f32
    %5 = vector.broadcast %cst_5 : f32 to vector<34x1xf32>
    %6 = arith.divf %4, %5 : vector<34x1xf32>
    %7 = vector.broadcast %6 : vector<34x1xf32> to vector<34x32xf32>
    %8 = arith.subf %0, %7 : vector<34x32xf32>
    %9 = vector.broadcast %6 : vector<34x1xf32> to vector<34x32xf32>
    %10 = arith.subf %0, %9 : vector<34x32xf32>
    %11 = arith.mulf %8, %10 : vector<34x32xf32>
    %cst_6 = arith.constant dense<0.000000e+00> : vector<34xf32>
    %12 = vector.multi_reduction <add>, %11, %cst_6 [1] : vector<34x32xf32> to vector<34xf32>
    %13 = vector.shape_cast %12 : vector<34xf32> to vector<34x1xf32>
    %cst_7 = arith.constant 3.200000e+01 : f32
    %14 = vector.broadcast %cst_7 : f32 to vector<34x1xf32>
    %15 = arith.divf %13, %14 : vector<34x1xf32>
    %16 = vector.broadcast %6 : vector<34x1xf32> to vector<34x32xf32>
    %17 = arith.subf %0, %16 : vector<34x32xf32>
    %cst_8 = arith.constant 9.99999974E-6 : f32
    %18 = vector.broadcast %cst_8 : f32 to vector<34x1xf32>
    %19 = arith.addf %15, %18 : vector<34x1xf32>
    %20 = math.rsqrt %19 : vector<34x1xf32>
    %21 = vector.broadcast %20 : vector<34x1xf32> to vector<34x32xf32>
    %22 = arith.mulf %17, %21 : vector<34x32xf32>
    %23 = vector.broadcast %1 : vector<1x32xf32> to vector<34x32xf32>
    %24 = arith.mulf %22, %23 : vector<34x32xf32>
    %25 = vector.broadcast %2 : vector<1x32xf32> to vector<34x32xf32>
    %26 = arith.addf %24, %25 : vector<34x32xf32>
    %27 = arith.truncf %26 : vector<34x32xf32> to vector<34x32xbf16>
    %c0_9 = arith.constant 0 : index
    %c0_10 = arith.constant 0 : index
    %28 = vector.load %arg4[%c0_9, %c0_10] : memref<32x96xbf16, #tpu.memory_space<vmem>>, vector<32x96xbf16>
    %cst_11 = arith.constant dense<0.000000e+00> : vector<34x96xf32>
    %29 = tpu.matmul %27, %28, %cst_11 {dimension_numbers = #tpu.dot_dimension_numbers<[1], [0], [0], [1], [0, 0, 1, 1], [], []>} : vector<34x32xbf16>, vector<32x96xbf16>, vector<34x96xf32> -> vector<34x96xf32>
    %c0_12 = arith.constant 0 : index
    %c0_13 = arith.constant 0 : index
    %30 = vector.load %arg5[%c0_12, %c0_13] : memref<1x96xf32, #tpu.memory_space<vmem>>, vector<1x96xf32>
    %31 = vector.broadcast %30 : vector<1x96xf32> to vector<34x96xf32>
    %32 = arith.addf %29, %31 : vector<34x96xf32>
    %33 = vector.extract_strided_slice %32 {offsets = [0, 0], sizes = [17, 24], strides = [1, 1]} : vector<34x96xf32> to vector<17x24xf32>
    %34 = vector.extract_strided_slice %33 {offsets = [0, 0], sizes = [17, 8], strides = [1, 1]} : vector<17x24xf32> to vector<17x8xf32>
    %35 = arith.truncf %34 : vector<17x8xf32> to vector<17x8xbf16>
    %36 = vector.extract_strided_slice %33 {offsets = [0, 8], sizes = [17, 8], strides = [1, 1]} : vector<17x24xf32> to vector<17x8xf32>
    %37 = arith.truncf %36 : vector<17x8xf32> to vector<17x8xbf16>
    %38 = vector.extract_strided_slice %33 {offsets = [0, 16], sizes = [17, 8], strides = [1, 1]} : vector<17x24xf32> to vector<17x8xf32>
    %39 = arith.truncf %38 : vector<17x8xf32> to vector<17x8xbf16>
    %cst_14 = arith.constant dense<0.000000e+00> : vector<17x17xf32>
    %40 = tpu.matmul %35, %37, %cst_14 {dimension_numbers = #tpu.dot_dimension_numbers<[1], [1], [0], [0], [0, 0, 1, 0], [], []>} : vector<17x8xbf16>, vector<17x8xbf16>, vector<17x17xf32> -> vector<17x17xf32>
    %cst_15 = arith.constant 0.353553385 : f32
    %41 = vector.broadcast %cst_15 : f32 to vector<17x17xf32>
    %42 = arith.mulf %40, %41 : vector<17x17xf32>
    %cst_16 = arith.constant dense<0xFF800000> : vector<17xf32>
    %43 = vector.multi_reduction <maximumf>, %42, %cst_16 [1] : vector<17x17xf32> to vector<17xf32>
    %44 = vector.shape_cast %43 : vector<17xf32> to vector<17x1xf32>
    %45 = vector.broadcast %44 : vector<17x1xf32> to vector<17x17xf32>
    %46 = arith.subf %42, %45 : vector<17x17xf32>
    %47 = arith.truncf %46 : vector<17x17xf32> to vector<17x17xbf16>
    %48 = math.exp %47 : vector<17x17xbf16>
    %49 = arith.extf %48 : vector<17x17xbf16> to vector<17x17xf32>
    %cst_17 = arith.constant dense<0.000000e+00> : vector<17xf32>
    %50 = vector.multi_reduction <add>, %49, %cst_17 [1] : vector<17x17xf32> to vector<17xf32>
    %51 = vector.shape_cast %50 : vector<17xf32> to vector<17x1xf32>
    %cst_18 = arith.constant dense<0.000000e+00> : vector<17x8xf32>
    %52 = tpu.matmul %48, %39, %cst_18 {dimension_numbers = #tpu.dot_dimension_numbers<[1], [0], [0], [1], [0, 0, 1, 1], [], []>} : vector<17x17xbf16>, vector<17x8xbf16>, vector<17x8xf32> -> vector<17x8xf32>
    %53 = tpu.reciprocal %51 {approx = true} : vector<17x1xf32> -> vector<17x1xf32>
    %54 = vector.broadcast %53 : vector<17x1xf32> to vector<17x8xf32>
    %55 = arith.mulf %52, %54 : vector<17x8xf32>
    %c0_19 = arith.constant 0 : index
    %c0_20 = arith.constant 0 : index
    %56 = vector.load %arg15[%c0_19, %c0_20] : memref<34x32xf32, #tpu.memory_space<vmem>>, vector<17x8xf32>
    tpu.vector_store %arg15[%c0_19, %c0_20], %55 {strides = array<i32>} : memref<34x32xf32, #tpu.memory_space<vmem>>, vector<17x8xf32>,
    %57 = vector.extract_strided_slice %32 {offsets = [0, 24], sizes = [17, 24], strides = [1, 1]} : vector<34x96xf32> to vector<17x24xf32>
    %58 = vector.extract_strided_slice %57 {offsets = [0, 0], sizes = [17, 8], strides = [1, 1]} : vector<17x24xf32> to vector<17x8xf32>
    %59 = arith.truncf %58 : vector<17x8xf32> to vector<17x8xbf16>
    %60 = vector.extract_strided_slice %57 {offsets = [0, 8], sizes = [17, 8], strides = [1, 1]} : vector<17x24xf32> to vector<17x8xf32>
    %61 = arith.truncf %60 : vector<17x8xf32> to vector<17x8xbf16>
    %62 = vector.extract_strided_slice %57 {offsets = [0, 16], sizes = [17, 8], strides = [1, 1]} : vector<17x24xf32> to vector<17x8xf32>
    %63 = arith.truncf %62 : vector<17x8xf32> to vector<17x8xbf16>
    %cst_21 = arith.constant dense<0.000000e+00> : vector<17x17xf32>
    %64 = tpu.matmul %59, %61, %cst_21 {dimension_numbers = #tpu.dot_dimension_numbers<[1], [1], [0], [0], [0, 0, 1, 0], [], []>} : vector<17x8xbf16>, vector<17x8xbf16>, vector<17x17xf32> -> vector<17x17xf32>
    %cst_22 = arith.constant 0.353553385 : f32
    %65 = vector.broadcast %cst_22 : f32 to vector<17x17xf32>
    %66 = arith.mulf %64, %65 : vector<17x17xf32>
    %cst_23 = arith.constant dense<0xFF800000> : vector<17xf32>
    %67 = vector.multi_reduction <maximumf>, %66, %cst_23 [1] : vector<17x17xf32> to vector<17xf32>
    %68 = vector.shape_cast %67 : vector<17xf32> to vector<17x1xf32>
    %69 = vector.broadcast %68 : vector<17x1xf32> to vector<17x17xf32>
    %70 = arith.subf %66, %69 : vector<17x17xf32>
    %71 = arith.truncf %70 : vector<17x17xf32> to vector<17x17xbf16>
    %72 = math.exp %71 : vector<17x17xbf16>
    %73 = arith.extf %72 : vector<17x17xbf16> to vector<17x17xf32>
    %cst_24 = arith.constant dense<0.000000e+00> : vector<17xf32>
    %74 = vector.multi_reduction <add>, %73, %cst_24 [1] : vector<17x17xf32> to vector<17xf32>
    %75 = vector.shape_cast %74 : vector<17xf32> to vector<17x1xf32>
    %cst_25 = arith.constant dense<0.000000e+00> : vector<17x8xf32>
    %76 = tpu.matmul %72, %63, %cst_25 {dimension_numbers = #tpu.dot_dimension_numbers<[1], [0], [0], [1], [0, 0, 1, 1], [], []>} : vector<17x17xbf16>, vector<17x8xbf16>, vector<17x8xf32> -> vector<17x8xf32>
    %77 = tpu.reciprocal %75 {approx = true} : vector<17x1xf32> -> vector<17x1xf32>
    %78 = vector.broadcast %77 : vector<17x1xf32> to vector<17x8xf32>
    %79 = arith.mulf %76, %78 : vector<17x8xf32>
    %c0_26 = arith.constant 0 : index
    %c8 = arith.constant 8 : index
    %80 = vector.load %arg15[%c0_26, %c8] : memref<34x32xf32, #tpu.memory_space<vmem>>, vector<17x8xf32>
    tpu.vector_store %arg15[%c0_26, %c8], %79 {strides = array<i32>} : memref<34x32xf32, #tpu.memory_space<vmem>>, vector<17x8xf32>,
    %81 = vector.extract_strided_slice %32 {offsets = [0, 48], sizes = [17, 24], strides = [1, 1]} : vector<34x96xf32> to vector<17x24xf32>
    %82 = vector.extract_strided_slice %81 {offsets = [0, 0], sizes = [17, 8], strides = [1, 1]} : vector<17x24xf32> to vector<17x8xf32>
    %83 = arith.truncf %82 : vector<17x8xf32> to vector<17x8xbf16>
    %84 = vector.extract_strided_slice %81 {offsets = [0, 8], sizes = [17, 8], strides = [1, 1]} : vector<17x24xf32> to vector<17x8xf32>
    %85 = arith.truncf %84 : vector<17x8xf32> to vector<17x8xbf16>
    %86 = vector.extract_strided_slice %81 {offsets = [0, 16], sizes = [17, 8], strides = [1, 1]} : vector<17x24xf32> to vector<17x8xf32>
    %87 = arith.truncf %86 : vector<17x8xf32> to vector<17x8xbf16>
    %cst_27 = arith.constant dense<0.000000e+00> : vector<17x17xf32>
    %88 = tpu.matmul %83, %85, %cst_27 {dimension_numbers = #tpu.dot_dimension_numbers<[1], [1], [0], [0], [0, 0, 1, 0], [], []>} : vector<17x8xbf16>, vector<17x8xbf16>, vector<17x17xf32> -> vector<17x17xf32>
    %cst_28 = arith.constant 0.353553385 : f32
    %89 = vector.broadcast %cst_28 : f32 to vector<17x17xf32>
    %90 = arith.mulf %88, %89 : vector<17x17xf32>
    %cst_29 = arith.constant dense<0xFF800000> : vector<17xf32>
    %91 = vector.multi_reduction <maximumf>, %90, %cst_29 [1] : vector<17x17xf32> to vector<17xf32>
    %92 = vector.shape_cast %91 : vector<17xf32> to vector<17x1xf32>
    %93 = vector.broadcast %92 : vector<17x1xf32> to vector<17x17xf32>
    %94 = arith.subf %90, %93 : vector<17x17xf32>
    %95 = arith.truncf %94 : vector<17x17xf32> to vector<17x17xbf16>
    %96 = math.exp %95 : vector<17x17xbf16>
    %97 = arith.extf %96 : vector<17x17xbf16> to vector<17x17xf32>
    %cst_30 = arith.constant dense<0.000000e+00> : vector<17xf32>
    %98 = vector.multi_reduction <add>, %97, %cst_30 [1] : vector<17x17xf32> to vector<17xf32>
    %99 = vector.shape_cast %98 : vector<17xf32> to vector<17x1xf32>
    %cst_31 = arith.constant dense<0.000000e+00> : vector<17x8xf32>
    %100 = tpu.matmul %96, %87, %cst_31 {dimension_numbers = #tpu.dot_dimension_numbers<[1], [0], [0], [1], [0, 0, 1, 1], [], []>} : vector<17x17xbf16>, vector<17x8xbf16>, vector<17x8xf32> -> vector<17x8xf32>
    %101 = tpu.reciprocal %99 {approx = true} : vector<17x1xf32> -> vector<17x1xf32>
    %102 = vector.broadcast %101 : vector<17x1xf32> to vector<17x8xf32>
    %103 = arith.mulf %100, %102 : vector<17x8xf32>
    %c0_32 = arith.constant 0 : index
    %c16 = arith.constant 16 : index
    %104 = vector.load %arg15[%c0_32, %c16] : memref<34x32xf32, #tpu.memory_space<vmem>>, vector<17x8xf32>
    tpu.vector_store %arg15[%c0_32, %c16], %103 {strides = array<i32>} : memref<34x32xf32, #tpu.memory_space<vmem>>, vector<17x8xf32>,
    %105 = vector.extract_strided_slice %32 {offsets = [0, 72], sizes = [17, 24], strides = [1, 1]} : vector<34x96xf32> to vector<17x24xf32>
    %106 = vector.extract_strided_slice %105 {offsets = [0, 0], sizes = [17, 8], strides = [1, 1]} : vector<17x24xf32> to vector<17x8xf32>
    %107 = arith.truncf %106 : vector<17x8xf32> to vector<17x8xbf16>
    %108 = vector.extract_strided_slice %105 {offsets = [0, 8], sizes = [17, 8], strides = [1, 1]} : vector<17x24xf32> to vector<17x8xf32>
    %109 = arith.truncf %108 : vector<17x8xf32> to vector<17x8xbf16>
    %110 = vector.extract_strided_slice %105 {offsets = [0, 16], sizes = [17, 8], strides = [1, 1]} : vector<17x24xf32> to vector<17x8xf32>
    %111 = arith.truncf %110 : vector<17x8xf32> to vector<17x8xbf16>
    %cst_33 = arith.constant dense<0.000000e+00> : vector<17x17xf32>
    %112 = tpu.matmul %107, %109, %cst_33 {dimension_numbers = #tpu.dot_dimension_numbers<[1], [1], [0], [0], [0, 0, 1, 0], [], []>} : vector<17x8xbf16>, vector<17x8xbf16>, vector<17x17xf32> -> vector<17x17xf32>
    %cst_34 = arith.constant 0.353553385 : f32
    %113 = vector.broadcast %cst_34 : f32 to vector<17x17xf32>
    %114 = arith.mulf %112, %113 : vector<17x17xf32>
    %cst_35 = arith.constant dense<0xFF800000> : vector<17xf32>
    %115 = vector.multi_reduction <maximumf>, %114, %cst_35 [1] : vector<17x17xf32> to vector<17xf32>
    %116 = vector.shape_cast %115 : vector<17xf32> to vector<17x1xf32>
    %117 = vector.broadcast %116 : vector<17x1xf32> to vector<17x17xf32>
    %118 = arith.subf %114, %117 : vector<17x17xf32>
    %119 = arith.truncf %118 : vector<17x17xf32> to vector<17x17xbf16>
    %120 = math.exp %119 : vector<17x17xbf16>
    %121 = arith.extf %120 : vector<17x17xbf16> to vector<17x17xf32>
    %cst_36 = arith.constant dense<0.000000e+00> : vector<17xf32>
    %122 = vector.multi_reduction <add>, %121, %cst_36 [1] : vector<17x17xf32> to vector<17xf32>
    %123 = vector.shape_cast %122 : vector<17xf32> to vector<17x1xf32>
    %cst_37 = arith.constant dense<0.000000e+00> : vector<17x8xf32>
    %124 = tpu.matmul %120, %111, %cst_37 {dimension_numbers = #tpu.dot_dimension_numbers<[1], [0], [0], [1], [0, 0, 1, 1], [], []>} : vector<17x17xbf16>, vector<17x8xbf16>, vector<17x8xf32> -> vector<17x8xf32>
    %125 = tpu.reciprocal %123 {approx = true} : vector<17x1xf32> -> vector<17x1xf32>
    %126 = vector.broadcast %125 : vector<17x1xf32> to vector<17x8xf32>
    %127 = arith.mulf %124, %126 : vector<17x8xf32>
    %c0_38 = arith.constant 0 : index
    %c24 = arith.constant 24 : index
    %128 = vector.load %arg15[%c0_38, %c24] : memref<34x32xf32, #tpu.memory_space<vmem>>, vector<17x8xf32>
    tpu.vector_store %arg15[%c0_38, %c24], %127 {strides = array<i32>} : memref<34x32xf32, #tpu.memory_space<vmem>>, vector<17x8xf32>,
    %129 = vector.extract_strided_slice %32 {offsets = [17, 0], sizes = [17, 24], strides = [1, 1]} : vector<34x96xf32> to vector<17x24xf32>
    %130 = vector.extract_strided_slice %129 {offsets = [0, 0], sizes = [17, 8], strides = [1, 1]} : vector<17x24xf32> to vector<17x8xf32>
    %131 = arith.truncf %130 : vector<17x8xf32> to vector<17x8xbf16>
    %132 = vector.extract_strided_slice %129 {offsets = [0, 8], sizes = [17, 8], strides = [1, 1]} : vector<17x24xf32> to vector<17x8xf32>
    %133 = arith.truncf %132 : vector<17x8xf32> to vector<17x8xbf16>
    %134 = vector.extract_strided_slice %129 {offsets = [0, 16], sizes = [17, 8], strides = [1, 1]} : vector<17x24xf32> to vector<17x8xf32>
    %135 = arith.truncf %134 : vector<17x8xf32> to vector<17x8xbf16>
    %cst_39 = arith.constant dense<0.000000e+00> : vector<17x17xf32>
    %136 = tpu.matmul %131, %133, %cst_39 {dimension_numbers = #tpu.dot_dimension_numbers<[1], [1], [0], [0], [0, 0, 1, 0], [], []>} : vector<17x8xbf16>, vector<17x8xbf16>, vector<17x17xf32> -> vector<17x17xf32>
    %cst_40 = arith.constant 0.353553385 : f32
    %137 = vector.broadcast %cst_40 : f32 to vector<17x17xf32>
    %138 = arith.mulf %136, %137 : vector<17x17xf32>
    %cst_41 = arith.constant dense<0xFF800000> : vector<17xf32>
    %139 = vector.multi_reduction <maximumf>, %138, %cst_41 [1] : vector<17x17xf32> to vector<17xf32>
    %140 = vector.shape_cast %139 : vector<17xf32> to vector<17x1xf32>
    %141 = vector.broadcast %140 : vector<17x1xf32> to vector<17x17xf32>
    %142 = arith.subf %138, %141 : vector<17x17xf32>
    %143 = arith.truncf %142 : vector<17x17xf32> to vector<17x17xbf16>
    %144 = math.exp %143 : vector<17x17xbf16>
    %145 = arith.extf %144 : vector<17x17xbf16> to vector<17x17xf32>
    %cst_42 = arith.constant dense<0.000000e+00> : vector<17xf32>
    %146 = vector.multi_reduction <add>, %145, %cst_42 [1] : vector<17x17xf32> to vector<17xf32>
    %147 = vector.shape_cast %146 : vector<17xf32> to vector<17x1xf32>
    %cst_43 = arith.constant dense<0.000000e+00> : vector<17x8xf32>
    %148 = tpu.matmul %144, %135, %cst_43 {dimension_numbers = #tpu.dot_dimension_numbers<[1], [0], [0], [1], [0, 0, 1, 1], [], []>} : vector<17x17xbf16>, vector<17x8xbf16>, vector<17x8xf32> -> vector<17x8xf32>
    %149 = tpu.reciprocal %147 {approx = true} : vector<17x1xf32> -> vector<17x1xf32>
    %150 = vector.broadcast %149 : vector<17x1xf32> to vector<17x8xf32>
    %151 = arith.mulf %148, %150 : vector<17x8xf32>
    %c17 = arith.constant 17 : index
    %c0_44 = arith.constant 0 : index
    %152 = vector.load %arg15[%c17, %c0_44] : memref<34x32xf32, #tpu.memory_space<vmem>>, vector<17x8xf32>
    tpu.vector_store %arg15[%c17, %c0_44], %151 {strides = array<i32>} : memref<34x32xf32, #tpu.memory_space<vmem>>, vector<17x8xf32>,
    %153 = vector.extract_strided_slice %32 {offsets = [17, 24], sizes = [17, 24], strides = [1, 1]} : vector<34x96xf32> to vector<17x24xf32>
    %154 = vector.extract_strided_slice %153 {offsets = [0, 0], sizes = [17, 8], strides = [1, 1]} : vector<17x24xf32> to vector<17x8xf32>
    %155 = arith.truncf %154 : vector<17x8xf32> to vector<17x8xbf16>
    %156 = vector.extract_strided_slice %153 {offsets = [0, 8], sizes = [17, 8], strides = [1, 1]} : vector<17x24xf32> to vector<17x8xf32>
    %157 = arith.truncf %156 : vector<17x8xf32> to vector<17x8xbf16>
    %158 = vector.extract_strided_slice %153 {offsets = [0, 16], sizes = [17, 8], strides = [1, 1]} : vector<17x24xf32> to vector<17x8xf32>
    %159 = arith.truncf %158 : vector<17x8xf32> to vector<17x8xbf16>
    %cst_45 = arith.constant dense<0.000000e+00> : vector<17x17xf32>
    %160 = tpu.matmul %155, %157, %cst_45 {dimension_numbers = #tpu.dot_dimension_numbers<[1], [1], [0], [0], [0, 0, 1, 0], [], []>} : vector<17x8xbf16>, vector<17x8xbf16>, vector<17x17xf32> -> vector<17x17xf32>
    %cst_46 = arith.constant 0.353553385 : f32
    %161 = vector.broadcast %cst_46 : f32 to vector<17x17xf32>
    %162 = arith.mulf %160, %161 : vector<17x17xf32>
    %cst_47 = arith.constant dense<0xFF800000> : vector<17xf32>
    %163 = vector.multi_reduction <maximumf>, %162, %cst_47 [1] : vector<17x17xf32> to vector<17xf32>
    %164 = vector.shape_cast %163 : vector<17xf32> to vector<17x1xf32>
    %165 = vector.broadcast %164 : vector<17x1xf32> to vector<17x17xf32>
    %166 = arith.subf %162, %165 : vector<17x17xf32>
    %167 = arith.truncf %166 : vector<17x17xf32> to vector<17x17xbf16>
    %168 = math.exp %167 : vector<17x17xbf16>
    %169 = arith.extf %168 : vector<17x17xbf16> to vector<17x17xf32>
    %cst_48 = arith.constant dense<0.000000e+00> : vector<17xf32>
    %170 = vector.multi_reduction <add>, %169, %cst_48 [1] : vector<17x17xf32> to vector<17xf32>
    %171 = vector.shape_cast %170 : vector<17xf32> to vector<17x1xf32>
    %cst_49 = arith.constant dense<0.000000e+00> : vector<17x8xf32>
    %172 = tpu.matmul %168, %159, %cst_49 {dimension_numbers = #tpu.dot_dimension_numbers<[1], [0], [0], [1], [0, 0, 1, 1], [], []>} : vector<17x17xbf16>, vector<17x8xbf16>, vector<17x8xf32> -> vector<17x8xf32>
    %173 = tpu.reciprocal %171 {approx = true} : vector<17x1xf32> -> vector<17x1xf32>
    %174 = vector.broadcast %173 : vector<17x1xf32> to vector<17x8xf32>
    %175 = arith.mulf %172, %174 : vector<17x8xf32>
    %c17_50 = arith.constant 17 : index
    %c8_51 = arith.constant 8 : index
    %176 = vector.load %arg15[%c17_50, %c8_51] : memref<34x32xf32, #tpu.memory_space<vmem>>, vector<17x8xf32>
    tpu.vector_store %arg15[%c17_50, %c8_51], %175 {strides = array<i32>} : memref<34x32xf32, #tpu.memory_space<vmem>>, vector<17x8xf32>,
    %177 = vector.extract_strided_slice %32 {offsets = [17, 48], sizes = [17, 24], strides = [1, 1]} : vector<34x96xf32> to vector<17x24xf32>
    %178 = vector.extract_strided_slice %177 {offsets = [0, 0], sizes = [17, 8], strides = [1, 1]} : vector<17x24xf32> to vector<17x8xf32>
    %179 = arith.truncf %178 : vector<17x8xf32> to vector<17x8xbf16>
    %180 = vector.extract_strided_slice %177 {offsets = [0, 8], sizes = [17, 8], strides = [1, 1]} : vector<17x24xf32> to vector<17x8xf32>
    %181 = arith.truncf %180 : vector<17x8xf32> to vector<17x8xbf16>
    %182 = vector.extract_strided_slice %177 {offsets = [0, 16], sizes = [17, 8], strides = [1, 1]} : vector<17x24xf32> to vector<17x8xf32>
    %183 = arith.truncf %182 : vector<17x8xf32> to vector<17x8xbf16>
    %cst_52 = arith.constant dense<0.000000e+00> : vector<17x17xf32>
    %184 = tpu.matmul %179, %181, %cst_52 {dimension_numbers = #tpu.dot_dimension_numbers<[1], [1], [0], [0], [0, 0, 1, 0], [], []>} : vector<17x8xbf16>, vector<17x8xbf16>, vector<17x17xf32> -> vector<17x17xf32>
    %cst_53 = arith.constant 0.353553385 : f32
    %185 = vector.broadcast %cst_53 : f32 to vector<17x17xf32>
    %186 = arith.mulf %184, %185 : vector<17x17xf32>
    %cst_54 = arith.constant dense<0xFF800000> : vector<17xf32>
    %187 = vector.multi_reduction <maximumf>, %186, %cst_54 [1] : vector<17x17xf32> to vector<17xf32>
    %188 = vector.shape_cast %187 : vector<17xf32> to vector<17x1xf32>
    %189 = vector.broadcast %188 : vector<17x1xf32> to vector<17x17xf32>
    %190 = arith.subf %186, %189 : vector<17x17xf32>
    %191 = arith.truncf %190 : vector<17x17xf32> to vector<17x17xbf16>
    %192 = math.exp %191 : vector<17x17xbf16>
    %193 = arith.extf %192 : vector<17x17xbf16> to vector<17x17xf32>
    %cst_55 = arith.constant dense<0.000000e+00> : vector<17xf32>
    %194 = vector.multi_reduction <add>, %193, %cst_55 [1] : vector<17x17xf32> to vector<17xf32>
    %195 = vector.shape_cast %194 : vector<17xf32> to vector<17x1xf32>
    %cst_56 = arith.constant dense<0.000000e+00> : vector<17x8xf32>
    %196 = tpu.matmul %192, %183, %cst_56 {dimension_numbers = #tpu.dot_dimension_numbers<[1], [0], [0], [1], [0, 0, 1, 1], [], []>} : vector<17x17xbf16>, vector<17x8xbf16>, vector<17x8xf32> -> vector<17x8xf32>
    %197 = tpu.reciprocal %195 {approx = true} : vector<17x1xf32> -> vector<17x1xf32>
    %198 = vector.broadcast %197 : vector<17x1xf32> to vector<17x8xf32>
    %199 = arith.mulf %196, %198 : vector<17x8xf32>
    %c17_57 = arith.constant 17 : index
    %c16_58 = arith.constant 16 : index
    %200 = vector.load %arg15[%c17_57, %c16_58] : memref<34x32xf32, #tpu.memory_space<vmem>>, vector<17x8xf32>
    tpu.vector_store %arg15[%c17_57, %c16_58], %199 {strides = array<i32>} : memref<34x32xf32, #tpu.memory_space<vmem>>, vector<17x8xf32>,
    %201 = vector.extract_strided_slice %32 {offsets = [17, 72], sizes = [17, 24], strides = [1, 1]} : vector<34x96xf32> to vector<17x24xf32>
    %202 = vector.extract_strided_slice %201 {offsets = [0, 0], sizes = [17, 8], strides = [1, 1]} : vector<17x24xf32> to vector<17x8xf32>
    %203 = arith.truncf %202 : vector<17x8xf32> to vector<17x8xbf16>
    %204 = vector.extract_strided_slice %201 {offsets = [0, 8], sizes = [17, 8], strides = [1, 1]} : vector<17x24xf32> to vector<17x8xf32>
    %205 = arith.truncf %204 : vector<17x8xf32> to vector<17x8xbf16>
    %206 = vector.extract_strided_slice %201 {offsets = [0, 16], sizes = [17, 8], strides = [1, 1]} : vector<17x24xf32> to vector<17x8xf32>
    %207 = arith.truncf %206 : vector<17x8xf32> to vector<17x8xbf16>
    %cst_59 = arith.constant dense<0.000000e+00> : vector<17x17xf32>
    %208 = tpu.matmul %203, %205, %cst_59 {dimension_numbers = #tpu.dot_dimension_numbers<[1], [1], [0], [0], [0, 0, 1, 0], [], []>} : vector<17x8xbf16>, vector<17x8xbf16>, vector<17x17xf32> -> vector<17x17xf32>
    %cst_60 = arith.constant 0.353553385 : f32
    %209 = vector.broadcast %cst_60 : f32 to vector<17x17xf32>
    %210 = arith.mulf %208, %209 : vector<17x17xf32>
    %cst_61 = arith.constant dense<0xFF800000> : vector<17xf32>
    %211 = vector.multi_reduction <maximumf>, %210, %cst_61 [1] : vector<17x17xf32> to vector<17xf32>
    %212 = vector.shape_cast %211 : vector<17xf32> to vector<17x1xf32>
    %213 = vector.broadcast %212 : vector<17x1xf32> to vector<17x17xf32>
    %214 = arith.subf %210, %213 : vector<17x17xf32>
    %215 = arith.truncf %214 : vector<17x17xf32> to vector<17x17xbf16>
    %216 = math.exp %215 : vector<17x17xbf16>
    %217 = arith.extf %216 : vector<17x17xbf16> to vector<17x17xf32>
    %cst_62 = arith.constant dense<0.000000e+00> : vector<17xf32>
    %218 = vector.multi_reduction <add>, %217, %cst_62 [1] : vector<17x17xf32> to vector<17xf32>
    %219 = vector.shape_cast %218 : vector<17xf32> to vector<17x1xf32>
    %cst_63 = arith.constant dense<0.000000e+00> : vector<17x8xf32>
    %220 = tpu.matmul %216, %207, %cst_63 {dimension_numbers = #tpu.dot_dimension_numbers<[1], [0], [0], [1], [0, 0, 1, 1], [], []>} : vector<17x17xbf16>, vector<17x8xbf16>, vector<17x8xf32> -> vector<17x8xf32>
    %221 = tpu.reciprocal %219 {approx = true} : vector<17x1xf32> -> vector<17x1xf32>
    %222 = vector.broadcast %221 : vector<17x1xf32> to vector<17x8xf32>
    %223 = arith.mulf %220, %222 : vector<17x8xf32>
    %c17_64 = arith.constant 17 : index
    %c24_65 = arith.constant 24 : index
    %224 = vector.load %arg15[%c17_64, %c24_65] : memref<34x32xf32, #tpu.memory_space<vmem>>, vector<17x8xf32>
    tpu.vector_store %arg15[%c17_64, %c24_65], %223 {strides = array<i32>} : memref<34x32xf32, #tpu.memory_space<vmem>>, vector<17x8xf32>,
    %c0_66 = arith.constant 0 : index
    %c0_67 = arith.constant 0 : index
    %225 = vector.load %arg15[%c0_66, %c0_67] : memref<34x32xf32, #tpu.memory_space<vmem>>, vector<34x32xf32>
    %226 = arith.truncf %225 : vector<34x32xf32> to vector<34x32xbf16>
    %c0_68 = arith.constant 0 : index
    %c0_69 = arith.constant 0 : index
    %227 = vector.load %arg6[%c0_68, %c0_69] : memref<32x32xbf16, #tpu.memory_space<vmem>>, vector<32x32xbf16>
    %cst_70 = arith.constant dense<0.000000e+00> : vector<34x32xf32>
    %228 = tpu.matmul %226, %227, %cst_70 {dimension_numbers = #tpu.dot_dimension_numbers<[1], [0], [0], [1], [0, 0, 1, 1], [], []>} : vector<34x32xbf16>, vector<32x32xbf16>, vector<34x32xf32> -> vector<34x32xf32>
    %229 = arith.addf %0, %228 : vector<34x32xf32>
    %c0_71 = arith.constant 0 : index
    %c0_72 = arith.constant 0 : index
    %230 = vector.load %arg7[%c0_71, %c0_72] : memref<1x32xf32, #tpu.memory_space<vmem>>, vector<1x32xf32>
    %231 = vector.broadcast %230 : vector<1x32xf32> to vector<34x32xf32>
    %232 = arith.addf %229, %231 : vector<34x32xf32>
    %c0_73 = arith.constant 0 : index
    %c0_74 = arith.constant 0 : index
    %233 = vector.load %arg8[%c0_73, %c0_74] : memref<1x32xf32, #tpu.memory_space<vmem>>, vector<1x32xf32>
    %c0_75 = arith.constant 0 : index
    %c0_76 = arith.constant 0 : index
    %234 = vector.load %arg9[%c0_75, %c0_76] : memref<1x32xf32, #tpu.memory_space<vmem>>, vector<1x32xf32>
    %cst_77 = arith.constant dense<0.000000e+00> : vector<34xf32>
    %235 = vector.multi_reduction <add>, %232, %cst_77 [1] : vector<34x32xf32> to vector<34xf32>
    %236 = vector.shape_cast %235 : vector<34xf32> to vector<34x1xf32>
    %cst_78 = arith.constant 3.200000e+01 : f32
    %237 = vector.broadcast %cst_78 : f32 to vector<34x1xf32>
    %238 = arith.divf %236, %237 : vector<34x1xf32>
    %239 = vector.broadcast %238 : vector<34x1xf32> to vector<34x32xf32>
    %240 = arith.subf %232, %239 : vector<34x32xf32>
    %241 = vector.broadcast %238 : vector<34x1xf32> to vector<34x32xf32>
    %242 = arith.subf %232, %241 : vector<34x32xf32>
    %243 = arith.mulf %240, %242 : vector<34x32xf32>
    %cst_79 = arith.constant dense<0.000000e+00> : vector<34xf32>
    %244 = vector.multi_reduction <add>, %243, %cst_79 [1] : vector<34x32xf32> to vector<34xf32>
    %245 = vector.shape_cast %244 : vector<34xf32> to vector<34x1xf32>
    %cst_80 = arith.constant 3.200000e+01 : f32
    %246 = vector.broadcast %cst_80 : f32 to vector<34x1xf32>
    %247 = arith.divf %245, %246 : vector<34x1xf32>
    %248 = vector.broadcast %238 : vector<34x1xf32> to vector<34x32xf32>
    %249 = arith.subf %232, %248 : vector<34x32xf32>
    %cst_81 = arith.constant 9.99999974E-6 : f32
    %250 = vector.broadcast %cst_81 : f32 to vector<34x1xf32>
    %251 = arith.addf %247, %250 : vector<34x1xf32>
    %252 = math.rsqrt %251 : vector<34x1xf32>
    %253 = vector.broadcast %252 : vector<34x1xf32> to vector<34x32xf32>
    %254 = arith.mulf %249, %253 : vector<34x32xf32>
    %255 = vector.broadcast %233 : vector<1x32xf32> to vector<34x32xf32>
    %256 = arith.mulf %254, %255 : vector<34x32xf32>
    %257 = vector.broadcast %234 : vector<1x32xf32> to vector<34x32xf32>
    %258 = arith.addf %256, %257 : vector<34x32xf32>
    %259 = arith.truncf %258 : vector<34x32xf32> to vector<34x32xbf16>
    %c0_82 = arith.constant 0 : index
    %c0_83 = arith.constant 0 : index
    %260 = vector.load %arg10[%c0_82, %c0_83] : memref<32x64xbf16, #tpu.memory_space<vmem>>, vector<32x64xbf16>
    %cst_84 = arith.constant dense<0.000000e+00> : vector<34x64xf32>
    %261 = tpu.matmul %259, %260, %cst_84 {dimension_numbers = #tpu.dot_dimension_numbers<[1], [0], [0], [1], [0, 0, 1, 1], [], []>} : vector<34x32xbf16>, vector<32x64xbf16>, vector<34x64xf32> -> vector<34x64xf32>
    %c0_85 = arith.constant 0 : index
    %c0_86 = arith.constant 0 : index
    %262 = vector.load %arg11[%c0_85, %c0_86] : memref<1x64xf32, #tpu.memory_space<vmem>>, vector<1x64xf32>
    %263 = vector.broadcast %262 : vector<1x64xf32> to vector<34x64xf32>
    %264 = arith.addf %261, %263 : vector<34x64xf32>
    %cst_87 = arith.constant 5.000000e-01 : f32
    %265 = vector.broadcast %cst_87 : f32 to vector<34x64xf32>
    %266 = arith.mulf %265, %264 : vector<34x64xf32>
    %cst_88 = arith.constant 4.471500e-02 : f32
    %267 = vector.broadcast %cst_88 : f32 to vector<34x64xf32>
    %268 = arith.mulf %267, %264 : vector<34x64xf32>
    %269 = arith.mulf %268, %264 : vector<34x64xf32>
    %270 = arith.mulf %269, %264 : vector<34x64xf32>
    %271 = arith.addf %264, %270 : vector<34x64xf32>
    %cst_89 = arith.constant 0.797884583 : f32
    %272 = vector.broadcast %cst_89 : f32 to vector<34x64xf32>
    %273 = arith.mulf %272, %271 : vector<34x64xf32>
    %274 = math.tanh %273 : vector<34x64xf32>
    %cst_90 = arith.constant 1.000000e+00 : f32
    %275 = vector.broadcast %cst_90 : f32 to vector<34x64xf32>
    %276 = arith.addf %275, %274 : vector<34x64xf32>
    %277 = arith.mulf %266, %276 : vector<34x64xf32>
    %278 = arith.truncf %277 : vector<34x64xf32> to vector<34x64xbf16>
    %c0_91 = arith.constant 0 : index
    %c0_92 = arith.constant 0 : index
    %279 = vector.load %arg12[%c0_91, %c0_92] : memref<64x32xbf16, #tpu.memory_space<vmem>>, vector<64x32xbf16>
    %cst_93 = arith.constant dense<0.000000e+00> : vector<34x32xf32>
    %280 = tpu.matmul %278, %279, %cst_93 {dimension_numbers = #tpu.dot_dimension_numbers<[1], [0], [0], [1], [0, 0, 1, 1], [], []>} : vector<34x64xbf16>, vector<64x32xbf16>, vector<34x32xf32> -> vector<34x32xf32>
    %c0_94 = arith.constant 0 : index
    %c0_95 = arith.constant 0 : index
    %281 = vector.load %arg13[%c0_94, %c0_95] : memref<1x32xf32, #tpu.memory_space<vmem>>, vector<1x32xf32>
    %282 = vector.broadcast %281 : vector<1x32xf32> to vector<34x32xf32>
    %283 = arith.addf %280, %282 : vector<34x32xf32>
    %284 = arith.addf %232, %283 : vector<34x32xf32>
    %c0_96 = arith.constant 0 : index
    %c0_97 = arith.constant 0 : index
    %285 = vector.load %arg14[%c0_96, %c0_97] : memref<34x32xf32, #tpu.memory_space<vmem>>, vector<34x32xf32>
    tpu.vector_store %arg14[%c0_96, %c0_97], %284 {strides = array<i32>} : memref<34x32xf32, #tpu.memory_space<vmem>>, vector<34x32xf32>,
    return
  }
  func.func @transform_0(%arg0: i32) -> (i32, i32) {
    %c0_i32 = arith.constant 0 : i32
    %c0_i32_0 = arith.constant 0 : i32
    return %arg0, %c0_i32 : i32, i32
  }
  func.func @transform_1(%arg0: i32) -> (i32, i32) {
    %c0_i32 = arith.constant 0 : i32
    %c0_i32_0 = arith.constant 0 : i32
    %c0_i32_1 = arith.constant 0 : i32
    return %c0_i32, %c0_i32_0 : i32, i32
  }
  func.func @transform_2(%arg0: i32) -> (i32, i32) {
    %c0_i32 = arith.constant 0 : i32
    %c0_i32_0 = arith.constant 0 : i32
    %c0_i32_1 = arith.constant 0 : i32
    return %c0_i32, %c0_i32_0 : i32, i32
  }
  func.func @transform_3(%arg0: i32) -> (i32, i32) {
    %c0_i32 = arith.constant 0 : i32
    %c0_i32_0 = arith.constant 0 : i32
    %c0_i32_1 = arith.constant 0 : i32
    return %c0_i32, %c0_i32_0 : i32, i32
  }
  func.func @transform_4(%arg0: i32) -> (i32, i32) {
    %c0_i32 = arith.constant 0 : i32
    %c0_i32_0 = arith.constant 0 : i32
    %c0_i32_1 = arith.constant 0 : i32
    return %c0_i32, %c0_i32_0 : i32, i32
  }
  func.func @transform_5(%arg0: i32) -> (i32, i32) {
    %c0_i32 = arith.constant 0 : i32
    %c0_i32_0 = arith.constant 0 : i32
    %c0_i32_1 = arith.constant 0 : i32
    return %c0_i32, %c0_i32_0 : i32, i32
  }
  func.func @transform_6(%arg0: i32) -> (i32, i32) {
    %c0_i32 = arith.constant 0 : i32
    %c0_i32_0 = arith.constant 0 : i32
    %c0_i32_1 = arith.constant 0 : i32
    return %c0_i32, %c0_i32_0 : i32, i32
  }
  func.func @transform_7(%arg0: i32) -> (i32, i32) {
    %c0_i32 = arith.constant 0 : i32
    %c0_i32_0 = arith.constant 0 : i32
    %c0_i32_1 = arith.constant 0 : i32
    return %c0_i32, %c0_i32_0 : i32, i32
  }
  func.func @transform_8(%arg0: i32) -> (i32, i32) {
    %c0_i32 = arith.constant 0 : i32
    %c0_i32_0 = arith.constant 0 : i32
    %c0_i32_1 = arith.constant 0 : i32
    return %c0_i32, %c0_i32_0 : i32, i32
  }
  func.func @transform_9(%arg0: i32) -> (i32, i32) {
    %c0_i32 = arith.constant 0 : i32
    %c0_i32_0 = arith.constant 0 : i32
    %c0_i32_1 = arith.constant 0 : i32
    return %c0_i32, %c0_i32_0 : i32, i32
  }
  func.func @transform_10(%arg0: i32) -> (i32, i32) {
    %c0_i32 = arith.constant 0 : i32
    %c0_i32_0 = arith.constant 0 : i32
    %c0_i32_1 = arith.constant 0 : i32
    return %c0_i32, %c0_i32_0 : i32, i32
  }
  func.func @transform_11(%arg0: i32) -> (i32, i32) {
    %c0_i32 = arith.constant 0 : i32
    %c0_i32_0 = arith.constant 0 : i32
    %c0_i32_1 = arith.constant 0 : i32
    return %c0_i32, %c0_i32_0 : i32, i32
  }
  func.func @transform_12(%arg0: i32) -> (i32, i32) {
    %c0_i32 = arith.constant 0 : i32
    %c0_i32_0 = arith.constant 0 : i32
    %c0_i32_1 = arith.constant 0 : i32
    return %c0_i32, %c0_i32_0 : i32, i32
  }
  func.func @transform_13(%arg0: i32) -> (i32, i32) {
    %c0_i32 = arith.constant 0 : i32
    %c0_i32_0 = arith.constant 0 : i32
    return %arg0, %c0_i32 : i32, i32
  }
}

module attributes {stable_mosaic.version = 11 : i64} {
  func.func @_block_kernel(%arg0: i32, %arg1: memref<16x32xf32, #tpu.memory_space<vmem>>, %arg2: memref<1x32xf32, #tpu.memory_space<vmem>>, %arg3: memref<1x32xf32, #tpu.memory_space<vmem>>, %arg4: memref<32x96xbf16, #tpu.memory_space<vmem>>, %arg5: memref<1x96xf32, #tpu.memory_space<vmem>>, %arg6: memref<32x32xbf16, #tpu.memory_space<vmem>>, %arg7: memref<1x32xf32, #tpu.memory_space<vmem>>, %arg8: memref<1x32xf32, #tpu.memory_space<vmem>>, %arg9: memref<1x32xf32, #tpu.memory_space<vmem>>, %arg10: memref<32x64xbf16, #tpu.memory_space<vmem>>, %arg11: memref<1x64xf32, #tpu.memory_space<vmem>>, %arg12: memref<64x32xbf16, #tpu.memory_space<vmem>>, %arg13: memref<1x32xf32, #tpu.memory_space<vmem>>, %arg14: memref<16x32xf32, #tpu.memory_space<vmem>>, %arg15: memref<16x32xf32, #tpu.memory_space<vmem>>) attributes {dimension_semantics = [#tpu.dimension_semantics<parallel>], iteration_bounds = array<i64: 1>, scalar_prefetch = 0 : i64, scratch_operands = 1 : i64, tpu.core_type = #tpu.core_type<tc>, window_params = [{transform_indices = @transform_0, window_bounds = array<i64: 16, 32>}, {pipeline_mode = #tpu.pipeline_mode<synchronous>, transform_indices = @transform_1, window_bounds = array<i64: 1, 32>}, {pipeline_mode = #tpu.pipeline_mode<synchronous>, transform_indices = @transform_2, window_bounds = array<i64: 1, 32>}, {pipeline_mode = #tpu.pipeline_mode<synchronous>, transform_indices = @transform_3, window_bounds = array<i64: 32, 96>}, {pipeline_mode = #tpu.pipeline_mode<synchronous>, transform_indices = @transform_4, window_bounds = array<i64: 1, 96>}, {pipeline_mode = #tpu.pipeline_mode<synchronous>, transform_indices = @transform_5, window_bounds = array<i64: 32, 32>}, {pipeline_mode = #tpu.pipeline_mode<synchronous>, transform_indices = @transform_6, window_bounds = array<i64: 1, 32>}, {pipeline_mode = #tpu.pipeline_mode<synchronous>, transform_indices = @transform_7, window_bounds = array<i64: 1, 32>}, {pipeline_mode = #tpu.pipeline_mode<synchronous>, transform_indices = @transform_8, window_bounds = array<i64: 1, 32>}, {pipeline_mode = #tpu.pipeline_mode<synchronous>, transform_indices = @transform_9, window_bounds = array<i64: 32, 64>}, {pipeline_mode = #tpu.pipeline_mode<synchronous>, transform_indices = @transform_10, window_bounds = array<i64: 1, 64>}, {pipeline_mode = #tpu.pipeline_mode<synchronous>, transform_indices = @transform_11, window_bounds = array<i64: 64, 32>}, {pipeline_mode = #tpu.pipeline_mode<synchronous>, transform_indices = @transform_12, window_bounds = array<i64: 1, 32>}, {transform_indices = @transform_13, window_bounds = array<i64: 16, 32>}]} {
    %c0 = arith.constant 0 : index
    %c0_0 = arith.constant 0 : index
    %0 = vector.load %arg1[%c0, %c0_0] : memref<16x32xf32, #tpu.memory_space<vmem>>, vector<16x32xf32>
    %c0_1 = arith.constant 0 : index
    %c0_2 = arith.constant 0 : index
    %1 = vector.load %arg2[%c0_1, %c0_2] : memref<1x32xf32, #tpu.memory_space<vmem>>, vector<1x32xf32>
    %c0_3 = arith.constant 0 : index
    %c0_4 = arith.constant 0 : index
    %2 = vector.load %arg3[%c0_3, %c0_4] : memref<1x32xf32, #tpu.memory_space<vmem>>, vector<1x32xf32>
    %cst = arith.constant dense<0.000000e+00> : vector<16xf32>
    %3 = vector.multi_reduction <add>, %0, %cst [1] : vector<16x32xf32> to vector<16xf32>
    %4 = vector.shape_cast %3 : vector<16xf32> to vector<16x1xf32>
    %cst_5 = arith.constant 3.200000e+01 : f32
    %5 = vector.broadcast %cst_5 : f32 to vector<16x1xf32>
    %6 = arith.divf %4, %5 : vector<16x1xf32>
    %7 = vector.broadcast %6 : vector<16x1xf32> to vector<16x32xf32>
    %8 = arith.subf %0, %7 : vector<16x32xf32>
    %9 = vector.broadcast %6 : vector<16x1xf32> to vector<16x32xf32>
    %10 = arith.subf %0, %9 : vector<16x32xf32>
    %11 = arith.mulf %8, %10 : vector<16x32xf32>
    %cst_6 = arith.constant dense<0.000000e+00> : vector<16xf32>
    %12 = vector.multi_reduction <add>, %11, %cst_6 [1] : vector<16x32xf32> to vector<16xf32>
    %13 = vector.shape_cast %12 : vector<16xf32> to vector<16x1xf32>
    %cst_7 = arith.constant 3.200000e+01 : f32
    %14 = vector.broadcast %cst_7 : f32 to vector<16x1xf32>
    %15 = arith.divf %13, %14 : vector<16x1xf32>
    %16 = vector.broadcast %6 : vector<16x1xf32> to vector<16x32xf32>
    %17 = arith.subf %0, %16 : vector<16x32xf32>
    %cst_8 = arith.constant 9.99999974E-6 : f32
    %18 = vector.broadcast %cst_8 : f32 to vector<16x1xf32>
    %19 = arith.addf %15, %18 : vector<16x1xf32>
    %20 = math.rsqrt %19 : vector<16x1xf32>
    %21 = vector.broadcast %20 : vector<16x1xf32> to vector<16x32xf32>
    %22 = arith.mulf %17, %21 : vector<16x32xf32>
    %23 = vector.broadcast %1 : vector<1x32xf32> to vector<16x32xf32>
    %24 = arith.mulf %22, %23 : vector<16x32xf32>
    %25 = vector.broadcast %2 : vector<1x32xf32> to vector<16x32xf32>
    %26 = arith.addf %24, %25 : vector<16x32xf32>
    %27 = arith.truncf %26 : vector<16x32xf32> to vector<16x32xbf16>
    %c0_9 = arith.constant 0 : index
    %c0_10 = arith.constant 0 : index
    %28 = vector.load %arg4[%c0_9, %c0_10] : memref<32x96xbf16, #tpu.memory_space<vmem>>, vector<32x96xbf16>
    %cst_11 = arith.constant dense<0.000000e+00> : vector<16x96xf32>
    %29 = tpu.matmul %27, %28, %cst_11 {dimension_numbers = #tpu.dot_dimension_numbers<[1], [0], [0], [1], [0, 0, 1, 1], [], []>} : vector<16x32xbf16>, vector<32x96xbf16>, vector<16x96xf32> -> vector<16x96xf32>
    %c0_12 = arith.constant 0 : index
    %c0_13 = arith.constant 0 : index
    %30 = vector.load %arg5[%c0_12, %c0_13] : memref<1x96xf32, #tpu.memory_space<vmem>>, vector<1x96xf32>
    %31 = vector.broadcast %30 : vector<1x96xf32> to vector<16x96xf32>
    %32 = arith.addf %29, %31 : vector<16x96xf32>
    %33 = vector.extract_strided_slice %32 {offsets = [0, 0], sizes = [8, 24], strides = [1, 1]} : vector<16x96xf32> to vector<8x24xf32>
    %34 = vector.extract_strided_slice %33 {offsets = [0, 0], sizes = [8, 8], strides = [1, 1]} : vector<8x24xf32> to vector<8x8xf32>
    %35 = arith.truncf %34 : vector<8x8xf32> to vector<8x8xbf16>
    %36 = vector.extract_strided_slice %33 {offsets = [0, 8], sizes = [8, 8], strides = [1, 1]} : vector<8x24xf32> to vector<8x8xf32>
    %37 = arith.truncf %36 : vector<8x8xf32> to vector<8x8xbf16>
    %38 = vector.extract_strided_slice %33 {offsets = [0, 16], sizes = [8, 8], strides = [1, 1]} : vector<8x24xf32> to vector<8x8xf32>
    %39 = arith.truncf %38 : vector<8x8xf32> to vector<8x8xbf16>
    %cst_14 = arith.constant dense<0.000000e+00> : vector<8x8xf32>
    %40 = tpu.matmul %35, %37, %cst_14 {dimension_numbers = #tpu.dot_dimension_numbers<[1], [1], [0], [0], [0, 0, 1, 0], [], []>} : vector<8x8xbf16>, vector<8x8xbf16>, vector<8x8xf32> -> vector<8x8xf32>
    %cst_15 = arith.constant 0.353553385 : f32
    %41 = vector.broadcast %cst_15 : f32 to vector<8x8xf32>
    %42 = arith.mulf %40, %41 : vector<8x8xf32>
    %cst_16 = arith.constant dense<0xFF800000> : vector<8xf32>
    %43 = vector.multi_reduction <maximumf>, %42, %cst_16 [1] : vector<8x8xf32> to vector<8xf32>
    %44 = vector.shape_cast %43 : vector<8xf32> to vector<8x1xf32>
    %45 = vector.broadcast %44 : vector<8x1xf32> to vector<8x8xf32>
    %46 = arith.subf %42, %45 : vector<8x8xf32>
    %47 = arith.truncf %46 : vector<8x8xf32> to vector<8x8xbf16>
    %48 = math.exp %47 : vector<8x8xbf16>
    %49 = arith.extf %48 : vector<8x8xbf16> to vector<8x8xf32>
    %cst_17 = arith.constant dense<0.000000e+00> : vector<8xf32>
    %50 = vector.multi_reduction <add>, %49, %cst_17 [1] : vector<8x8xf32> to vector<8xf32>
    %51 = vector.shape_cast %50 : vector<8xf32> to vector<8x1xf32>
    %cst_18 = arith.constant dense<0.000000e+00> : vector<8x8xf32>
    %52 = tpu.matmul %48, %39, %cst_18 {dimension_numbers = #tpu.dot_dimension_numbers<[1], [0], [0], [1], [0, 0, 1, 1], [], []>} : vector<8x8xbf16>, vector<8x8xbf16>, vector<8x8xf32> -> vector<8x8xf32>
    %53 = tpu.reciprocal %51 {approx = true} : vector<8x1xf32> -> vector<8x1xf32>
    %54 = vector.broadcast %53 : vector<8x1xf32> to vector<8x8xf32>
    %55 = arith.mulf %52, %54 : vector<8x8xf32>
    %c0_19 = arith.constant 0 : index
    %c0_20 = arith.constant 0 : index
    %56 = vector.load %arg15[%c0_19, %c0_20] : memref<16x32xf32, #tpu.memory_space<vmem>>, vector<8x8xf32>
    tpu.vector_store %arg15[%c0_19, %c0_20], %55 {strides = array<i32>} : memref<16x32xf32, #tpu.memory_space<vmem>>, vector<8x8xf32>,
    %57 = vector.extract_strided_slice %32 {offsets = [0, 24], sizes = [8, 24], strides = [1, 1]} : vector<16x96xf32> to vector<8x24xf32>
    %58 = vector.extract_strided_slice %57 {offsets = [0, 0], sizes = [8, 8], strides = [1, 1]} : vector<8x24xf32> to vector<8x8xf32>
    %59 = arith.truncf %58 : vector<8x8xf32> to vector<8x8xbf16>
    %60 = vector.extract_strided_slice %57 {offsets = [0, 8], sizes = [8, 8], strides = [1, 1]} : vector<8x24xf32> to vector<8x8xf32>
    %61 = arith.truncf %60 : vector<8x8xf32> to vector<8x8xbf16>
    %62 = vector.extract_strided_slice %57 {offsets = [0, 16], sizes = [8, 8], strides = [1, 1]} : vector<8x24xf32> to vector<8x8xf32>
    %63 = arith.truncf %62 : vector<8x8xf32> to vector<8x8xbf16>
    %cst_21 = arith.constant dense<0.000000e+00> : vector<8x8xf32>
    %64 = tpu.matmul %59, %61, %cst_21 {dimension_numbers = #tpu.dot_dimension_numbers<[1], [1], [0], [0], [0, 0, 1, 0], [], []>} : vector<8x8xbf16>, vector<8x8xbf16>, vector<8x8xf32> -> vector<8x8xf32>
    %cst_22 = arith.constant 0.353553385 : f32
    %65 = vector.broadcast %cst_22 : f32 to vector<8x8xf32>
    %66 = arith.mulf %64, %65 : vector<8x8xf32>
    %cst_23 = arith.constant dense<0xFF800000> : vector<8xf32>
    %67 = vector.multi_reduction <maximumf>, %66, %cst_23 [1] : vector<8x8xf32> to vector<8xf32>
    %68 = vector.shape_cast %67 : vector<8xf32> to vector<8x1xf32>
    %69 = vector.broadcast %68 : vector<8x1xf32> to vector<8x8xf32>
    %70 = arith.subf %66, %69 : vector<8x8xf32>
    %71 = arith.truncf %70 : vector<8x8xf32> to vector<8x8xbf16>
    %72 = math.exp %71 : vector<8x8xbf16>
    %73 = arith.extf %72 : vector<8x8xbf16> to vector<8x8xf32>
    %cst_24 = arith.constant dense<0.000000e+00> : vector<8xf32>
    %74 = vector.multi_reduction <add>, %73, %cst_24 [1] : vector<8x8xf32> to vector<8xf32>
    %75 = vector.shape_cast %74 : vector<8xf32> to vector<8x1xf32>
    %cst_25 = arith.constant dense<0.000000e+00> : vector<8x8xf32>
    %76 = tpu.matmul %72, %63, %cst_25 {dimension_numbers = #tpu.dot_dimension_numbers<[1], [0], [0], [1], [0, 0, 1, 1], [], []>} : vector<8x8xbf16>, vector<8x8xbf16>, vector<8x8xf32> -> vector<8x8xf32>
    %77 = tpu.reciprocal %75 {approx = true} : vector<8x1xf32> -> vector<8x1xf32>
    %78 = vector.broadcast %77 : vector<8x1xf32> to vector<8x8xf32>
    %79 = arith.mulf %76, %78 : vector<8x8xf32>
    %c0_26 = arith.constant 0 : index
    %c8 = arith.constant 8 : index
    %80 = vector.load %arg15[%c0_26, %c8] : memref<16x32xf32, #tpu.memory_space<vmem>>, vector<8x8xf32>
    tpu.vector_store %arg15[%c0_26, %c8], %79 {strides = array<i32>} : memref<16x32xf32, #tpu.memory_space<vmem>>, vector<8x8xf32>,
    %81 = vector.extract_strided_slice %32 {offsets = [0, 48], sizes = [8, 24], strides = [1, 1]} : vector<16x96xf32> to vector<8x24xf32>
    %82 = vector.extract_strided_slice %81 {offsets = [0, 0], sizes = [8, 8], strides = [1, 1]} : vector<8x24xf32> to vector<8x8xf32>
    %83 = arith.truncf %82 : vector<8x8xf32> to vector<8x8xbf16>
    %84 = vector.extract_strided_slice %81 {offsets = [0, 8], sizes = [8, 8], strides = [1, 1]} : vector<8x24xf32> to vector<8x8xf32>
    %85 = arith.truncf %84 : vector<8x8xf32> to vector<8x8xbf16>
    %86 = vector.extract_strided_slice %81 {offsets = [0, 16], sizes = [8, 8], strides = [1, 1]} : vector<8x24xf32> to vector<8x8xf32>
    %87 = arith.truncf %86 : vector<8x8xf32> to vector<8x8xbf16>
    %cst_27 = arith.constant dense<0.000000e+00> : vector<8x8xf32>
    %88 = tpu.matmul %83, %85, %cst_27 {dimension_numbers = #tpu.dot_dimension_numbers<[1], [1], [0], [0], [0, 0, 1, 0], [], []>} : vector<8x8xbf16>, vector<8x8xbf16>, vector<8x8xf32> -> vector<8x8xf32>
    %cst_28 = arith.constant 0.353553385 : f32
    %89 = vector.broadcast %cst_28 : f32 to vector<8x8xf32>
    %90 = arith.mulf %88, %89 : vector<8x8xf32>
    %cst_29 = arith.constant dense<0xFF800000> : vector<8xf32>
    %91 = vector.multi_reduction <maximumf>, %90, %cst_29 [1] : vector<8x8xf32> to vector<8xf32>
    %92 = vector.shape_cast %91 : vector<8xf32> to vector<8x1xf32>
    %93 = vector.broadcast %92 : vector<8x1xf32> to vector<8x8xf32>
    %94 = arith.subf %90, %93 : vector<8x8xf32>
    %95 = arith.truncf %94 : vector<8x8xf32> to vector<8x8xbf16>
    %96 = math.exp %95 : vector<8x8xbf16>
    %97 = arith.extf %96 : vector<8x8xbf16> to vector<8x8xf32>
    %cst_30 = arith.constant dense<0.000000e+00> : vector<8xf32>
    %98 = vector.multi_reduction <add>, %97, %cst_30 [1] : vector<8x8xf32> to vector<8xf32>
    %99 = vector.shape_cast %98 : vector<8xf32> to vector<8x1xf32>
    %cst_31 = arith.constant dense<0.000000e+00> : vector<8x8xf32>
    %100 = tpu.matmul %96, %87, %cst_31 {dimension_numbers = #tpu.dot_dimension_numbers<[1], [0], [0], [1], [0, 0, 1, 1], [], []>} : vector<8x8xbf16>, vector<8x8xbf16>, vector<8x8xf32> -> vector<8x8xf32>
    %101 = tpu.reciprocal %99 {approx = true} : vector<8x1xf32> -> vector<8x1xf32>
    %102 = vector.broadcast %101 : vector<8x1xf32> to vector<8x8xf32>
    %103 = arith.mulf %100, %102 : vector<8x8xf32>
    %c0_32 = arith.constant 0 : index
    %c16 = arith.constant 16 : index
    %104 = vector.load %arg15[%c0_32, %c16] : memref<16x32xf32, #tpu.memory_space<vmem>>, vector<8x8xf32>
    tpu.vector_store %arg15[%c0_32, %c16], %103 {strides = array<i32>} : memref<16x32xf32, #tpu.memory_space<vmem>>, vector<8x8xf32>,
    %105 = vector.extract_strided_slice %32 {offsets = [0, 72], sizes = [8, 24], strides = [1, 1]} : vector<16x96xf32> to vector<8x24xf32>
    %106 = vector.extract_strided_slice %105 {offsets = [0, 0], sizes = [8, 8], strides = [1, 1]} : vector<8x24xf32> to vector<8x8xf32>
    %107 = arith.truncf %106 : vector<8x8xf32> to vector<8x8xbf16>
    %108 = vector.extract_strided_slice %105 {offsets = [0, 8], sizes = [8, 8], strides = [1, 1]} : vector<8x24xf32> to vector<8x8xf32>
    %109 = arith.truncf %108 : vector<8x8xf32> to vector<8x8xbf16>
    %110 = vector.extract_strided_slice %105 {offsets = [0, 16], sizes = [8, 8], strides = [1, 1]} : vector<8x24xf32> to vector<8x8xf32>
    %111 = arith.truncf %110 : vector<8x8xf32> to vector<8x8xbf16>
    %cst_33 = arith.constant dense<0.000000e+00> : vector<8x8xf32>
    %112 = tpu.matmul %107, %109, %cst_33 {dimension_numbers = #tpu.dot_dimension_numbers<[1], [1], [0], [0], [0, 0, 1, 0], [], []>} : vector<8x8xbf16>, vector<8x8xbf16>, vector<8x8xf32> -> vector<8x8xf32>
    %cst_34 = arith.constant 0.353553385 : f32
    %113 = vector.broadcast %cst_34 : f32 to vector<8x8xf32>
    %114 = arith.mulf %112, %113 : vector<8x8xf32>
    %cst_35 = arith.constant dense<0xFF800000> : vector<8xf32>
    %115 = vector.multi_reduction <maximumf>, %114, %cst_35 [1] : vector<8x8xf32> to vector<8xf32>
    %116 = vector.shape_cast %115 : vector<8xf32> to vector<8x1xf32>
    %117 = vector.broadcast %116 : vector<8x1xf32> to vector<8x8xf32>
    %118 = arith.subf %114, %117 : vector<8x8xf32>
    %119 = arith.truncf %118 : vector<8x8xf32> to vector<8x8xbf16>
    %120 = math.exp %119 : vector<8x8xbf16>
    %121 = arith.extf %120 : vector<8x8xbf16> to vector<8x8xf32>
    %cst_36 = arith.constant dense<0.000000e+00> : vector<8xf32>
    %122 = vector.multi_reduction <add>, %121, %cst_36 [1] : vector<8x8xf32> to vector<8xf32>
    %123 = vector.shape_cast %122 : vector<8xf32> to vector<8x1xf32>
    %cst_37 = arith.constant dense<0.000000e+00> : vector<8x8xf32>
    %124 = tpu.matmul %120, %111, %cst_37 {dimension_numbers = #tpu.dot_dimension_numbers<[1], [0], [0], [1], [0, 0, 1, 1], [], []>} : vector<8x8xbf16>, vector<8x8xbf16>, vector<8x8xf32> -> vector<8x8xf32>
    %125 = tpu.reciprocal %123 {approx = true} : vector<8x1xf32> -> vector<8x1xf32>
    %126 = vector.broadcast %125 : vector<8x1xf32> to vector<8x8xf32>
    %127 = arith.mulf %124, %126 : vector<8x8xf32>
    %c0_38 = arith.constant 0 : index
    %c24 = arith.constant 24 : index
    %128 = vector.load %arg15[%c0_38, %c24] : memref<16x32xf32, #tpu.memory_space<vmem>>, vector<8x8xf32>
    tpu.vector_store %arg15[%c0_38, %c24], %127 {strides = array<i32>} : memref<16x32xf32, #tpu.memory_space<vmem>>, vector<8x8xf32>,
    %129 = vector.extract_strided_slice %32 {offsets = [8, 0], sizes = [8, 24], strides = [1, 1]} : vector<16x96xf32> to vector<8x24xf32>
    %130 = vector.extract_strided_slice %129 {offsets = [0, 0], sizes = [8, 8], strides = [1, 1]} : vector<8x24xf32> to vector<8x8xf32>
    %131 = arith.truncf %130 : vector<8x8xf32> to vector<8x8xbf16>
    %132 = vector.extract_strided_slice %129 {offsets = [0, 8], sizes = [8, 8], strides = [1, 1]} : vector<8x24xf32> to vector<8x8xf32>
    %133 = arith.truncf %132 : vector<8x8xf32> to vector<8x8xbf16>
    %134 = vector.extract_strided_slice %129 {offsets = [0, 16], sizes = [8, 8], strides = [1, 1]} : vector<8x24xf32> to vector<8x8xf32>
    %135 = arith.truncf %134 : vector<8x8xf32> to vector<8x8xbf16>
    %cst_39 = arith.constant dense<0.000000e+00> : vector<8x8xf32>
    %136 = tpu.matmul %131, %133, %cst_39 {dimension_numbers = #tpu.dot_dimension_numbers<[1], [1], [0], [0], [0, 0, 1, 0], [], []>} : vector<8x8xbf16>, vector<8x8xbf16>, vector<8x8xf32> -> vector<8x8xf32>
    %cst_40 = arith.constant 0.353553385 : f32
    %137 = vector.broadcast %cst_40 : f32 to vector<8x8xf32>
    %138 = arith.mulf %136, %137 : vector<8x8xf32>
    %cst_41 = arith.constant dense<0xFF800000> : vector<8xf32>
    %139 = vector.multi_reduction <maximumf>, %138, %cst_41 [1] : vector<8x8xf32> to vector<8xf32>
    %140 = vector.shape_cast %139 : vector<8xf32> to vector<8x1xf32>
    %141 = vector.broadcast %140 : vector<8x1xf32> to vector<8x8xf32>
    %142 = arith.subf %138, %141 : vector<8x8xf32>
    %143 = arith.truncf %142 : vector<8x8xf32> to vector<8x8xbf16>
    %144 = math.exp %143 : vector<8x8xbf16>
    %145 = arith.extf %144 : vector<8x8xbf16> to vector<8x8xf32>
    %cst_42 = arith.constant dense<0.000000e+00> : vector<8xf32>
    %146 = vector.multi_reduction <add>, %145, %cst_42 [1] : vector<8x8xf32> to vector<8xf32>
    %147 = vector.shape_cast %146 : vector<8xf32> to vector<8x1xf32>
    %cst_43 = arith.constant dense<0.000000e+00> : vector<8x8xf32>
    %148 = tpu.matmul %144, %135, %cst_43 {dimension_numbers = #tpu.dot_dimension_numbers<[1], [0], [0], [1], [0, 0, 1, 1], [], []>} : vector<8x8xbf16>, vector<8x8xbf16>, vector<8x8xf32> -> vector<8x8xf32>
    %149 = tpu.reciprocal %147 {approx = true} : vector<8x1xf32> -> vector<8x1xf32>
    %150 = vector.broadcast %149 : vector<8x1xf32> to vector<8x8xf32>
    %151 = arith.mulf %148, %150 : vector<8x8xf32>
    %c8_44 = arith.constant 8 : index
    %c0_45 = arith.constant 0 : index
    %152 = vector.load %arg15[%c8_44, %c0_45] : memref<16x32xf32, #tpu.memory_space<vmem>>, vector<8x8xf32>
    tpu.vector_store %arg15[%c8_44, %c0_45], %151 {strides = array<i32>} : memref<16x32xf32, #tpu.memory_space<vmem>>, vector<8x8xf32>,
    %153 = vector.extract_strided_slice %32 {offsets = [8, 24], sizes = [8, 24], strides = [1, 1]} : vector<16x96xf32> to vector<8x24xf32>
    %154 = vector.extract_strided_slice %153 {offsets = [0, 0], sizes = [8, 8], strides = [1, 1]} : vector<8x24xf32> to vector<8x8xf32>
    %155 = arith.truncf %154 : vector<8x8xf32> to vector<8x8xbf16>
    %156 = vector.extract_strided_slice %153 {offsets = [0, 8], sizes = [8, 8], strides = [1, 1]} : vector<8x24xf32> to vector<8x8xf32>
    %157 = arith.truncf %156 : vector<8x8xf32> to vector<8x8xbf16>
    %158 = vector.extract_strided_slice %153 {offsets = [0, 16], sizes = [8, 8], strides = [1, 1]} : vector<8x24xf32> to vector<8x8xf32>
    %159 = arith.truncf %158 : vector<8x8xf32> to vector<8x8xbf16>
    %cst_46 = arith.constant dense<0.000000e+00> : vector<8x8xf32>
    %160 = tpu.matmul %155, %157, %cst_46 {dimension_numbers = #tpu.dot_dimension_numbers<[1], [1], [0], [0], [0, 0, 1, 0], [], []>} : vector<8x8xbf16>, vector<8x8xbf16>, vector<8x8xf32> -> vector<8x8xf32>
    %cst_47 = arith.constant 0.353553385 : f32
    %161 = vector.broadcast %cst_47 : f32 to vector<8x8xf32>
    %162 = arith.mulf %160, %161 : vector<8x8xf32>
    %cst_48 = arith.constant dense<0xFF800000> : vector<8xf32>
    %163 = vector.multi_reduction <maximumf>, %162, %cst_48 [1] : vector<8x8xf32> to vector<8xf32>
    %164 = vector.shape_cast %163 : vector<8xf32> to vector<8x1xf32>
    %165 = vector.broadcast %164 : vector<8x1xf32> to vector<8x8xf32>
    %166 = arith.subf %162, %165 : vector<8x8xf32>
    %167 = arith.truncf %166 : vector<8x8xf32> to vector<8x8xbf16>
    %168 = math.exp %167 : vector<8x8xbf16>
    %169 = arith.extf %168 : vector<8x8xbf16> to vector<8x8xf32>
    %cst_49 = arith.constant dense<0.000000e+00> : vector<8xf32>
    %170 = vector.multi_reduction <add>, %169, %cst_49 [1] : vector<8x8xf32> to vector<8xf32>
    %171 = vector.shape_cast %170 : vector<8xf32> to vector<8x1xf32>
    %cst_50 = arith.constant dense<0.000000e+00> : vector<8x8xf32>
    %172 = tpu.matmul %168, %159, %cst_50 {dimension_numbers = #tpu.dot_dimension_numbers<[1], [0], [0], [1], [0, 0, 1, 1], [], []>} : vector<8x8xbf16>, vector<8x8xbf16>, vector<8x8xf32> -> vector<8x8xf32>
    %173 = tpu.reciprocal %171 {approx = true} : vector<8x1xf32> -> vector<8x1xf32>
    %174 = vector.broadcast %173 : vector<8x1xf32> to vector<8x8xf32>
    %175 = arith.mulf %172, %174 : vector<8x8xf32>
    %c8_51 = arith.constant 8 : index
    %c8_52 = arith.constant 8 : index
    %176 = vector.load %arg15[%c8_51, %c8_52] : memref<16x32xf32, #tpu.memory_space<vmem>>, vector<8x8xf32>
    tpu.vector_store %arg15[%c8_51, %c8_52], %175 {strides = array<i32>} : memref<16x32xf32, #tpu.memory_space<vmem>>, vector<8x8xf32>,
    %177 = vector.extract_strided_slice %32 {offsets = [8, 48], sizes = [8, 24], strides = [1, 1]} : vector<16x96xf32> to vector<8x24xf32>
    %178 = vector.extract_strided_slice %177 {offsets = [0, 0], sizes = [8, 8], strides = [1, 1]} : vector<8x24xf32> to vector<8x8xf32>
    %179 = arith.truncf %178 : vector<8x8xf32> to vector<8x8xbf16>
    %180 = vector.extract_strided_slice %177 {offsets = [0, 8], sizes = [8, 8], strides = [1, 1]} : vector<8x24xf32> to vector<8x8xf32>
    %181 = arith.truncf %180 : vector<8x8xf32> to vector<8x8xbf16>
    %182 = vector.extract_strided_slice %177 {offsets = [0, 16], sizes = [8, 8], strides = [1, 1]} : vector<8x24xf32> to vector<8x8xf32>
    %183 = arith.truncf %182 : vector<8x8xf32> to vector<8x8xbf16>
    %cst_53 = arith.constant dense<0.000000e+00> : vector<8x8xf32>
    %184 = tpu.matmul %179, %181, %cst_53 {dimension_numbers = #tpu.dot_dimension_numbers<[1], [1], [0], [0], [0, 0, 1, 0], [], []>} : vector<8x8xbf16>, vector<8x8xbf16>, vector<8x8xf32> -> vector<8x8xf32>
    %cst_54 = arith.constant 0.353553385 : f32
    %185 = vector.broadcast %cst_54 : f32 to vector<8x8xf32>
    %186 = arith.mulf %184, %185 : vector<8x8xf32>
    %cst_55 = arith.constant dense<0xFF800000> : vector<8xf32>
    %187 = vector.multi_reduction <maximumf>, %186, %cst_55 [1] : vector<8x8xf32> to vector<8xf32>
    %188 = vector.shape_cast %187 : vector<8xf32> to vector<8x1xf32>
    %189 = vector.broadcast %188 : vector<8x1xf32> to vector<8x8xf32>
    %190 = arith.subf %186, %189 : vector<8x8xf32>
    %191 = arith.truncf %190 : vector<8x8xf32> to vector<8x8xbf16>
    %192 = math.exp %191 : vector<8x8xbf16>
    %193 = arith.extf %192 : vector<8x8xbf16> to vector<8x8xf32>
    %cst_56 = arith.constant dense<0.000000e+00> : vector<8xf32>
    %194 = vector.multi_reduction <add>, %193, %cst_56 [1] : vector<8x8xf32> to vector<8xf32>
    %195 = vector.shape_cast %194 : vector<8xf32> to vector<8x1xf32>
    %cst_57 = arith.constant dense<0.000000e+00> : vector<8x8xf32>
    %196 = tpu.matmul %192, %183, %cst_57 {dimension_numbers = #tpu.dot_dimension_numbers<[1], [0], [0], [1], [0, 0, 1, 1], [], []>} : vector<8x8xbf16>, vector<8x8xbf16>, vector<8x8xf32> -> vector<8x8xf32>
    %197 = tpu.reciprocal %195 {approx = true} : vector<8x1xf32> -> vector<8x1xf32>
    %198 = vector.broadcast %197 : vector<8x1xf32> to vector<8x8xf32>
    %199 = arith.mulf %196, %198 : vector<8x8xf32>
    %c8_58 = arith.constant 8 : index
    %c16_59 = arith.constant 16 : index
    %200 = vector.load %arg15[%c8_58, %c16_59] : memref<16x32xf32, #tpu.memory_space<vmem>>, vector<8x8xf32>
    tpu.vector_store %arg15[%c8_58, %c16_59], %199 {strides = array<i32>} : memref<16x32xf32, #tpu.memory_space<vmem>>, vector<8x8xf32>,
    %201 = vector.extract_strided_slice %32 {offsets = [8, 72], sizes = [8, 24], strides = [1, 1]} : vector<16x96xf32> to vector<8x24xf32>
    %202 = vector.extract_strided_slice %201 {offsets = [0, 0], sizes = [8, 8], strides = [1, 1]} : vector<8x24xf32> to vector<8x8xf32>
    %203 = arith.truncf %202 : vector<8x8xf32> to vector<8x8xbf16>
    %204 = vector.extract_strided_slice %201 {offsets = [0, 8], sizes = [8, 8], strides = [1, 1]} : vector<8x24xf32> to vector<8x8xf32>
    %205 = arith.truncf %204 : vector<8x8xf32> to vector<8x8xbf16>
    %206 = vector.extract_strided_slice %201 {offsets = [0, 16], sizes = [8, 8], strides = [1, 1]} : vector<8x24xf32> to vector<8x8xf32>
    %207 = arith.truncf %206 : vector<8x8xf32> to vector<8x8xbf16>
    %cst_60 = arith.constant dense<0.000000e+00> : vector<8x8xf32>
    %208 = tpu.matmul %203, %205, %cst_60 {dimension_numbers = #tpu.dot_dimension_numbers<[1], [1], [0], [0], [0, 0, 1, 0], [], []>} : vector<8x8xbf16>, vector<8x8xbf16>, vector<8x8xf32> -> vector<8x8xf32>
    %cst_61 = arith.constant 0.353553385 : f32
    %209 = vector.broadcast %cst_61 : f32 to vector<8x8xf32>
    %210 = arith.mulf %208, %209 : vector<8x8xf32>
    %cst_62 = arith.constant dense<0xFF800000> : vector<8xf32>
    %211 = vector.multi_reduction <maximumf>, %210, %cst_62 [1] : vector<8x8xf32> to vector<8xf32>
    %212 = vector.shape_cast %211 : vector<8xf32> to vector<8x1xf32>
    %213 = vector.broadcast %212 : vector<8x1xf32> to vector<8x8xf32>
    %214 = arith.subf %210, %213 : vector<8x8xf32>
    %215 = arith.truncf %214 : vector<8x8xf32> to vector<8x8xbf16>
    %216 = math.exp %215 : vector<8x8xbf16>
    %217 = arith.extf %216 : vector<8x8xbf16> to vector<8x8xf32>
    %cst_63 = arith.constant dense<0.000000e+00> : vector<8xf32>
    %218 = vector.multi_reduction <add>, %217, %cst_63 [1] : vector<8x8xf32> to vector<8xf32>
    %219 = vector.shape_cast %218 : vector<8xf32> to vector<8x1xf32>
    %cst_64 = arith.constant dense<0.000000e+00> : vector<8x8xf32>
    %220 = tpu.matmul %216, %207, %cst_64 {dimension_numbers = #tpu.dot_dimension_numbers<[1], [0], [0], [1], [0, 0, 1, 1], [], []>} : vector<8x8xbf16>, vector<8x8xbf16>, vector<8x8xf32> -> vector<8x8xf32>
    %221 = tpu.reciprocal %219 {approx = true} : vector<8x1xf32> -> vector<8x1xf32>
    %222 = vector.broadcast %221 : vector<8x1xf32> to vector<8x8xf32>
    %223 = arith.mulf %220, %222 : vector<8x8xf32>
    %c8_65 = arith.constant 8 : index
    %c24_66 = arith.constant 24 : index
    %224 = vector.load %arg15[%c8_65, %c24_66] : memref<16x32xf32, #tpu.memory_space<vmem>>, vector<8x8xf32>
    tpu.vector_store %arg15[%c8_65, %c24_66], %223 {strides = array<i32>} : memref<16x32xf32, #tpu.memory_space<vmem>>, vector<8x8xf32>,
    %c0_67 = arith.constant 0 : index
    %c0_68 = arith.constant 0 : index
    %225 = vector.load %arg15[%c0_67, %c0_68] : memref<16x32xf32, #tpu.memory_space<vmem>>, vector<16x32xf32>
    %226 = arith.truncf %225 : vector<16x32xf32> to vector<16x32xbf16>
    %c0_69 = arith.constant 0 : index
    %c0_70 = arith.constant 0 : index
    %227 = vector.load %arg6[%c0_69, %c0_70] : memref<32x32xbf16, #tpu.memory_space<vmem>>, vector<32x32xbf16>
    %cst_71 = arith.constant dense<0.000000e+00> : vector<16x32xf32>
    %228 = tpu.matmul %226, %227, %cst_71 {dimension_numbers = #tpu.dot_dimension_numbers<[1], [0], [0], [1], [0, 0, 1, 1], [], []>} : vector<16x32xbf16>, vector<32x32xbf16>, vector<16x32xf32> -> vector<16x32xf32>
    %229 = arith.addf %0, %228 : vector<16x32xf32>
    %c0_72 = arith.constant 0 : index
    %c0_73 = arith.constant 0 : index
    %230 = vector.load %arg7[%c0_72, %c0_73] : memref<1x32xf32, #tpu.memory_space<vmem>>, vector<1x32xf32>
    %231 = vector.broadcast %230 : vector<1x32xf32> to vector<16x32xf32>
    %232 = arith.addf %229, %231 : vector<16x32xf32>
    %c0_74 = arith.constant 0 : index
    %c0_75 = arith.constant 0 : index
    %233 = vector.load %arg8[%c0_74, %c0_75] : memref<1x32xf32, #tpu.memory_space<vmem>>, vector<1x32xf32>
    %c0_76 = arith.constant 0 : index
    %c0_77 = arith.constant 0 : index
    %234 = vector.load %arg9[%c0_76, %c0_77] : memref<1x32xf32, #tpu.memory_space<vmem>>, vector<1x32xf32>
    %cst_78 = arith.constant dense<0.000000e+00> : vector<16xf32>
    %235 = vector.multi_reduction <add>, %232, %cst_78 [1] : vector<16x32xf32> to vector<16xf32>
    %236 = vector.shape_cast %235 : vector<16xf32> to vector<16x1xf32>
    %cst_79 = arith.constant 3.200000e+01 : f32
    %237 = vector.broadcast %cst_79 : f32 to vector<16x1xf32>
    %238 = arith.divf %236, %237 : vector<16x1xf32>
    %239 = vector.broadcast %238 : vector<16x1xf32> to vector<16x32xf32>
    %240 = arith.subf %232, %239 : vector<16x32xf32>
    %241 = vector.broadcast %238 : vector<16x1xf32> to vector<16x32xf32>
    %242 = arith.subf %232, %241 : vector<16x32xf32>
    %243 = arith.mulf %240, %242 : vector<16x32xf32>
    %cst_80 = arith.constant dense<0.000000e+00> : vector<16xf32>
    %244 = vector.multi_reduction <add>, %243, %cst_80 [1] : vector<16x32xf32> to vector<16xf32>
    %245 = vector.shape_cast %244 : vector<16xf32> to vector<16x1xf32>
    %cst_81 = arith.constant 3.200000e+01 : f32
    %246 = vector.broadcast %cst_81 : f32 to vector<16x1xf32>
    %247 = arith.divf %245, %246 : vector<16x1xf32>
    %248 = vector.broadcast %238 : vector<16x1xf32> to vector<16x32xf32>
    %249 = arith.subf %232, %248 : vector<16x32xf32>
    %cst_82 = arith.constant 9.99999974E-6 : f32
    %250 = vector.broadcast %cst_82 : f32 to vector<16x1xf32>
    %251 = arith.addf %247, %250 : vector<16x1xf32>
    %252 = math.rsqrt %251 : vector<16x1xf32>
    %253 = vector.broadcast %252 : vector<16x1xf32> to vector<16x32xf32>
    %254 = arith.mulf %249, %253 : vector<16x32xf32>
    %255 = vector.broadcast %233 : vector<1x32xf32> to vector<16x32xf32>
    %256 = arith.mulf %254, %255 : vector<16x32xf32>
    %257 = vector.broadcast %234 : vector<1x32xf32> to vector<16x32xf32>
    %258 = arith.addf %256, %257 : vector<16x32xf32>
    %259 = arith.truncf %258 : vector<16x32xf32> to vector<16x32xbf16>
    %c0_83 = arith.constant 0 : index
    %c0_84 = arith.constant 0 : index
    %260 = vector.load %arg10[%c0_83, %c0_84] : memref<32x64xbf16, #tpu.memory_space<vmem>>, vector<32x64xbf16>
    %cst_85 = arith.constant dense<0.000000e+00> : vector<16x64xf32>
    %261 = tpu.matmul %259, %260, %cst_85 {dimension_numbers = #tpu.dot_dimension_numbers<[1], [0], [0], [1], [0, 0, 1, 1], [], []>} : vector<16x32xbf16>, vector<32x64xbf16>, vector<16x64xf32> -> vector<16x64xf32>
    %c0_86 = arith.constant 0 : index
    %c0_87 = arith.constant 0 : index
    %262 = vector.load %arg11[%c0_86, %c0_87] : memref<1x64xf32, #tpu.memory_space<vmem>>, vector<1x64xf32>
    %263 = vector.broadcast %262 : vector<1x64xf32> to vector<16x64xf32>
    %264 = arith.addf %261, %263 : vector<16x64xf32>
    %cst_88 = arith.constant 5.000000e-01 : f32
    %265 = vector.broadcast %cst_88 : f32 to vector<16x64xf32>
    %266 = arith.mulf %265, %264 : vector<16x64xf32>
    %cst_89 = arith.constant 4.471500e-02 : f32
    %267 = vector.broadcast %cst_89 : f32 to vector<16x64xf32>
    %268 = arith.mulf %267, %264 : vector<16x64xf32>
    %269 = arith.mulf %268, %264 : vector<16x64xf32>
    %270 = arith.mulf %269, %264 : vector<16x64xf32>
    %271 = arith.addf %264, %270 : vector<16x64xf32>
    %cst_90 = arith.constant 0.797884583 : f32
    %272 = vector.broadcast %cst_90 : f32 to vector<16x64xf32>
    %273 = arith.mulf %272, %271 : vector<16x64xf32>
    %274 = math.tanh %273 : vector<16x64xf32>
    %cst_91 = arith.constant 1.000000e+00 : f32
    %275 = vector.broadcast %cst_91 : f32 to vector<16x64xf32>
    %276 = arith.addf %275, %274 : vector<16x64xf32>
    %277 = arith.mulf %266, %276 : vector<16x64xf32>
    %278 = arith.truncf %277 : vector<16x64xf32> to vector<16x64xbf16>
    %c0_92 = arith.constant 0 : index
    %c0_93 = arith.constant 0 : index
    %279 = vector.load %arg12[%c0_92, %c0_93] : memref<64x32xbf16, #tpu.memory_space<vmem>>, vector<64x32xbf16>
    %cst_94 = arith.constant dense<0.000000e+00> : vector<16x32xf32>
    %280 = tpu.matmul %278, %279, %cst_94 {dimension_numbers = #tpu.dot_dimension_numbers<[1], [0], [0], [1], [0, 0, 1, 1], [], []>} : vector<16x64xbf16>, vector<64x32xbf16>, vector<16x32xf32> -> vector<16x32xf32>
    %c0_95 = arith.constant 0 : index
    %c0_96 = arith.constant 0 : index
    %281 = vector.load %arg13[%c0_95, %c0_96] : memref<1x32xf32, #tpu.memory_space<vmem>>, vector<1x32xf32>
    %282 = vector.broadcast %281 : vector<1x32xf32> to vector<16x32xf32>
    %283 = arith.addf %280, %282 : vector<16x32xf32>
    %284 = arith.addf %232, %283 : vector<16x32xf32>
    %c0_97 = arith.constant 0 : index
    %c0_98 = arith.constant 0 : index
    %285 = vector.load %arg14[%c0_97, %c0_98] : memref<16x32xf32, #tpu.memory_space<vmem>>, vector<16x32xf32>
    tpu.vector_store %arg14[%c0_97, %c0_98], %284 {strides = array<i32>} : memref<16x32xf32, #tpu.memory_space<vmem>>, vector<16x32xf32>,
    return
  }
  func.func @transform_0(%arg0: i32) -> (i32, i32) {
    %c0_i32 = arith.constant 0 : i32
    %c0_i32_0 = arith.constant 0 : i32
    return %arg0, %c0_i32 : i32, i32
  }
  func.func @transform_1(%arg0: i32) -> (i32, i32) {
    %c0_i32 = arith.constant 0 : i32
    %c0_i32_0 = arith.constant 0 : i32
    %c0_i32_1 = arith.constant 0 : i32
    return %c0_i32, %c0_i32_0 : i32, i32
  }
  func.func @transform_2(%arg0: i32) -> (i32, i32) {
    %c0_i32 = arith.constant 0 : i32
    %c0_i32_0 = arith.constant 0 : i32
    %c0_i32_1 = arith.constant 0 : i32
    return %c0_i32, %c0_i32_0 : i32, i32
  }
  func.func @transform_3(%arg0: i32) -> (i32, i32) {
    %c0_i32 = arith.constant 0 : i32
    %c0_i32_0 = arith.constant 0 : i32
    %c0_i32_1 = arith.constant 0 : i32
    return %c0_i32, %c0_i32_0 : i32, i32
  }
  func.func @transform_4(%arg0: i32) -> (i32, i32) {
    %c0_i32 = arith.constant 0 : i32
    %c0_i32_0 = arith.constant 0 : i32
    %c0_i32_1 = arith.constant 0 : i32
    return %c0_i32, %c0_i32_0 : i32, i32
  }
  func.func @transform_5(%arg0: i32) -> (i32, i32) {
    %c0_i32 = arith.constant 0 : i32
    %c0_i32_0 = arith.constant 0 : i32
    %c0_i32_1 = arith.constant 0 : i32
    return %c0_i32, %c0_i32_0 : i32, i32
  }
  func.func @transform_6(%arg0: i32) -> (i32, i32) {
    %c0_i32 = arith.constant 0 : i32
    %c0_i32_0 = arith.constant 0 : i32
    %c0_i32_1 = arith.constant 0 : i32
    return %c0_i32, %c0_i32_0 : i32, i32
  }
  func.func @transform_7(%arg0: i32) -> (i32, i32) {
    %c0_i32 = arith.constant 0 : i32
    %c0_i32_0 = arith.constant 0 : i32
    %c0_i32_1 = arith.constant 0 : i32
    return %c0_i32, %c0_i32_0 : i32, i32
  }
  func.func @transform_8(%arg0: i32) -> (i32, i32) {
    %c0_i32 = arith.constant 0 : i32
    %c0_i32_0 = arith.constant 0 : i32
    %c0_i32_1 = arith.constant 0 : i32
    return %c0_i32, %c0_i32_0 : i32, i32
  }
  func.func @transform_9(%arg0: i32) -> (i32, i32) {
    %c0_i32 = arith.constant 0 : i32
    %c0_i32_0 = arith.constant 0 : i32
    %c0_i32_1 = arith.constant 0 : i32
    return %c0_i32, %c0_i32_0 : i32, i32
  }
  func.func @transform_10(%arg0: i32) -> (i32, i32) {
    %c0_i32 = arith.constant 0 : i32
    %c0_i32_0 = arith.constant 0 : i32
    %c0_i32_1 = arith.constant 0 : i32
    return %c0_i32, %c0_i32_0 : i32, i32
  }
  func.func @transform_11(%arg0: i32) -> (i32, i32) {
    %c0_i32 = arith.constant 0 : i32
    %c0_i32_0 = arith.constant 0 : i32
    %c0_i32_1 = arith.constant 0 : i32
    return %c0_i32, %c0_i32_0 : i32, i32
  }
  func.func @transform_12(%arg0: i32) -> (i32, i32) {
    %c0_i32 = arith.constant 0 : i32
    %c0_i32_0 = arith.constant 0 : i32
    %c0_i32_1 = arith.constant 0 : i32
    return %c0_i32, %c0_i32_0 : i32, i32
  }
  func.func @transform_13(%arg0: i32) -> (i32, i32) {
    %c0_i32 = arith.constant 0 : i32
    %c0_i32_0 = arith.constant 0 : i32
    return %arg0, %c0_i32 : i32, i32
  }
}

module attributes {stable_mosaic.version = 11 : i64} {
  func.func @_clip_head_kernel(%arg0: memref<2x32xf32, #tpu.memory_space<vmem>>, %arg1: memref<2x32xf32, #tpu.memory_space<vmem>>, %arg2: memref<1x32xf32, #tpu.memory_space<vmem>>, %arg3: memref<1x32xf32, #tpu.memory_space<vmem>>, %arg4: memref<1x32xf32, #tpu.memory_space<vmem>>, %arg5: memref<1x32xf32, #tpu.memory_space<vmem>>, %arg6: memref<32x32xbf16, #tpu.memory_space<vmem>>, %arg7: memref<1x1xf32, #tpu.memory_space<vmem>>, %arg8: memref<2x2xf32, #tpu.memory_space<vmem>>) attributes {dimension_semantics = [], scalar_prefetch = 0 : i64, scratch_operands = 0 : i64, tpu.core_type = #tpu.core_type<tc>} {
    %c0 = arith.constant 0 : index
    %c0_0 = arith.constant 0 : index
    %0 = vector.load %arg0[%c0, %c0_0] : memref<2x32xf32, #tpu.memory_space<vmem>>, vector<2x32xf32>
    %c0_1 = arith.constant 0 : index
    %c0_2 = arith.constant 0 : index
    %1 = vector.load %arg2[%c0_1, %c0_2] : memref<1x32xf32, #tpu.memory_space<vmem>>, vector<1x32xf32>
    %c0_3 = arith.constant 0 : index
    %c0_4 = arith.constant 0 : index
    %2 = vector.load %arg3[%c0_3, %c0_4] : memref<1x32xf32, #tpu.memory_space<vmem>>, vector<1x32xf32>
    %cst = arith.constant dense<0.000000e+00> : vector<2xf32>
    %3 = vector.multi_reduction <add>, %0, %cst [1] : vector<2x32xf32> to vector<2xf32>
    %4 = vector.shape_cast %3 : vector<2xf32> to vector<2x1xf32>
    %cst_5 = arith.constant 3.200000e+01 : f32
    %5 = vector.broadcast %cst_5 : f32 to vector<2x1xf32>
    %6 = arith.divf %4, %5 : vector<2x1xf32>
    %7 = vector.broadcast %6 : vector<2x1xf32> to vector<2x32xf32>
    %8 = arith.subf %0, %7 : vector<2x32xf32>
    %9 = vector.broadcast %6 : vector<2x1xf32> to vector<2x32xf32>
    %10 = arith.subf %0, %9 : vector<2x32xf32>
    %11 = arith.mulf %8, %10 : vector<2x32xf32>
    %cst_6 = arith.constant dense<0.000000e+00> : vector<2xf32>
    %12 = vector.multi_reduction <add>, %11, %cst_6 [1] : vector<2x32xf32> to vector<2xf32>
    %13 = vector.shape_cast %12 : vector<2xf32> to vector<2x1xf32>
    %cst_7 = arith.constant 3.200000e+01 : f32
    %14 = vector.broadcast %cst_7 : f32 to vector<2x1xf32>
    %15 = arith.divf %13, %14 : vector<2x1xf32>
    %16 = vector.broadcast %6 : vector<2x1xf32> to vector<2x32xf32>
    %17 = arith.subf %0, %16 : vector<2x32xf32>
    %cst_8 = arith.constant 9.99999974E-6 : f32
    %18 = vector.broadcast %cst_8 : f32 to vector<2x1xf32>
    %19 = arith.addf %15, %18 : vector<2x1xf32>
    %20 = math.rsqrt %19 : vector<2x1xf32>
    %21 = vector.broadcast %20 : vector<2x1xf32> to vector<2x32xf32>
    %22 = arith.mulf %17, %21 : vector<2x32xf32>
    %23 = vector.broadcast %1 : vector<1x32xf32> to vector<2x32xf32>
    %24 = arith.mulf %22, %23 : vector<2x32xf32>
    %25 = vector.broadcast %2 : vector<1x32xf32> to vector<2x32xf32>
    %26 = arith.addf %24, %25 : vector<2x32xf32>
    %c0_9 = arith.constant 0 : index
    %c0_10 = arith.constant 0 : index
    %27 = vector.load %arg1[%c0_9, %c0_10] : memref<2x32xf32, #tpu.memory_space<vmem>>, vector<2x32xf32>
    %c0_11 = arith.constant 0 : index
    %c0_12 = arith.constant 0 : index
    %28 = vector.load %arg4[%c0_11, %c0_12] : memref<1x32xf32, #tpu.memory_space<vmem>>, vector<1x32xf32>
    %c0_13 = arith.constant 0 : index
    %c0_14 = arith.constant 0 : index
    %29 = vector.load %arg5[%c0_13, %c0_14] : memref<1x32xf32, #tpu.memory_space<vmem>>, vector<1x32xf32>
    %cst_15 = arith.constant dense<0.000000e+00> : vector<2xf32>
    %30 = vector.multi_reduction <add>, %27, %cst_15 [1] : vector<2x32xf32> to vector<2xf32>
    %31 = vector.shape_cast %30 : vector<2xf32> to vector<2x1xf32>
    %cst_16 = arith.constant 3.200000e+01 : f32
    %32 = vector.broadcast %cst_16 : f32 to vector<2x1xf32>
    %33 = arith.divf %31, %32 : vector<2x1xf32>
    %34 = vector.broadcast %33 : vector<2x1xf32> to vector<2x32xf32>
    %35 = arith.subf %27, %34 : vector<2x32xf32>
    %36 = vector.broadcast %33 : vector<2x1xf32> to vector<2x32xf32>
    %37 = arith.subf %27, %36 : vector<2x32xf32>
    %38 = arith.mulf %35, %37 : vector<2x32xf32>
    %cst_17 = arith.constant dense<0.000000e+00> : vector<2xf32>
    %39 = vector.multi_reduction <add>, %38, %cst_17 [1] : vector<2x32xf32> to vector<2xf32>
    %40 = vector.shape_cast %39 : vector<2xf32> to vector<2x1xf32>
    %cst_18 = arith.constant 3.200000e+01 : f32
    %41 = vector.broadcast %cst_18 : f32 to vector<2x1xf32>
    %42 = arith.divf %40, %41 : vector<2x1xf32>
    %43 = vector.broadcast %33 : vector<2x1xf32> to vector<2x32xf32>
    %44 = arith.subf %27, %43 : vector<2x32xf32>
    %cst_19 = arith.constant 9.99999974E-6 : f32
    %45 = vector.broadcast %cst_19 : f32 to vector<2x1xf32>
    %46 = arith.addf %42, %45 : vector<2x1xf32>
    %47 = math.rsqrt %46 : vector<2x1xf32>
    %48 = vector.broadcast %47 : vector<2x1xf32> to vector<2x32xf32>
    %49 = arith.mulf %44, %48 : vector<2x32xf32>
    %50 = vector.broadcast %28 : vector<1x32xf32> to vector<2x32xf32>
    %51 = arith.mulf %49, %50 : vector<2x32xf32>
    %52 = vector.broadcast %29 : vector<1x32xf32> to vector<2x32xf32>
    %53 = arith.addf %51, %52 : vector<2x32xf32>
    %54 = arith.truncf %26 : vector<2x32xf32> to vector<2x32xbf16>
    %c0_20 = arith.constant 0 : index
    %c0_21 = arith.constant 0 : index
    %55 = vector.load %arg6[%c0_20, %c0_21] : memref<32x32xbf16, #tpu.memory_space<vmem>>, vector<32x32xbf16>
    %cst_22 = arith.constant dense<0.000000e+00> : vector<2x32xf32>
    %56 = tpu.matmul %54, %55, %cst_22 {dimension_numbers = #tpu.dot_dimension_numbers<[1], [0], [0], [1], [0, 0, 1, 1], [], []>} : vector<2x32xbf16>, vector<32x32xbf16>, vector<2x32xf32> -> vector<2x32xf32>
    %57 = arith.truncf %53 : vector<2x32xf32> to vector<2x32xbf16>
    %c0_23 = arith.constant 0 : index
    %c0_24 = arith.constant 0 : index
    %58 = vector.load %arg6[%c0_23, %c0_24] : memref<32x32xbf16, #tpu.memory_space<vmem>>, vector<32x32xbf16>
    %cst_25 = arith.constant dense<0.000000e+00> : vector<2x32xf32>
    %59 = tpu.matmul %57, %58, %cst_25 {dimension_numbers = #tpu.dot_dimension_numbers<[1], [0], [0], [1], [0, 0, 1, 1], [], []>} : vector<2x32xbf16>, vector<32x32xbf16>, vector<2x32xf32> -> vector<2x32xf32>
    %60 = arith.mulf %56, %56 : vector<2x32xf32>
    %cst_26 = arith.constant dense<0.000000e+00> : vector<2xf32>
    %61 = vector.multi_reduction <add>, %60, %cst_26 [1] : vector<2x32xf32> to vector<2xf32>
    %62 = vector.shape_cast %61 : vector<2xf32> to vector<2x1xf32>
    %63 = math.rsqrt %62 : vector<2x1xf32>
    %64 = vector.broadcast %63 : vector<2x1xf32> to vector<2x32xf32>
    %65 = arith.mulf %56, %64 : vector<2x32xf32>
    %66 = arith.mulf %59, %59 : vector<2x32xf32>
    %cst_27 = arith.constant dense<0.000000e+00> : vector<2xf32>
    %67 = vector.multi_reduction <add>, %66, %cst_27 [1] : vector<2x32xf32> to vector<2xf32>
    %68 = vector.shape_cast %67 : vector<2xf32> to vector<2x1xf32>
    %69 = math.rsqrt %68 : vector<2x1xf32>
    %70 = vector.broadcast %69 : vector<2x1xf32> to vector<2x32xf32>
    %71 = arith.mulf %59, %70 : vector<2x32xf32>
    %c0_28 = arith.constant 0 : index
    %c0_29 = arith.constant 0 : index
    %72 = vector.load %arg7[%c0_28, %c0_29] : memref<1x1xf32, #tpu.memory_space<vmem>>, vector<1x1xf32>
    %73 = math.exp %72 : vector<1x1xf32>
    %cst_30 = arith.constant dense<0.000000e+00> : vector<2x2xf32>
    %74 = tpu.matmul %65, %71, %cst_30 {dimension_numbers = #tpu.dot_dimension_numbers<[1], [1], [0], [0], [0, 0, 1, 0], [], []>} : vector<2x32xf32>, vector<2x32xf32>, vector<2x2xf32> -> vector<2x2xf32>
    %75 = vector.broadcast %73 : vector<1x1xf32> to vector<2x2xf32>
    %76 = arith.mulf %75, %74 : vector<2x2xf32>
    %c0_31 = arith.constant 0 : index
    %c0_32 = arith.constant 0 : index
    %77 = vector.load %arg8[%c0_31, %c0_32] : memref<2x2xf32, #tpu.memory_space<vmem>>, vector<2x2xf32>
    tpu.vector_store %arg8[%c0_31, %c0_32], %76 {strides = array<i32>} : memref<2x2xf32, #tpu.memory_space<vmem>>, vector<2x2xf32>,
    return
  }
}

</mosaic_0001>

<bundles_post_ra>
// kernel: clip_forward.6
= control target key start
LH: loop header
LB: loop body
LE: loop exit
PB: predicated region body
PF: predicated region fallthrough
CT: control target
= control target key end

     0   :  { %s480_s18 = smov 0   ;;  %s524_s0 = inlined_call_operand.vmem [shape: f32[2,16,64], index: 0, kind: input, shape index: {}]   ;;  %s525_s1 = inlined_call_operand.vmem [shape: bf16[64,32], index: 1, kind: input, shape index: {}]   ;;  %s526_s2 = inlined_call_operand.vmem [shape: f32[1,32], index: 2, kind: input, shape index: {}]   ;;  %s527_s3 = inlined_call_operand.vmem [shape: f32[1,32], index: 3, kind: input, shape index: {}]   ;;  %s528_s4 = inlined_call_operand.vmem [shape: f32[17,32], index: 4, kind: input, shape index: {}]   ;;  %s529_s5 = inlined_call_operand.vmem [shape: f32[2,17,32], index: 5, kind: output, shape index: {}]  }
   0x1 LB: > { %s391_s19 = sadd.s32 4294967295, %s446_s18   ;;  %p395_p0 = scmp.ge.s32.totalorder %s446_s18, 1  ;;  %s446_s18 = sphi %s480_s18, %s15_s18  }
   0x2   : > { %p187_p1 = scmp.lt.s32.totalorder %s446_s18, 3 }
   0x4   : > { %p188_p2 = pnand %p395_p0, %p187_p1 }
   0x5   : > { %v436_v0 = vld [vmem:[%s525_s1] sm:$0xff] (!%p188_p2)   ;;  %v448_v1 = vmov (!%p188_p2), 0.0   ;;  %v437_v2 = vld [vmem:[%s525_s1 + $0x8] sm:$0xff] (!%p188_p2)   ;;  %vm449_vm0 = vmmov (!%p188_p2), 0   ;;  %p215_p3 = scmp.lt.s32.totalorder (!%p188_p2), %s391_s19, 1  ;;  %v438_v3 = vld [vmem:[%s525_s1 + $0x10] sm:$0xff] (!%p188_p2)  }
   0x6   : > { %191 = sbr.rel (%p188_p2) target bundleno = 241 (0xf1), region = 40  ;;  %413 = vmatprep.subr.bf16.mxu0 (!%p188_p2), %v448_v1  ;;  %421 = vmatprep.mubr.msk.bf16.mxu0 (!%p188_p2), %vm449_vm0, %v448_v1  ;;  %v439_v4 = vld [vmem:[%s525_s1 + $0x18] sm:$0xff] (!%p188_p2)   ;;  %vm268_vm1 = vcmask (!%p188_p2), 523264   ;;  %v313_v8 = vld [vmem:[%s528_s4] sm:$0xff] (!%p188_p2)  ;;  %vm318_vm2 = vcmask (!%p188_p2), 253952   ;;  %v314_v11 = vld [vmem:[%s528_s4 + $0x8] sm:$0xff] (!%p188_p2) }
   0x7   : > { %414 = vmatpush3.bf16.msra.mxu0 (!%p188_p2), %v436_v0  ;;  %v316_v9 = vld [vmem:[%s527_s3] sm:$0x1] (!%p188_p2)  ;;  %v315_v12 = vld [vmem:[%s528_s4 + $0x10] sm:$0x1] (!%p188_p2)  ;;  %v324_v13 = vrot.slane (!%p188_p2), %v313_v8, 1  ;;  %v325_v14 = vrot.slane (!%p188_p2), %v314_v11, 1 }
   0x8   : > { %415 = vmatprep.subr.bf16.mxu0 (!%p188_p2), %v448_v1  ;;  %v317_v10 = vadd.f32 (!%p188_p2), %v316_v9, %v313_v8  ;;  %vm323_vm3 = vcmask (!%p188_p2), 1046528   ;;  %v399_v15 = vld [vmem:[%s526_s2] ss:$0 sm:$0xff] (!%p188_p2)  ;;  %v327_v16 = vrot.slane (!%p188_p2), %v315_v12, 1  ;;  %vm333_vm4 = vcmask (!%p188_p2), 261120  }
   0x9   : > { %v326_v18 = vsel (!%p188_p2), %vm323_vm3, %v324_v13, %v325_v14 }
   0xa   : > { %v328_v22 = vsel (!%p188_p2), %vm323_vm3, %v325_v14, %v327_v16 }
   0xb   : > { %416 = vmatpush3.bf16.msra.mxu0 (!%p188_p2), %v437_v2 }
   0xc   : > { %417 = vmatprep.subr.bf16.mxu0 (!%p188_p2), %v448_v1 }
   0xd   : > { %s531_s19 = smov (!%p215_p3, %s391_s19), 1 }
   0xe   : > { %s407_s26 = sshll.u32 %s531_s19, 4  ;;  %s425_s7 = smul.u32 24, %s531_s19 }
   0xf   : > { %s219_s29 = scalar_lea.vmem %s524_s0, %s407_s26  ;;  %418 = vmatpush3.bf16.msra.mxu0 %v438_v3 }
  0x10   : > { %v226_v5 = vld [vmem:[%s219_s29] sm:$0xff]  ;;  %v227_v6 = vld [vmem:[%s219_s29 + $0x8] sm:$0xff]  ;;  %419 = vmatprep.subr.bf16.mxu0 %v448_v1  ;;  %s224_s14 = scalar_lea.vmem %s529_s5, %s425_s7 }
  0x11   : > { %v228_v7 = vpack.c.bf16 %v227_v6, %v226_v5  ;;  %319 = vst.msk [vmem:[%s224_s14] sm:$0x1] %vm318_vm2, %v317_v10 }
  0x13   : > { %420 = vmatpush3.bf16.msra.mxu0 %v439_v4 }
  0x16   : > { %422 = vmatmul.mubr.msk.bf16.vlgmr.msra.gmra.mrb[0].mxu0 %vm268_vm1, %v228_v7 }
  0xe9   : > { %v306_v17 = vpop.f32.mrb[0].mxu0 }
  0xea   : > { %v307_v19 = vadd.f32 %v399_v15, %v306_v17  ;;  %v423_v20 = vpop.f32.mrb[1].mxu0 }
  0xeb   : > { %v309_v21 = vpop.f32.mrb[2].mxu0 }
  0xec   : > { %v331_v23 = vadd.f32 %v326_v18, %v307_v19  ;;  %v310_v24 = vadd.f32 %v399_v15, %v309_v21  ;;  %v424_v25 = vpop.f32.mrb[3].mxu0 }
  0xee   : > { %334 = vst.msk [vmem:[%s224_s14 + $0x1] sm:$0xff] %vm333_vm4, %v331_v23  ;;  %v332_v26 = vadd.f32 %v328_v22, %v310_v24 }
  0xf0   : > { %335 = vst.msk [vmem:[%s224_s14 + $0x9] sm:$0xff] %vm333_vm4, %v332_v26 }
  0xf1 PF: > { %s15_s18 = sadd.s32 1, %s446_s18  }
  0xf2   : > { %p12_p4 = scmp.ge.s32.totalorder %s15_s18, 4  }
  0xf4   :  { %14 = sbr.rel (!%p12_p4) target bundleno = 1 (0x1), region = 70 }

// kernel: clip_forward.11
= control target key start
LH: loop header
LB: loop body
LE: loop exit
PB: predicated region body
PF: predicated region fallthrough
CT: control target
= control target key end

     0   :  { %vm35_vm0 = vcmask 254976   ;;  %v361_v14 = vmov 0.0   ;;  %vm362_vm1 = vmmov 0   ;;  %vm111_vm2 = vcmask 261120   ;;  %s452_s1 = inlined_call_operand.vmem [shape: f32[2,32], index: 1, kind: input, shape index: {}]   ;;  %s453_s0 = inlined_call_operand.vmem [shape: f32[2,32], index: 0, kind: input, shape index: {}]   ;;  %s454_s6 = inlined_call_operand.vmem [shape: bf16[32,32], index: 6, kind: input, shape index: {}]   ;;  %s455_s4 = inlined_call_operand.vmem [shape: f32[1,32], index: 4, kind: input, shape index: {}]   ;;  %s456_s5 = inlined_call_operand.vmem [shape: f32[1,32], index: 5, kind: input, shape index: {}]   ;;  %s457_s2 = inlined_call_operand.vmem [shape: f32[1,32], index: 2, kind: input, shape index: {}]   ;;  %s458_s3 = inlined_call_operand.vmem [shape: f32[1,32], index: 3, kind: input, shape index: {}]   ;;  %s459_s7 = inlined_call_operand.<no memory space> [shape: f32[1,1], index: 7, kind: input, shape index: {}]   ;;  %s460_s8 = inlined_call_operand.vmem [shape: f32[2,2], index: 8, kind: output, shape index: {}]  }
   0x1   :  { %v64_v0 = vld [vmem:[%s452_s1] sm:$0x3]  ;;  %332 = vmatprep.subr.bf16.mxu1 %v361_v14  ;;  %324 = vmatprep.subr.bf16.mxu0 %v361_v14  ;;  %v350_v16 = vld [vmem:[%s454_s6 + $0x8] sm:$0xff]   ;;  %v363_v49 = vmov 0   ;;  %v13_v50 = vstv %s459_s7  ;;  %v291_v53 = vlaneseq  ;;  %vm300_vm3 = vcmask 9216  }
   0x2   :  { %v32_v1 = vld [vmem:[%s453_s0] sm:$0x3]  ;;  %v67_v2 = vsel %vm35_vm0, %v64_v0, 0.0  ;;  %336 = vmatprep.mubr.msk.bf16.mxu1 %vm362_vm1, %v361_v14  ;;  %328 = vmatprep.mubr.msk.bf16.mxu0 %vm362_vm1, %v361_v14  ;;  %14 = vst [vmem:[#allocation2] sm:$0x1] %v13_v50 }
   0x3   :  { %68 = vadd.xlane.f32.xlu0 %v67_v2  ;;  %v36_v3 = vsel %vm35_vm0, %v32_v1, 0.0  ;;  %v349_v15 = vld [vmem:[%s454_s6] sm:$0xff]   ;;  %v292_v54 = vshrl.u32 %v291_v53, 7 }
   0x4   :  { %333 = vmatpush3.bf16.msra.mxu1 %v349_v15  ;;  %325 = vmatpush3.bf16.msra.mxu0 %v349_v15  ;;  %v308_v24 = vld [vmem:[%s455_s4] ss:$0 sm:$0xff] }
   0x5   :  { %334 = vmatprep.subr.bf16.mxu1 %v361_v14  ;;  %326 = vmatprep.subr.bf16.mxu0 %v361_v14  ;;  %v309_v26 = vld [vmem:[%s456_s5] ss:$0 sm:$0xff]  ;;  %v293_v55 = vsub.s32 0, %v292_v54 }
   0x6   :  { %v306_v29 = vld [vmem:[%s457_s2] ss:$0 sm:$0xff]  ;;  %348 = vset.pattern.permute.xlu0 %v363_v49 }
   0x7   :  { %37 = vadd.xlane.f32.xlu0 %v36_v3  ;;  %v307_v32 = vld [vmem:[%s458_s3] ss:$0 sm:$0xff] }
   0x8   :  { %335 = vmatpush3.bf16.msra.mxu1 %v350_v16  ;;  %327 = vmatpush3.bf16.msra.mxu0 %v350_v16 }
   0x9   :  { %340 = vmatprep.subr.mxu0 %v361_v14  ;;  %v211_v51 = vld [vmem:[#allocation2] sm:$0x1] }
   0xa   :  { %v212_v52 = vmul.f32 1.442695, %v211_v51 }
  0x90   :  { %v69_v4 = vpop.xlane.xlu0 %68 }
  0x91   :  { %v70_v5 = vmul.f32 0.03125, %v69_v4 }
  0x93   :  { %v71_v6 = vsub.f32 %v64_v0, %v70_v5 }
  0x94   :  { %v38_v7 = vpop.xlane.xlu0 %37 }
  0x95   :  { %v40_v8 = vmul.f32 0.03125, %v38_v7  ;;  %v72_v9 = vmul.f32 %v71_v6, %v71_v6 }
  0x97   :  { %v41_v10 = vsub.f32 %v32_v1, %v40_v8  ;;  %v73_v11 = vsel %vm35_vm0, %v72_v9, 0.0 }
  0x98   :  { %74 = vadd.xlane.f32.xlu1 %v73_v11 }
  0x99   :  { %v42_v12 = vmul.f32 %v41_v10, %v41_v10 }
  0x9b   :  { %v43_v13 = vsel %vm35_vm0, %v42_v12, 0.0 }
  0x9c   :  { %44 = vadd.xlane.f32.xlu1 %v43_v13 }
 0x125   :  { %v75_v17 = vpop.xlane.xlu1 %74 }
 0x126   :  { %v76_v18 = vmul.f32 0.03125, %v75_v17 }
 0x128   :  { %v77_v19 = vadd.f32 1e-05, %v76_v18 }
 0x129   :  { %v45_v20 = vpop.xlane.xlu1 %44 }
 0x12a   :  { %351 = vrsqrt.f32 %v77_v19  ;;  %v46_v21 = vmul.f32 0.03125, %v45_v20 }
 0x12c   :  { %v47_v22 = vadd.f32 1e-05, %v46_v21 }
 0x12e   :  { %353 = vrsqrt.f32 %v47_v22 }
 0x12f   :  { %355 = vpow2.f32 %v212_v52 }
 0x134   :  { %v352_v23 = vpop.eup %351 }
 0x135   :  { %v79_v25 = vmul.f32 %v352_v23, %v71_v6 }
 0x137   :  { %v86_v27 = vmul.f32 %v308_v24, %v79_v25 }
 0x138   :  { %v354_v28 = vpop.eup %353 }
 0x139   :  { %v93_v30 = vadd.f32 %v309_v26, %v86_v27  ;;  %v49_v31 = vmul.f32 %v354_v28, %v41_v10  ;;  %v356_v56 = vpop.eup %355 }
 0x13a   :  { %v294_v57 = vrot.slane %v356_v56, %v293_v55 }
 0x13b   :  { %v155_v33 = vpack.c.bf16 %v93_v30, %v93_v30  ;;  %v56_v34 = vmul.f32 %v306_v29, %v49_v31 }
 0x13d   :  { %337 = vmatmul.mubr.msk.bf16.vlgmr.msra.gmra.mrb[0].mxu1 %vm111_vm2, %v155_v33  ;;  %v63_v35 = vadd.f32 %v307_v32, %v56_v34 }
 0x13f   :  { %v94_v36 = vpack.c.bf16 %v63_v35, %v63_v35 }
 0x141   :  { %329 = vmatmul.mubr.msk.bf16.vlgmr.msra.gmra.mrb[0].mxu0 %vm111_vm2, %v94_v36 }
 0x142   :  { %342 = vmatprep.mubr.msk.f32.mxu0 %vm362_vm1, %v361_v14 }
 0x210   :  { %v193_v37 = vpop.f32.mrb[0].mxu1 }
 0x211   :  { %v205_v38 = vmul.f32 %v193_v37, %v193_v37  ;;  %v338_v39 = vpop.f32.mrb[1].mxu1 }
 0x212   :  { %v196_v40 = vpop.f32.mrb[2].mxu1 }
 0x213   :  { %v339_v41 = vpop.f32.mrb[3].mxu1  ;;  %v206_v42 = vsel %vm35_vm0, %v205_v38, 0.0 }
 0x214   :  { %207 = vadd.xlane.f32.xlu0 %v206_v42  ;;  %v149_v43 = vpop.f32.mrb[0].mxu0 }
 0x215   :  { %v199_v44 = vmul.f32 %v149_v43, %v149_v43  ;;  %v330_v45 = vpop.f32.mrb[1].mxu0 }
 0x216   :  { %v152_v46 = vpop.f32.mrb[2].mxu0 }
 0x217   :  { %v331_v47 = vpop.f32.mrb[3].mxu0  ;;  %v200_v48 = vsel %vm35_vm0, %v199_v44, 0.0 }
 0x218   :  { %201 = vadd.xlane.f32.xlu1 %v200_v48 }
 0x22a   :  { %296 = vperm.xlu0 %348, %v294_v57  }
 0x2a1   :  { %v208_v58 = vpop.xlane.xlu0 %207 }
 0x2a2   :  { %357 = vrsqrt.f32 %v208_v58 }
 0x2a5   :  { %v202_v59 = vpop.xlane.xlu1 %201 }
 0x2a6   :  { %359 = vrsqrt.f32 %v202_v59 }
 0x2a9   :  { %v297_v0 = vpop.permute.xlu0 %296 }
 0x2ac   :  { %v358_v60 = vpop.eup %357 }
 0x2ad   :  { %v210_v61 = vmul.f32 %v358_v60, %v193_v37 }
 0x2af   :  { %341 = vmatpush3.xpose.msk.msra.mxu0 %vm111_vm2, %v210_v61 }
 0x2b0   :  { %v360_v62 = vpop.eup %359 }
 0x2b1   :  { %v204_v63 = vmul.f32 %v360_v62, %v149_v43 }
 0x2b3   :  { %343 = vmatmul.mubr.msk.f32.vlgmr.msra.gmra.mrb[4].mxu0 %vm111_vm2, %v204_v63 }
 0x386   :  { %v286_v1 = vpop.f32.mrb[4].mxu0 }
 0x387   :  { %v299_v2 = vmul.f32 %v297_v0, %v286_v1  ;;  %v344_v3 = vpop.f32.mrb[5].mxu0 }
 0x389   :  { %301 = vst.msk [vmem:[%s460_s8] sm:$0x3] %vm300_vm3, %v299_v2 }

// kernel: clip_forward.7
= control target key start
LH: loop header
LB: loop body
LE: loop exit
PB: predicated region body
PF: predicated region fallthrough
CT: control target
= control target key end

     0   :  { %vm52_vm0 = vcmask 261120   ;;  %vm65_vm1 = vcmask 254976   ;;  %v2678_v30 = vmov 0.0   ;;  %vm2679_vm2 = vmmov 0   ;;  %s2680_s25 = smov 120   ;;  %s2681_s26 = smov 96   ;;  %s3402_s0 = inlined_call_operand.vmem [shape: f32[34,32], index: 0, kind: input, shape index: {}]   ;;  %s3403_s3 = inlined_call_operand.vmem [shape: bf16[32,96], index: 3, kind: input, shape index: {}]   ;;  %s3404_s1 = inlined_call_operand.vmem [shape: f32[1,32], index: 1, kind: input, shape index: {}]   ;;  %s3405_s2 = inlined_call_operand.vmem [shape: f32[1,32], index: 2, kind: input, shape index: {}]   ;;  %s3406_s4 = inlined_call_operand.vmem [shape: f32[1,96], index: 4, kind: input, shape index: {}]   ;;  %s3407_s5 = inlined_call_operand.vmem [shape: bf16[32,32], index: 5, kind: input, shape index: {}]   ;;  %s3408_s6 = inlined_call_operand.vmem [shape: f32[1,32], index: 6, kind: input, shape index: {}]   ;;  %s3409_s9 = inlined_call_operand.vmem [shape: bf16[32,64], index: 9, kind: input, shape index: {}]   ;;  %s3410_s7 = inlined_call_operand.vmem [shape: f32[1,32], index: 7, kind: input, shape index: {}]   ;;  %s3411_s8 = inlined_call_operand.vmem [shape: f32[1,32], index: 8, kind: input, shape index: {}]   ;;  %s3412_s11 = inlined_call_operand.vmem [shape: bf16[64,32], index: 11, kind: input, shape index: {}]   ;;  %s3413_s10 = inlined_call_operand.vmem [shape: f32[1,64], index: 10, kind: input, shape index: {}]   ;;  %s3414_s12 = inlined_call_operand.vmem [shape: f32[1,32], index: 12, kind: input, shape index: {}]   ;;  %s3415_s13 = inlined_call_operand.vmem [shape: f32[34,32], index: 13, kind: output, shape index: {}]  }
   0x1   :  { %v45_v0 = vld [vmem:[%s3402_s0] sm:$0xff]  ;;  %v47_v1 = vld [vmem:[%s3402_s0 + $0x10] sm:$0xff]  ;;  %v46_v2 = vld [vmem:[%s3402_s0 + $0x8] sm:$0xff]  ;;  %2324 = vmatprep.subr.bf16.mxu1 %v2678_v30  ;;  %2328 = vmatprep.mubr.msk.bf16.mxu1 %vm2679_vm2, %v2678_v30  ;;  %vm241_vm3 = vcmask 64512   ;;  %s2683_s27 = smov 80   ;;  %s2684_s28 = smov 72  }
   0x2   :  { %v53_v3 = vsel %vm52_vm0, %v45_v0, 0.0  ;;  %v59_v4 = vsel %vm52_vm0, %v47_v1, 0.0  ;;  %v48_v5 = vld [vmem:[%s3402_s0 + $0x18] sm:$0xff]  ;;  %v56_v6 = vsel %vm52_vm0, %v46_v2, 0.0  ;;  %v49_v26 = vld [vmem:[%s3402_s0 + $0x20] sm:$0x3] }
   0x3   :  { %54 = vadd.xlane.f32.xlu0 %v53_v3  ;;  %60 = vadd.xlane.f32.xlu1 %v59_v4  ;;  %v62_v7 = vsel %vm52_vm0, %v48_v5, 0.0  ;;  %v66_v28 = vsel %vm65_vm1, %v49_v26, 0.0  ;;  %v2553_v31 = vld [vmem:[%s3403_s3] sm:$0xff]   ;;  %v2554_v32 = vld [vmem:[%s3403_s3 + $0x8] sm:$0xff]   ;;  %s2685_s29 = smov 112   ;;  %s2686_s30 = smov 88  }
   0x4   :  { %2325 = vmatpush3.bf16.msra.mxu1 %v2553_v31  ;;  %v2176_v52 = vld [vmem:[%s3404_s1] ss:$0 sm:$0xff]  ;;  %vm350_vm4 = vcmask 1040384   ;;  %vm980_vm5 = vsmask.f32 7424  ;;  %vm312_vm6 = vcmask 131072  }
   0x5   :  { %2326 = vmatprep.subr.bf16.mxu1 %v2678_v30  ;;  %v2177_v57 = vld [vmem:[%s3405_s2] ss:$0 sm:$0xff]  ;;  %vm305_vm7 = vcmask 138240   ;;  %s2688_s14 = smov 64   ;;  %s2689_s15 = smov 48   ;;  %vm597_vm8 = vcmask 130112  }
   0x6   :  { %s2690_s16 = smov 56   ;;  %s2691_s17 = smov 40   ;;  %vm412_vm9 = vcmask 57344   ;;  %vm785_vm10 = vcmask 195712   ;;  %vm973_vm11 = vcmask 261312   ;;  %vm600_vm12 = vcmask 122944  }
   0x7   :  { %57 = vadd.xlane.f32.xlu0 %v56_v6  ;;  %63 = vadd.xlane.f32.xlu1 %v62_v7  ;;  %s2692_s18 = smov 8   ;;  %s2693_s19 = smov 16   ;;  %vm788_vm13 = vcmask 188544   ;;  %vm976_vm14 = vcmask 254144   ;;  %vm2096_vm15 = vcmask 523264  }
   0x8   :  { %2327 = vmatpush3.bf16.msra.mxu1 %v2554_v32  ;;  %s2694_s3 = smov 24  }
  0x90   :  { %v55_v8 = vpop.xlane.xlu0 %54  ;;  %v61_v9 = vpop.xlane.xlu1 %60 }
  0x91   :  { %v70_v10 = vmul.f32 0.03125, %v55_v8  ;;  %v72_v11 = vmul.f32 0.03125, %v61_v9 }
  0x93   :  { %v75_v12 = vsub.f32 %v45_v0, %v70_v10  ;;  %v2781_v13 = vsub.f32 %v47_v1, %v72_v11 }
  0x94   :  { %v58_v14 = vpop.xlane.xlu0 %57  ;;  %v64_v15 = vpop.xlane.xlu1 %63 }
  0x95   :  { %v71_v16 = vmul.f32 0.03125, %v58_v14  ;;  %v73_v17 = vmul.f32 0.03125, %v64_v15  ;;  %v80_v18 = vmul.f32 %v75_v12, %v75_v12  ;;  %v82_v19 = vmul.f32 %v2781_v13, %v2781_v13  ;;  %v2821_v14 = vld [vmem:[%s3406_s4] ss:$0 sm:$0xff]  ;;  %s2682_s4 = smov 104  }
  0x97   :  { %v76_v20 = vsub.f32 %v46_v2, %v71_v16  ;;  %v78_v21 = vsub.f32 %v48_v5, %v73_v17  ;;  %v85_v22 = vsel %vm52_vm0, %v80_v18, 0.0  ;;  %v91_v23 = vsel %vm52_vm0, %v82_v19, 0.0 }
  0x98   :  { %86 = vadd.xlane.f32.xlu0 %v85_v22 }
  0x99   :  { %v81_v24 = vmul.f32 %v76_v20, %v76_v20  ;;  %v83_v25 = vmul.f32 %v78_v21, %v78_v21 }
  0x9b   :  { %v88_v27 = vsel %vm52_vm0, %v81_v24, 0.0  ;;  %v94_v29 = vsel %vm52_vm0, %v83_v25, 0.0 }
  0x9c   :  { %92 = vadd.xlane.f32.xlu0 %v91_v23  ;;  %89 = vadd.xlane.f32.xlu1 %v88_v27 }
  0xa0   :  { %67 = vadd.xlane.f32.xlu0 %v66_v28  ;;  %95 = vadd.xlane.f32.xlu1 %v94_v29 }
 0x125   :  { %v87_v33 = vpop.xlane.xlu0 %86 }
 0x126   :  { %v100_v34 = vmul.f32 0.03125, %v87_v33 }
 0x128   :  { %v105_v35 = vadd.f32 1e-05, %v100_v34 }
 0x129   :  { %v90_v36 = vpop.xlane.xlu1 %89  ;;  %v93_v37 = vpop.xlane.xlu0 %92 }
 0x12a   :  { %2563 = vrsqrt.f32 %v105_v35  ;;  %v101_v38 = vmul.f32 0.03125, %v90_v36  ;;  %v102_v39 = vmul.f32 0.03125, %v93_v37 }
 0x12c   :  { %v106_v40 = vadd.f32 1e-05, %v101_v38  ;;  %v107_v41 = vadd.f32 1e-05, %v102_v39 }
 0x12d   :  { %v96_v42 = vpop.xlane.xlu1 %95  ;;  %v68_v43 = vpop.xlane.xlu0 %67 }
 0x12e   :  { %2565 = vrsqrt.f32 %v106_v40  ;;  %v103_v44 = vmul.f32 0.03125, %v96_v42  ;;  %v74_v45 = vmul.f32 0.03125, %v68_v43 }
 0x12f   :  { %2567 = vrsqrt.f32 %v107_v41 }
 0x130   :  { %v108_v46 = vadd.f32 1e-05, %v103_v44  ;;  %v79_v47 = vsub.f32 %v49_v26, %v74_v45 }
 0x132   :  { %2569 = vrsqrt.f32 %v108_v46  ;;  %v84_v48 = vmul.f32 %v79_v47, %v79_v47  ;;  %v2687_v46 = vmov 0  }
 0x134   :  { %v2564_v49 = vpop.eup %2563  ;;  %v97_v50 = vsel %vm65_vm1, %v84_v48, 0.0 }
 0x135   :  { %98 = vadd.xlane.f32.xlu1 %v97_v50  ;;  %v115_v51 = vmul.f32 %v2564_v49, %v75_v12 }
 0x137   :  { %v126_v55 = vmul.f32 %v2176_v52, %v115_v51 }
 0x138   :  { %v2566_v53 = vpop.eup %2565 }
 0x139   :  { %v116_v54 = vmul.f32 %v2566_v53, %v76_v20  ;;  %v2568_v56 = vpop.eup %2567  ;;  %v137_v60 = vadd.f32 %v2177_v57, %v126_v55 }
 0x13a   :  { %v117_v62 = vmul.f32 %v2568_v56, %v2781_v13 }
 0x13b   :  { %v127_v58 = vmul.f32 %v2176_v52, %v116_v54 }
 0x13c   :  { %v2570_v59 = vpop.eup %2569  ;;  %v128_v2 = vmul.f32 %v2176_v52, %v117_v62 }
 0x13d   :  { %v138_v61 = vadd.f32 %v2177_v57, %v127_v58  ;;  %v118_v63 = vmul.f32 %v2570_v59, %v78_v21 }
 0x13e   :  { %v139_v4 = vadd.f32 %v2177_v57, %v128_v2 }
 0x13f   :  { %v142_v0 = vpack.c.bf16 %v138_v61, %v137_v60  ;;  %v129_v1 = vmul.f32 %v2176_v52, %v118_v63 }
 0x141   :  { %2329 = vmatmul.mubr.msk.bf16.vlgmr.msra.gmra.mrb[0].mxu1 %vm52_vm0, %v142_v0  ;;  %v140_v3 = vadd.f32 %v2177_v57, %v129_v1 }
 0x142   :  { %2332 = vmatprep.mubr.msk.bf16.mxu1 %vm2679_vm2, %v2678_v30 }
 0x143   :  { %v143_v5 = vpack.c.bf16 %v140_v3, %v139_v4 }
 0x149   :  { %2333 = vmatmul.mubr.msk.bf16.gmra.mrb[4].mxu1 %vm52_vm0, %v143_v5 }
 0x14a   :  { %2336 = vmatprep.mubr.msk.bf16.mxu1 %vm2679_vm2, %v2678_v30 }
 0x1c2   :  { %v99_v6 = vpop.xlane.xlu1 %98 }
 0x1c3   :  { %v104_v7 = vmul.f32 0.03125, %v99_v6 }
 0x1c5   :  { %v109_v8 = vadd.f32 1e-05, %v104_v7 }
 0x1c7   :  { %2571 = vrsqrt.f32 %v109_v8 }
 0x1d1   :  { %v2572_v9 = vpop.eup %2571 }
 0x1d2   :  { %v119_v10 = vmul.f32 %v2572_v9, %v79_v47  ;;  %v2879_v47 = vsel %vm350_vm4, 65535, %v2687_v46 }
 0x1d4   :  { %v130_v11 = vmul.f32 %v2176_v52, %v119_v10 }
 0x1d6   :  { %v141_v12 = vadd.f32 %v2177_v57, %v130_v11 }
 0x1d8   :  { %v144_v13 = vpack.c.bf16 %v141_v12, %v141_v12 }
 0x1da   :  { %2337 = vmatmul.mubr.msk.bf16.gmra.mrb[8].mxu1 %vm52_vm0, %v144_v13 }
 0x214   :  { %v211_v15 = vpop.f32.mrb[0].mxu1 }
 0x215   :  { %v2330_v16 = vpop.f32.mrb[1].mxu1  ;;  %v212_v18 = vadd.f32 %v2821_v14, %v211_v15 }
 0x216   :  { %v214_v17 = vpop.f32.mrb[2].mxu1 }
 0x217   :  { %v215_v19 = vadd.f32 %v2821_v14, %v214_v17  ;;  %v2331_v20 = vpop.f32.mrb[3].mxu1 }
 0x219   :  { %v2825_v21 = vpack.c.bf16 %v215_v19, %v212_v18 }
 0x21b   :  { %237 = vrot.lane.b32.xlu0 %v2825_v21, %s2680_s25  ;;  %418 = vrot.lane.b32.xlu1 %v2825_v21, %s2681_s26 }
 0x21c   :  { %2344 = vmatprep.mubr.msk.bf16.mxu1 %vm241_vm3, %v2825_v21  ;;  %v219_v22 = vpop.f32.mrb[4].mxu1 }
 0x21d   :  { %v220_v23 = vadd.f32 %v2821_v14, %v219_v22  ;;  %v2334_v24 = vpop.f32.mrb[5].mxu1 }
 0x21e   :  { %v222_v25 = vpop.f32.mrb[6].mxu1 }
 0x21f   :  { %v2834_v26 = vpack.c.bf16 %v220_v23, %v220_v23  ;;  %v223_v27 = vadd.f32 %v2821_v14, %v222_v25  ;;  %414 = vrot.lane.b32.xlu0 %v2825_v21, %s2682_s4  ;;  %v2335_v28 = vpop.f32.mrb[7].mxu1 }
 0x221   :  { %v2839_v29 = vpack.c.bf16 %v223_v27, %v220_v23  ;;  %239 = vrot.lane.b32.xlu1 %v2834_v26, %s2680_s25 }
 0x223   :  { %416 = vrot.lane.b32.xlu0 %v2834_v26, %s2682_s4  ;;  %v984_v52 = vshll.u32 %v2839_v29, 16  ;;  %v982_v61 = vshrl.u32 %v2839_v29, 16 }
 0x225   :  { %420 = vrot.lane.b32.xlu1 %v2834_v26, %s2681_s26  ;;  %v986_v58 = vrot.slane %v984_v52, 1 }
 0x227   :  { %602 = vrot.lane.b32.xlu0 %v2825_v21, %s2683_s27  ;;  %v987_v63 = vor.u32 %v986_v58, %v982_v61 }
 0x229   :  { %606 = vrot.lane.b32.xlu1 %v2825_v21, %s2684_s28 }
 0x22b   :  { %341 = vrot.lane.b32.xlu0 %v2834_v26, %s2685_s29 }
 0x22d   :  { %608 = vrot.lane.b32.xlu1 %v2834_v26, %s2684_s28 }
 0x231   :  { %604 = vrot.lane.b32.xlu1 %v2834_v26, %s2683_s27 }
 0x235   :  { %339 = vrot.lane.b32.xlu1 %v2825_v21, %s2685_s29 }
 0x239   :  { %517 = vrot.lane.b32.xlu1 %v2825_v21, %s2686_s30 }
 0x23d   :  { %519 = vrot.lane.b32.xlu1 %v2834_v26, %s2686_s30 }
 0x28d   :  { %v419_v31 = vpop.permute.xlu1 %418  ;;  %v238_v32 = vpop.permute.xlu0 %237 }
 0x28e   :  { %2520 = vmatprep.subr.msk.bf16.mxu1 %vm241_vm3, %v238_v32  ;;  %2522 = vmatprep.subr.msk.bf16.mxu0 %vm241_vm3, %v419_v31  ;;  %v249_v33 = vsel %vm241_vm3, %v238_v32, 0  ;;  %v429_v34 = vsel %vm241_vm3, %v419_v31, 0 }
 0x28f   :  { %2341 = vmatpush3.bf16.xpose.msra.mxu1 %v249_v33  ;;  %2357 = vmatpush3.bf16.xpose.msra.mxu0 %v429_v34 }
 0x291   :  { %v415_v35 = vpop.permute.xlu0 %414 }
 0x292   :  { %2360 = vmatprep.mubr.msk.bf16.mxu0 %vm241_vm3, %v415_v35 }
 0x293   :  { %v240_v36 = vpop.permute.xlu1 %239 }
 0x294   :  { %2521 = vmatprep.subr.msk.bf16.mxu1 %vm241_vm3, %v240_v36  ;;  %v252_v37 = vsel %vm241_vm3, %v240_v36, 0 }
 0x295   :  { %v417_v40 = vpop.permute.xlu0 %416 }
 0x297   :  { %v421_v38 = vpop.permute.xlu1 %420  ;;  %2343 = vmatpush3.bf16.xpose.msra.mxu1 %v252_v37 }
 0x298   :  { %2523 = vmatprep.subr.msk.bf16.mxu0 %vm241_vm3, %v421_v38  ;;  %v432_v39 = vsel %vm241_vm3, %v421_v38, 0 }
 0x299   :  { %2359 = vmatpush3.bf16.xpose.msra.mxu0 %v432_v39  ;;  %v603_v42 = vpop.permute.xlu0 %602 }
 0x29b   :  { %v607_v41 = vpop.permute.xlu1 %606 }
 0x29c   :  { %2524 = vmatprep.subr.msk.bf16.mxu0 %vm241_vm3, %v607_v41  ;;  %v617_v44 = vsel %vm241_vm3, %v607_v41, 0 }
 0x29d   :  { %v342_v48 = vpop.permute.xlu0 %341 }
 0x29e   :  { %2345 = vmatmul.mubr.msk.bf16.vlgmr.msra.gmra.mrb[12].mxu1 %vm241_vm3, %v2834_v26  ;;  %v354_v50 = vand.u32 %v2879_v47, %v342_v48 }
 0x29f   :  { %v609_v43 = vpop.permute.xlu1 %608 }
 0x2a0   :  { %2361 = vmatmul.mubr.msk.bf16.vlgmr.msra.gmra.mrb[0].mxu0 %vm241_vm3, %v417_v40  ;;  %v620_v51 = vsel %vm241_vm3, %v609_v43, 0 }
 0x2a1   :  { %2373 = vmatpush3.bf16.xpose.msra.mxu0 %v617_v44  ;;  %2376 = vmatprep.mubr.msk.bf16.mxu0 %vm241_vm3, %v603_v42 }
 0x2a2   :  { %2525 = vmatprep.subr.msk.bf16.mxu0 %vm241_vm3, %v609_v43 }
 0x2a3   :  { %v605_v45 = vpop.permute.xlu1 %604 }
 0x2a7   :  { %v340_v49 = vpop.permute.xlu1 %339 }
 0x2a8   :  { %2348 = vmatprep.subr.bf16.mxu1 %v340_v49 }
 0x2a9   :  { %2349 = vmatpush3.bf16.msra.mxu1 %v340_v49  ;;  %2375 = vmatpush3.bf16.xpose.msra.mxu0 %v620_v51 }
 0x2aa   :  { %2350 = vmatprep.subr.bf16.mxu1 %v354_v50 }
 0x2ab   :  { %v2884_v53 = vpop.permute.xlu1 %517 }
 0x2ad   :  { %v227_v54 = vpop.f32.mrb[8].mxu1  ;;  %2351 = vmatpush3.bf16.msra.mxu1 %v354_v50 }
 0x2ae   :  { %v228_v55 = vadd.f32 %v2821_v14, %v227_v54  ;;  %2364 = vmatprep.subr.bf16.mxu1 %v2884_v53  ;;  %v2338_v56 = vpop.f32.mrb[9].mxu1 }
 0x2af   :  { %v230_v57 = vpop.f32.mrb[10].mxu1  ;;  %v520_v35 = vpop.permute.xlu1 %519 }
 0x2b0   :  { %v2888_v59 = vpack.c.bf16 %v228_v55, %v228_v55  ;;  %2377 = vmatmul.mubr.msk.bf16.vlgmr.msra.gmra.mrb[4].mxu0 %vm241_vm3, %v605_v45  ;;  %v2339_v60 = vpop.f32.mrb[11].mxu1 }
 0x2b2   :  { %v989_v62 = vshll.u32 %v2888_v59, 16 }
 0x2b4   :  { %v991_v0 = vrot.slane %v989_v62, 1 }
 0x2b6   :  { %v2893_v1 = vsel %vm980_vm5, %v987_v63, %v991_v0  ;;  %v529_v63 = vand.u32 %v520_v35, %v2879_v47 }
 0x371   :  { %v2346_v2 = vpop.f32.mrb[12].mxu1 }
 0x372   :  { %v304_v3 = vmul.f32 0.35355338, %v2346_v2  ;;  %v288_v4 = vpop.f32.mrb[13].mxu1 }
 0x373   :  { %v302_v5 = vmul.f32 0.35355338, %v288_v4  ;;  %v2347_v6 = vpop.f32.mrb[14].mxu1  ;;  %v2362_v7 = vpop.f32.mrb[0].mxu0 }
 0x374   :  { %v484_v8 = vmul.f32 0.35355338, %v2362_v7  ;;  %v291_v9 = vpop.f32.mrb[15].mxu1  ;;  %v468_v10 = vpop.f32.mrb[1].mxu0  ;;  %v313_v11 = vsel %vm312_vm6, %v304_v3, -inf }
 0x375   :  { %314 = vmax.xlane.f32.xlu0 %v313_v11  ;;  %v2363_v12 = vpop.f32.mrb[2].mxu0  ;;  %v303_v13 = vmul.f32 0.35355338, %v291_v9  ;;  %v482_v16 = vmul.f32 0.35355338, %v468_v10  ;;  %v306_v17 = vsel %vm305_vm7, %v302_v5, -inf }
 0x376   :  { %v471_v14 = vpop.f32.mrb[3].mxu0  ;;  %v491_v15 = vsel %vm312_vm6, %v484_v8, -inf }
 0x377   :  { %492 = vmax.xlane.f32.xlu1 %v491_v15  ;;  %v309_v18 = vsel %vm305_vm7, %v303_v13, -inf  ;;  %v483_v19 = vmul.f32 0.35355338, %v471_v14  ;;  %v485_v20 = vsel %vm305_vm7, %v482_v16, -inf }
 0x379   :  { %307 = vmax.xlane.f32.xlu0 %v306_v17  ;;  %v488_v22 = vsel %vm305_vm7, %v483_v19, -inf }
 0x37b   :  { %310 = vmax.xlane.f32.xlu1 %v309_v18 }
 0x37d   :  { %486 = vmax.xlane.f32.xlu0 %v485_v20 }
 0x381   :  { %489 = vmax.xlane.f32.xlu0 %v488_v22 }
 0x383   :  { %v2378_v23 = vpop.f32.mrb[4].mxu0 }
 0x384   :  { %v2901_v24 = vmul.f32 0.35355338, %v2378_v23  ;;  %v656_v25 = vpop.f32.mrb[5].mxu0 }
 0x385   :  { %v2379_v27 = vpop.f32.mrb[6].mxu0  ;;  %v2903_v28 = vmul.f32 0.35355338, %v656_v25 }
 0x386   :  { %v659_v29 = vpop.f32.mrb[7].mxu0  ;;  %v679_v31 = vsel %vm312_vm6, %v2901_v24, -inf }
 0x387   :  { %680 = vmax.xlane.f32.xlu0 %v679_v31  ;;  %v673_v32 = vsel %vm305_vm7, %v2903_v28, -inf  ;;  %v671_v33 = vmul.f32 0.35355338, %v659_v29 }
 0x389   :  { %v676_v34 = vsel %vm305_vm7, %v671_v33, -inf }
 0x38b   :  { %674 = vmax.xlane.f32.xlu0 %v673_v32 }
 0x38c   :  { %705 = vrot.lane.b32.xlu1 %v2825_v21, %s2688_s14 }
 0x3a1   :  { %707 = vrot.lane.b32.xlu0 %v2834_v26, %s2688_s14 }
 0x3a5   :  { %796 = vrot.lane.b32.xlu0 %v2834_v26, %s2689_s15 }
 0x3a9   :  { %792 = vrot.lane.b32.xlu0 %v2834_v26, %s2690_s16 }
 0x3b0   :  { %677 = vmax.xlane.f32.xlu1 %v676_v34 }
 0x3c1   :  { %794 = vrot.lane.b32.xlu1 %v2825_v21, %s2689_s15 }
 0x3c5   :  { %790 = vrot.lane.b32.xlu1 %v2825_v21, %s2690_s16 }
 0x402   :  { %v315_v36 = vpop.xlane.xlu0 %314 }
 0x403   :  { %v318_v37 = vsub.f32 %v304_v3, %v315_v36 }
 0x404   :  { %v493_v38 = vpop.xlane.xlu1 %492 }
 0x405   :  { %v320_v40 = vpack.c.bf16 %v318_v37, %v318_v37  ;;  %v496_v48 = vsub.f32 %v484_v8, %v493_v38 }
 0x406   :  { %v308_v39 = vpop.xlane.xlu0 %307 }
 0x407   :  { %v316_v42 = vsub.f32 %v302_v5, %v308_v39  ;;  %v325_v46 = vmul.bf16 1069105081, %v320_v40  ;;  %v498_v54 = vpack.c.bf16 %v496_v48, %v496_v48 }
 0x408   :  { %v311_v41 = vpop.xlane.xlu1 %310 }
 0x409   :  { %v317_v43 = vsub.f32 %v303_v13, %v311_v41  ;;  %v503_v57 = vmul.bf16 1069105081, %v498_v54 }
 0x40a   :  { %v487_v44 = vpop.xlane.xlu0 %486 }
 0x40b   :  { %v319_v45 = vpack.c.bf16 %v317_v43, %v316_v42  ;;  %v494_v51 = vsub.f32 %v482_v16, %v487_v44 }
 0x40c   :  { %v706_v2 = vpop.permute.xlu1 %705 }
 0x40d   :  { %v322_v49 = vmul.bf16 1069105081, %v319_v45 }
 0x40e   :  { %v490_v50 = vpop.xlane.xlu0 %489 }
 0x40f   :  { %2573 = vpow.bf16 %v322_v49  ;;  %v495_v52 = vsub.f32 %v483_v19, %v490_v50 }
 0x410   :  { %2575 = vpow.bf16 %v325_v46  ;;  %v2983_v46 = vshrl.u32 %v2888_v59, 16 }
 0x411   :  { %v497_v55 = vpack.c.bf16 %v495_v52, %v494_v51 }
 0x413   :  { %v500_v56 = vmul.bf16 1069105081, %v497_v55 }
 0x414   :  { %v681_v58 = vpop.xlane.xlu0 %680 }
 0x415   :  { %2577 = vpow.bf16 %v500_v56 }
 0x416   :  { %2579 = vpow.bf16 %v503_v57 }
 0x418   :  { %v675_v62 = vpop.xlane.xlu0 %674 }
 0x419   :  { %v682_v8 = vsub.f32 %v2903_v28, %v675_v62 }
 0x41a   :  { %v2922_v60 = vpop.eup %2573 }
 0x41b   :  { %v2924_v61 = vpop.eup %2575  ;;  %2352 = vmatprep.mubr.msk.bf16.mxu1 %vm305_vm7, %v2922_v60 }
 0x41c   :  { %2353 = vmatmul.mubr.msk.bf16.vlgmr.msra.gmra.mrb[16].mxu1 %vm305_vm7, %v2924_v61  ;;  %v708_v3 = vpop.permute.xlu0 %707 }
 0x41d   :  { %2365 = vmatpush3.bf16.msra.mxu1 %v2884_v53  ;;  %v717_v5 = vand.u32 %v708_v3, %v2879_v47  ;;  %v684_v53 = vsub.f32 %v2901_v24, %v681_v58 }
 0x41e   :  { %2366 = vmatprep.subr.bf16.mxu1 %v529_v63 }
 0x41f   :  { %v686_v6 = vpack.c.bf16 %v684_v53, %v684_v53 }
 0x420   :  { %v2932_v0 = vpop.eup %2577  ;;  %v797_v18 = vpop.permute.xlu0 %796 }
 0x421   :  { %2367 = vmatpush3.bf16.msra.mxu1 %v529_v63  ;;  %2368 = vmatprep.mubr.msk.bf16.mxu1 %vm305_vm7, %v2932_v0  ;;  %v2936_v4 = vpop.eup %2579  ;;  %v691_v11 = vmul.bf16 1069105081, %v686_v6  ;;  %v808_v19 = vsel %vm241_vm3, %v797_v18, 0 }
 0x422   :  { %2380 = vmatprep.subr.bf16.mxu1 %v706_v2 }
 0x424   :  { %2369 = vmatmul.mubr.msk.bf16.vlgmr.msra.gmra.mrb[20].mxu1 %vm305_vm7, %v2936_v4  ;;  %v793_v20 = vpop.permute.xlu0 %792 }
 0x425   :  { %2381 = vmatpush3.bf16.msra.mxu1 %v706_v2 }
 0x426   :  { %2382 = vmatprep.subr.bf16.mxu1 %v717_v5 }
 0x429   :  { %2383 = vmatpush3.bf16.msra.mxu1 %v717_v5 }
 0x43d   :  { %v678_v7 = vpop.xlane.xlu1 %677 }
 0x43e   :  { %v683_v9 = vsub.f32 %v671_v33, %v678_v7 }
 0x440   :  { %v685_v10 = vpack.c.bf16 %v683_v9, %v682_v8 }
 0x441   :  { %v795_v12 = vpop.permute.xlu1 %794 }
 0x442   :  { %v688_v13 = vmul.bf16 1069105081, %v685_v10  ;;  %2526 = vmatprep.subr.msk.bf16.mxu1 %vm241_vm3, %v795_v12  ;;  %v805_v16 = vsel %vm241_vm3, %v795_v12, 0 }
 0x444   :  { %2581 = vpow.bf16 %v688_v13 }
 0x445   :  { %2583 = vpow.bf16 %v691_v11  ;;  %v791_v17 = vpop.permute.xlu1 %790 }
 0x44f   :  { %v2944_v14 = vpop.eup %2581 }
 0x450   :  { %v2946_v15 = vpop.eup %2583  ;;  %2384 = vmatprep.mubr.msk.bf16.mxu1 %vm305_vm7, %v2944_v14 }
 0x451   :  { %2385 = vmatmul.mubr.msk.bf16.vlgmr.msra.gmra.mrb[24].mxu1 %vm305_vm7, %v2946_v15 }
 0x452   :  { %2389 = vmatpush3.bf16.xpose.msra.mxu1 %v805_v16  ;;  %2392 = vmatprep.mubr.msk.bf16.mxu1 %vm241_vm3, %v791_v17 }
 0x453   :  { %2527 = vmatprep.subr.msk.bf16.mxu1 %vm241_vm3, %v797_v18 }
 0x45a   :  { %2391 = vmatpush3.bf16.xpose.msra.mxu1 %v808_v19 }
 0x461   :  { %2393 = vmatmul.mubr.msk.bf16.vlgmr.msra.gmra.mrb[28].mxu1 %vm241_vm3, %v793_v20 }
 0x4ef   :  { %v2957_v22 = vpop.f32.mrb[16].mxu1 }
 0x4f0   :  { %v2959_v23 = vpop.f32.mrb[17].mxu1 }
 0x4f1   :  { %v2355_v24 = vpop.f32.mrb[18].mxu1 }
 0x4f2   :  { %v2961_v25 = vpop.f32.mrb[19].mxu1 }
 0x4f7   :  { %v2963_v27 = vpop.f32.mrb[20].mxu1 }
 0x4f8   :  { %v2965_v28 = vpop.f32.mrb[21].mxu1 }
 0x4f9   :  { %v2371_v29 = vpop.f32.mrb[22].mxu1 }
 0x4fa   :  { %v2967_v31 = vpop.f32.mrb[23].mxu1 }
 0x524   :  { %v2969_v32 = vpop.f32.mrb[24].mxu1 }
 0x525   :  { %v2971_v33 = vpop.f32.mrb[25].mxu1 }
 0x526   :  { %v2387_v34 = vpop.f32.mrb[26].mxu1 }
 0x527   :  { %v2973_v35 = vpop.f32.mrb[27].mxu1 }
 0x534   :  { %v2394_v36 = vpop.f32.mrb[28].mxu1 }
 0x535   :  { %v860_v37 = vmul.f32 0.35355338, %v2394_v36  ;;  %v844_v38 = vpop.f32.mrb[29].mxu1 }
 0x536   :  { %v858_v39 = vmul.f32 0.35355338, %v844_v38  ;;  %v2395_v40 = vpop.f32.mrb[30].mxu1 }
 0x537   :  { %v847_v41 = vpop.f32.mrb[31].mxu1  ;;  %v867_v42 = vsel %vm312_vm6, %v860_v37, -inf }
 0x538   :  { %v859_v43 = vmul.f32 0.35355338, %v847_v41  ;;  %868 = vmax.xlane.f32.xlu0 %v867_v42  ;;  %v861_v44 = vsel %vm305_vm7, %v858_v39, -inf }
 0x539   :  { %862 = vmax.xlane.f32.xlu1 %v861_v44 }
 0x53a   :  { %v864_v45 = vsel %vm305_vm7, %v859_v43, -inf }
 0x53c   :  { %865 = vmax.xlane.f32.xlu0 %v864_v45 }
 0x54a   :  { %895 = vrot.lane.b32.xlu1 %v2834_v26, %s2691_s17 }
 0x54e   :  { %995 = vrot.lane.b32.xlu1 %v2893_v1, %s2680_s25 }
 0x552   :  { %997 = vrot.lane.b32.xlu1 %v2983_v46, %s2680_s25  ;;  %893 = vrot.lane.b32.xlu0 %v2825_v21, %s2691_s17 }
 0x556   :  { %1096 = vrot.lane.b32.xlu1 %v2983_v46, %s2685_s29 }
 0x5c5   :  { %v869_v48 = vpop.xlane.xlu0 %868 }
 0x5c6   :  { %v872_v49 = vsub.f32 %v860_v37, %v869_v48  ;;  %v863_v50 = vpop.xlane.xlu1 %862 }
 0x5c7   :  { %v870_v52 = vsub.f32 %v858_v39, %v863_v50 }
 0x5c8   :  { %v874_v51 = vpack.c.bf16 %v872_v49, %v872_v49 }
 0x5c9   :  { %v866_v26 = vpop.xlane.xlu0 %865 }
 0x5ca   :  { %v871_v54 = vsub.f32 %v859_v43, %v866_v26  ;;  %v896_v55 = vpop.permute.xlu1 %895  ;;  %v879_v59 = vmul.bf16 1069105081, %v874_v51 }
 0x5cb   :  { %v905_v62 = vand.u32 %v896_v55, %v2879_v47 }
 0x5cc   :  { %v873_v56 = vpack.c.bf16 %v871_v54, %v870_v52 }
 0x5cd   :  { %v894_v57 = vpop.permute.xlu0 %893 }
 0x5ce   :  { %v876_v58 = vmul.bf16 1069105081, %v873_v56  ;;  %2396 = vmatprep.subr.bf16.mxu0 %v894_v57  ;;  %v996_v21 = vpop.permute.xlu1 %995 }
 0x5cf   :  { %2397 = vmatpush3.bf16.msra.mxu0 %v894_v57  ;;  %v1006_v3 = vsel %vm241_vm3, %v996_v21, 0 }
 0x5d0   :  { %2585 = vpow.bf16 %v876_v58  ;;  %2398 = vmatprep.subr.bf16.mxu0 %v905_v62 }
 0x5d1   :  { %2587 = vpow.bf16 %v879_v59 }
 0x5d2   :  { %v998_v5 = vpop.permute.xlu1 %997 }
 0x5d3   :  { %2399 = vmatpush3.bf16.msra.mxu0 %v905_v62  ;;  %v1009_v53 = vsel %vm241_vm3, %v998_v5, 0 }
 0x5d4   :  { %2528 = vmatprep.subr.msk.bf16.mxu0 %vm241_vm3, %v996_v21 }
 0x5d6   :  { %v1097_v29 = vpop.permute.xlu1 %1096 }
 0x5d7   :  { %v1106_v45 = vand.u32 %v1097_v29, %v2879_v47 }
 0x5db   :  { %v2993_v63 = vpop.eup %2585 }
 0x5dc   :  { %v2995_v2 = vpop.eup %2587  ;;  %2400 = vmatprep.mubr.msk.bf16.mxu0 %vm305_vm7, %v2993_v63 }
 0x5dd   :  { %2401 = vmatmul.mubr.msk.bf16.vlgmr.msra.gmra.mrb[8].mxu0 %vm305_vm7, %v2995_v2 }
 0x5de   :  { %2405 = vmatpush3.bf16.xpose.msra.mxu0 %v1006_v3  ;;  %2408 = vmatprep.mubr.msk.bf16.mxu0 %vm241_vm3, %v2893_v1 }
 0x5df   :  { %2529 = vmatprep.subr.msk.bf16.mxu0 %vm241_vm3, %v998_v5 }
 0x5e6   :  { %2407 = vmatpush3.bf16.xpose.msra.mxu0 %v1009_v53 }
 0x5ed   :  { %2409 = vmatmul.mubr.msk.bf16.vlgmr.msra.gmra.mrb[12].mxu0 %vm241_vm3, %v2983_v46 }
 0x6b0   :  { %v3008_v6 = vpop.f32.mrb[8].mxu0 }
 0x6b1   :  { %v3010_v7 = vpop.f32.mrb[9].mxu0 }
 0x6b2   :  { %v2403_v8 = vpop.f32.mrb[10].mxu0 }
 0x6b3   :  { %v3012_v9 = vpop.f32.mrb[11].mxu0 }
 0x6c0   :  { %v2410_v10 = vpop.f32.mrb[12].mxu0 }
 0x6c1   :  { %v1061_v11 = vmul.f32 0.35355338, %v2410_v10  ;;  %v1045_v12 = vpop.f32.mrb[13].mxu0 }
 0x6c2   :  { %v2411_v13 = vpop.f32.mrb[14].mxu0  ;;  %v1059_v16 = vmul.f32 0.35355338, %v1045_v12 }
 0x6c3   :  { %v1048_v17 = vpop.f32.mrb[15].mxu0  ;;  %v1068_v18 = vsel %vm312_vm6, %v1061_v11, -inf }
 0x6c4   :  { %v1060_v19 = vmul.f32 0.35355338, %v1048_v17  ;;  %1069 = vmax.xlane.f32.xlu0 %v1068_v18  ;;  %v1062_v24 = vsel %vm305_vm7, %v1059_v16, -inf }
 0x6c6   :  { %v1065_v20 = vsel %vm305_vm7, %v1060_v19, -inf }
 0x6c7   :  { %1066 = vmax.xlane.f32.xlu1 %v1065_v20 }
 0x6c8   :  { %1063 = vmax.xlane.f32.xlu0 %v1062_v24 }
 0x6d8   :  { %1169 = vrot.lane.b32.xlu1 %v2893_v1, %s2681_s26 }
 0x6dc   :  { %1165 = vrot.lane.b32.xlu1 %v2893_v1, %s2682_s4 }
 0x6de   :  { %1094 = vrot.lane.b32.xlu0 %v2893_v1, %s2685_s29 }
 0x6e2   :  { %1171 = vrot.lane.b32.xlu0 %v2983_v46, %s2681_s26 }
 0x6e6   :  { %1167 = vrot.lane.b32.xlu0 %v2983_v46, %s2682_s4 }
 0x751   :  { %v1070_v34 = vpop.xlane.xlu0 %1069 }
 0x752   :  { %v1073_v36 = vsub.f32 %v1061_v11, %v1070_v34 }
 0x754   :  { %v1067_v37 = vpop.xlane.xlu1 %1066  ;;  %v1075_v38 = vpack.c.bf16 %v1073_v36, %v1073_v36 }
 0x755   :  { %v1072_v39 = vsub.f32 %v1060_v19, %v1067_v37  ;;  %v1064_v40 = vpop.xlane.xlu0 %1063 }
 0x756   :  { %v1071_v41 = vsub.f32 %v1059_v16, %v1064_v40  ;;  %v1080_v43 = vmul.bf16 1069105081, %v1075_v38 }
 0x758   :  { %v1074_v42 = vpack.c.bf16 %v1072_v39, %v1071_v41  ;;  %v1170_v49 = vpop.permute.xlu1 %1169 }
 0x759   :  { %v1095_v44 = vpop.permute.xlu0 %1094  ;;  %v1180_v26 = vsel %vm241_vm3, %v1170_v49, 0 }
 0x75a   :  { %v1077_v48 = vmul.bf16 1069105081, %v1074_v42  ;;  %2412 = vmatprep.subr.bf16.mxu1 %v1095_v44 }
 0x75b   :  { %2413 = vmatpush3.bf16.msra.mxu1 %v1095_v44 }
 0x75c   :  { %2589 = vpow.bf16 %v1077_v48  ;;  %2414 = vmatprep.subr.bf16.mxu1 %v1106_v45  ;;  %v1166_v52 = vpop.permute.xlu1 %1165 }
 0x75d   :  { %2591 = vpow.bf16 %v1080_v43  ;;  %v1172_v54 = vpop.permute.xlu0 %1171 }
 0x75e   :  { %v1183_v55 = vsel %vm241_vm3, %v1172_v54, 0 }
 0x75f   :  { %2415 = vmatpush3.bf16.msra.mxu1 %v1106_v45 }
 0x760   :  { %2530 = vmatprep.subr.msk.bf16.mxu1 %vm241_vm3, %v1170_v49 }
 0x761   :  { %v1168_v56 = vpop.permute.xlu0 %1167 }
 0x767   :  { %v3029_v50 = vpop.eup %2589 }
 0x768   :  { %v3031_v51 = vpop.eup %2591  ;;  %2416 = vmatprep.mubr.msk.bf16.mxu1 %vm305_vm7, %v3029_v50 }
 0x769   :  { %2417 = vmatmul.mubr.msk.bf16.vlgmr.msra.gmra.mrb[32].mxu1 %vm305_vm7, %v3031_v51 }
 0x76a   :  { %2421 = vmatpush3.bf16.xpose.msra.mxu1 %v1180_v26  ;;  %2424 = vmatprep.mubr.msk.bf16.mxu1 %vm241_vm3, %v1166_v52 }
 0x76b   :  { %2531 = vmatprep.subr.msk.bf16.mxu1 %vm241_vm3, %v1172_v54 }
 0x772   :  { %2423 = vmatpush3.bf16.xpose.msra.mxu1 %v1183_v55 }
 0x779   :  { %2425 = vmatmul.mubr.msk.bf16.vlgmr.msra.gmra.mrb[36].mxu1 %vm241_vm3, %v1168_v56 }
 0x83c   :  { %v3042_v59 = vpop.f32.mrb[32].mxu1 }
 0x83d   :  { %v3044_v57 = vpop.f32.mrb[33].mxu1 }
 0x83e   :  { %v2419_v58 = vpop.f32.mrb[34].mxu1 }
 0x83f   :  { %v3046_v62 = vpop.f32.mrb[35].mxu1 }
 0x84c   :  { %v2426_v21 = vpop.f32.mrb[36].mxu1 }
 0x84d   :  { %v1235_v3 = vmul.f32 0.35355338, %v2426_v21  ;;  %v1219_v5 = vpop.f32.mrb[37].mxu1 }
 0x84e   :  { %v1233_v53 = vmul.f32 0.35355338, %v1219_v5  ;;  %v2427_v8 = vpop.f32.mrb[38].mxu1 }
 0x84f   :  { %v1222_v10 = vpop.f32.mrb[39].mxu1  ;;  %v1242_v11 = vsel %vm312_vm6, %v1235_v3, -inf }
 0x850   :  { %v1234_v12 = vmul.f32 0.35355338, %v1222_v10  ;;  %1243 = vmax.xlane.f32.xlu0 %v1242_v11  ;;  %v1236_v13 = vsel %vm305_vm7, %v1233_v53, -inf }
 0x851   :  { %1237 = vmax.xlane.f32.xlu1 %v1236_v13 }
 0x852   :  { %v1239_v16 = vsel %vm305_vm7, %v1234_v12, -inf }
 0x854   :  { %1240 = vmax.xlane.f32.xlu0 %v1239_v16 }
 0x862   :  { %1270 = vrot.lane.b32.xlu1 %v2983_v46, %s2686_s30 }
 0x866   :  { %1355 = vrot.lane.b32.xlu1 %v2893_v1, %s2684_s28 }
 0x86a   :  { %1357 = vrot.lane.b32.xlu1 %v2983_v46, %s2684_s28  ;;  %1268 = vrot.lane.b32.xlu0 %v2893_v1, %s2686_s30 }
 0x86e   :  { %1353 = vrot.lane.b32.xlu1 %v2983_v46, %s2683_s27  ;;  %1351 = vrot.lane.b32.xlu0 %v2893_v1, %s2683_s27 }
 0x872   :  { %1456 = vrot.lane.b32.xlu1 %v2983_v46, %s2688_s14 }
 0x8dd   :  { %v1244_v17 = vpop.xlane.xlu0 %1243 }
 0x8de   :  { %v1247_v18 = vsub.f32 %v1235_v3, %v1244_v17  ;;  %v1238_v19 = vpop.xlane.xlu1 %1237 }
 0x8df   :  { %v1245_v29 = vsub.f32 %v1233_v53, %v1238_v19 }
 0x8e0   :  { %v1249_v20 = vpack.c.bf16 %v1247_v18, %v1247_v18 }
 0x8e1   :  { %v1241_v24 = vpop.xlane.xlu0 %1240 }
 0x8e2   :  { %v1246_v34 = vsub.f32 %v1234_v12, %v1241_v24  ;;  %v1271_v36 = vpop.permute.xlu1 %1270  ;;  %v1254_v38 = vmul.bf16 1069105081, %v1249_v20 }
 0x8e3   :  { %v1280_v41 = vand.u32 %v1271_v36, %v2879_v47 }
 0x8e4   :  { %v1248_v37 = vpack.c.bf16 %v1246_v34, %v1245_v29 }
 0x8e5   :  { %v1269_v39 = vpop.permute.xlu0 %1268 }
 0x8e6   :  { %v1251_v40 = vmul.bf16 1069105081, %v1248_v37  ;;  %2428 = vmatprep.subr.bf16.mxu0 %v1269_v39  ;;  %v1356_v42 = vpop.permute.xlu1 %1355 }
 0x8e7   :  { %2429 = vmatpush3.bf16.msra.mxu0 %v1269_v39  ;;  %v1366_v45 = vsel %vm241_vm3, %v1356_v42, 0 }
 0x8e8   :  { %2593 = vpow.bf16 %v1251_v40  ;;  %2430 = vmatprep.subr.bf16.mxu0 %v1280_v41 }
 0x8e9   :  { %2595 = vpow.bf16 %v1254_v38  ;;  %v1352_v48 = vpop.permute.xlu0 %1351 }
 0x8ea   :  { %v1358_v49 = vpop.permute.xlu1 %1357 }
 0x8eb   :  { %2431 = vmatpush3.bf16.msra.mxu0 %v1280_v41  ;;  %v1369_v26 = vsel %vm241_vm3, %v1358_v49, 0 }
 0x8ec   :  { %2532 = vmatprep.subr.msk.bf16.mxu0 %vm241_vm3, %v1356_v42 }
 0x8ee   :  { %v1354_v52 = vpop.permute.xlu1 %1353 }
 0x8f2   :  { %v1457_v17 = vpop.permute.xlu1 %1456 }
 0x8f3   :  { %v3067_v43 = vpop.eup %2593  ;;  %v1466_v40 = vand.u32 %v1457_v17, %v2879_v47 }
 0x8f4   :  { %v3069_v44 = vpop.eup %2595  ;;  %2432 = vmatprep.mubr.msk.bf16.mxu0 %vm305_vm7, %v3067_v43 }
 0x8f5   :  { %2433 = vmatmul.mubr.msk.bf16.vlgmr.msra.gmra.mrb[16].mxu0 %vm305_vm7, %v3069_v44 }
 0x8f6   :  { %2437 = vmatpush3.bf16.xpose.msra.mxu0 %v1366_v45  ;;  %2440 = vmatprep.mubr.msk.bf16.mxu0 %vm241_vm3, %v1352_v48 }
 0x8f7   :  { %2533 = vmatprep.subr.msk.bf16.mxu0 %vm241_vm3, %v1358_v49 }
 0x8fe   :  { %2439 = vmatpush3.bf16.xpose.msra.mxu0 %v1369_v26 }
 0x905   :  { %2441 = vmatmul.mubr.msk.bf16.vlgmr.msra.gmra.mrb[20].mxu0 %vm241_vm3, %v1354_v52 }
 0x9c8   :  { %v3080_v54 = vpop.f32.mrb[16].mxu0 }
 0x9c9   :  { %v3082_v55 = vpop.f32.mrb[17].mxu0 }
 0x9ca   :  { %v2435_v56 = vpop.f32.mrb[18].mxu0 }
 0x9cb   :  { %v3084_v58 = vpop.f32.mrb[19].mxu0 }
 0x9d8   :  { %v2442_v21 = vpop.f32.mrb[20].mxu0 }
 0x9d9   :  { %v1421_v3 = vmul.f32 0.35355338, %v2442_v21  ;;  %v1405_v5 = vpop.f32.mrb[21].mxu0 }
 0x9da   :  { %v2443_v53 = vpop.f32.mrb[22].mxu0  ;;  %v1419_v8 = vmul.f32 0.35355338, %v1405_v5 }
 0x9db   :  { %v1408_v10 = vpop.f32.mrb[23].mxu0  ;;  %v1428_v11 = vsel %vm312_vm6, %v1421_v3, -inf }
 0x9dc   :  { %v1420_v12 = vmul.f32 0.35355338, %v1408_v10  ;;  %1429 = vmax.xlane.f32.xlu0 %v1428_v11  ;;  %v1422_v16 = vsel %vm305_vm7, %v1419_v8, -inf }
 0x9de   :  { %v1425_v13 = vsel %vm305_vm7, %v1420_v12, -inf }
 0x9df   :  { %1426 = vmax.xlane.f32.xlu1 %v1425_v13 }
 0x9e0   :  { %1423 = vmax.xlane.f32.xlu0 %v1422_v16 }
 0x9f0   :  { %1541 = vrot.lane.b32.xlu1 %v2893_v1, %s2689_s15 }
 0x9f4   :  { %1537 = vrot.lane.b32.xlu1 %v2893_v1, %s2690_s16 }
 0x9f6   :  { %1454 = vrot.lane.b32.xlu0 %v2893_v1, %s2688_s14 }
 0x9fa   :  { %1543 = vrot.lane.b32.xlu0 %v2983_v46, %s2689_s15 }
 0x9fe   :  { %1539 = vrot.lane.b32.xlu0 %v2983_v46, %s2690_s16 }
 0xa69   :  { %v1430_v18 = vpop.xlane.xlu0 %1429 }
 0xa6a   :  { %v1433_v19 = vsub.f32 %v1421_v3, %v1430_v18 }
 0xa6c   :  { %v1427_v20 = vpop.xlane.xlu1 %1426  ;;  %v1435_v24 = vpack.c.bf16 %v1433_v19, %v1433_v19 }
 0xa6d   :  { %v1432_v29 = vsub.f32 %v1420_v12, %v1427_v20  ;;  %v1424_v34 = vpop.xlane.xlu0 %1423 }
 0xa6e   :  { %v1431_v36 = vsub.f32 %v1419_v8, %v1424_v34  ;;  %v1440_v38 = vmul.bf16 1069105081, %v1435_v24  ;;  %v506_v34 = vunpack.c.h.bf16 %v2932_v0 }
 0xa70   :  { %v1434_v37 = vpack.c.bf16 %v1432_v29, %v1431_v36  ;;  %v1542_v42 = vpop.permute.xlu1 %1541  ;;  %v505_v29 = vunpack.c.l.bf16 %v2932_v0 }
 0xa71   :  { %v1455_v39 = vpop.permute.xlu0 %1454  ;;  %v1552_v49 = vsel %vm241_vm3, %v1542_v42, 0 }
 0xa72   :  { %v1437_v41 = vmul.bf16 1069105081, %v1434_v37  ;;  %2444 = vmatprep.subr.bf16.mxu1 %v1455_v39  ;;  %v508_v36 = vsel %vm305_vm7, %v505_v29, 0.0  ;;  %v694_v37 = vunpack.c.h.bf16 %v2944_v14 }
 0xa73   :  { %2445 = vmatpush3.bf16.msra.mxu1 %v1455_v39  ;;  %v693_v39 = vunpack.c.l.bf16 %v2944_v14  ;;  %v507_v14 = vunpack.c.l.bf16 %v2936_v4 }
 0xa74   :  { %2597 = vpow.bf16 %v1437_v41  ;;  %2446 = vmatprep.subr.bf16.mxu1 %v1466_v40  ;;  %v1538_v26 = vpop.permute.xlu1 %1537  ;;  %v881_v41 = vunpack.c.l.bf16 %v2993_v63 }
 0xa75   :  { %2599 = vpow.bf16 %v1440_v38  ;;  %v1544_v52 = vpop.permute.xlu0 %1543  ;;  %v511_v38 = vsel %vm305_vm7, %v506_v34, 0.0 }
 0xa76   :  { %v1555_v56 = vsel %vm241_vm3, %v1544_v52, 0 }
 0xa77   :  { %2447 = vmatpush3.bf16.msra.mxu1 %v1466_v40  ;;  %v699_v40 = vsel %vm305_vm7, %v694_v37, 0.0 }
 0xa78   :  { %2534 = vmatprep.subr.msk.bf16.mxu1 %vm241_vm3, %v1542_v42  ;;  %v1256_v42 = vunpack.c.l.bf16 %v3067_v43 }
 0xa79   :  { %v1540_v21 = vpop.permute.xlu0 %1539 }
 0xa7f   :  { %v3101_v45 = vpop.eup %2597 }
 0xa80   :  { %v3103_v48 = vpop.eup %2599  ;;  %2448 = vmatprep.mubr.msk.bf16.mxu1 %vm305_vm7, %v3101_v45  ;;  %v1442_v4 = vunpack.c.l.bf16 %v3101_v45 }
 0xa81   :  { %2449 = vmatmul.mubr.msk.bf16.vlgmr.msra.gmra.mrb[40].mxu1 %vm305_vm7, %v3103_v48 }
 0xa82   :  { %2453 = vmatpush3.bf16.xpose.msra.mxu1 %v1552_v49  ;;  %2456 = vmatprep.mubr.msk.bf16.mxu1 %vm241_vm3, %v1538_v26  ;;  %v884_v49 = vsel %vm305_vm7, %v881_v41, 0.0  ;;  %v1259_v26 = vsel %vm305_vm7, %v1256_v42, 0.0  ;;  %v1444_v41 = vunpack.c.l.bf16 %v3103_v48 }
 0xa83   :  { %2535 = vmatprep.subr.msk.bf16.mxu1 %vm241_vm3, %v1544_v52  ;;  %v695_v52 = vunpack.c.l.bf16 %v2946_v15  ;;  %v1445_v15 = vsel %vm305_vm7, %v1442_v4, 0.0 }
 0xa84   :  { %v1451_v42 = vsel %vm312_vm6, %v1444_v41, 0.0 }
 0xa8a   :  { %2455 = vmatpush3.bf16.xpose.msra.mxu1 %v1555_v56  ;;  %v514_v56 = vsel %vm312_vm6, %v507_v14, 0.0  ;;  %v327_v14 = vunpack.c.l.bf16 %v2922_v60 }
 0xa8b   :  { %2484 = vmatprep.subr.bf16.mxu1 %v2678_v30 }
 0xa91   :  { %2457 = vmatmul.mubr.msk.bf16.vlgmr.msra.gmra.mrb[44].mxu1 %vm241_vm3, %v1540_v21  ;;  %v702_v21 = vsel %vm312_vm6, %v695_v52, 0.0  ;;  %v330_v52 = vsel %vm305_vm7, %v327_v14, 0.0 }
 0xa92   :  { %2488 = vmatprep.mubr.msk.bf16.mxu1 %vm2679_vm2, %v2678_v30 }
 0xb54   :  { %v3117_v3 = vpop.f32.mrb[40].mxu1 }
 0xb55   :  { %v3119_v5 = vpop.f32.mrb[41].mxu1 }
 0xb56   :  { %v2451_v53 = vpop.f32.mrb[42].mxu1 }
 0xb57   :  { %v3121_v8 = vpop.f32.mrb[43].mxu1  ;;  %v1443_v53 = vunpack.c.h.bf16 %v3101_v45 }
 0xb64   :  { %v2458_v10 = vpop.f32.mrb[44].mxu1 }
 0xb65   :  { %v1607_v11 = vmul.f32 0.35355338, %v2458_v10  ;;  %v1591_v12 = vpop.f32.mrb[45].mxu1 }
 0xb66   :  { %v1605_v13 = vmul.f32 0.35355338, %v1591_v12  ;;  %v2459_v16 = vpop.f32.mrb[46].mxu1  ;;  %v1448_v12 = vsel %vm305_vm7, %v1443_v53, 0.0  ;;  %v1083_v53 = vunpack.c.h.bf16 %v3029_v50 }
 0xb67   :  { %v1594_v17 = vpop.f32.mrb[47].mxu1  ;;  %v1614_v18 = vsel %vm312_vm6, %v1607_v11, -inf  ;;  %v883_v16 = vunpack.c.l.bf16 %v2995_v2 }
 0xb68   :  { %v1606_v19 = vmul.f32 0.35355338, %v1594_v17  ;;  %1615 = vmax.xlane.f32.xlu0 %v1614_v18  ;;  %v1608_v20 = vsel %vm305_vm7, %v1605_v13, -inf  ;;  %v1088_v4 = vsel %vm305_vm7, %v1083_v53, 0.0 }
 0xb69   :  { %1609 = vmax.xlane.f32.xlu1 %v1608_v20 }
 0xb6a   :  { %v1611_v24 = vsel %vm305_vm7, %v1606_v19, -inf }
 0xb6c   :  { %1612 = vmax.xlane.f32.xlu0 %v1611_v24 }
 0xb7a   :  { %1642 = vrot.lane.b32.xlu1 %v2983_v46, %s2691_s17  ;;  %v882_v46 = vunpack.c.h.bf16 %v2993_v63  ;;  %v1257_v63 = vunpack.c.h.bf16 %v3067_v43  ;;  %v890_v43 = vsel %vm312_vm6, %v883_v16, 0.0 }
 0xb7c   :  { %v887_v0 = vsel %vm305_vm7, %v882_v46, 0.0  ;;  %v1262_v10 = vsel %vm305_vm7, %v1257_v63, 0.0 }
 0xb82   :  { %1640 = vrot.lane.b32.xlu0 %v2893_v1, %s2691_s17  ;;  %v696_v1 = vsel %vm305_vm7, %v693_v39, 0.0 }
 0xb9e   :  { %509 = vadd.xlane.f32.xlu1 %v508_v36 }
 0xba1   :  { %512 = vadd.xlane.f32.xlu0 %v511_v38 }
 0xba2   :  { %700 = vadd.xlane.f32.xlu1 %v699_v40 }
 0xba5   :  { %697 = vadd.xlane.f32.xlu0 %v696_v1 }
 0xba6   :  { %888 = vadd.xlane.f32.xlu1 %v887_v0  ;;  %v1258_v0 = vunpack.c.l.bf16 %v3069_v44  ;;  %v329_v44 = vunpack.c.l.bf16 %v2924_v61  ;;  %v1084_v61 = vunpack.c.l.bf16 %v3031_v51 }
 0xba8   :  { %v336_v63 = vsel %vm312_vm6, %v329_v44, 0.0 }
 0xba9   :  { %885 = vadd.xlane.f32.xlu0 %v884_v49  ;;  %v1265_v49 = vsel %vm312_vm6, %v1258_v0, 0.0 }
 0xbaa   :  { %1260 = vadd.xlane.f32.xlu1 %v1259_v26 }
 0xbad   :  { %515 = vadd.xlane.f32.xlu0 %v514_v56  ;;  %v328_v56 = vunpack.c.h.bf16 %v2922_v60  ;;  %v1091_v60 = vsel %vm312_vm6, %v1084_v61, 0.0 }
 0xbae   :  { %703 = vadd.xlane.f32.xlu1 %v702_v21 }
 0xbaf   :  { %v333_v21 = vsel %vm305_vm7, %v328_v56, 0.0 }
 0xbb1   :  { %1263 = vadd.xlane.f32.xlu0 %v1262_v10  ;;  %v1082_v10 = vunpack.c.l.bf16 %v3029_v50 }
 0xbb2   :  { %1449 = vadd.xlane.f32.xlu1 %v1448_v12 }
 0xbb3   :  { %v1085_v12 = vsel %vm305_vm7, %v1082_v10, 0.0 }
 0xbb5   :  { %1446 = vadd.xlane.f32.xlu0 %v1445_v15 }
 0xbb9   :  { %891 = vadd.xlane.f32.xlu0 %v890_v43 }
 0xbf5   :  { %v1616_v17 = vpop.xlane.xlu0 %1615 }
 0xbf6   :  { %v1619_v18 = vsub.f32 %v1607_v11, %v1616_v17  ;;  %v1610_v20 = vpop.xlane.xlu1 %1609 }
 0xbf7   :  { %v1617_v34 = vsub.f32 %v1605_v13, %v1610_v20 }
 0xbf8   :  { %v1621_v24 = vpack.c.bf16 %v1619_v18, %v1619_v18 }
 0xbf9   :  { %v1613_v29 = vpop.xlane.xlu0 %1612 }
 0xbfa   :  { %v1618_v36 = vsub.f32 %v1606_v19, %v1613_v29  ;;  %v1643_v45 = vpop.permute.xlu1 %1642  ;;  %v1626_v38 = vmul.bf16 1069105081, %v1621_v24 }
 0xbfb   :  { %v1652_v46 = vand.u32 %v1643_v45, %v2879_v47 }
 0xbfc   :  { %v1620_v37 = vpack.c.bf16 %v1618_v36, %v1617_v34 }
 0xbfd   :  { %v1641_v39 = vpop.permute.xlu0 %1640 }
 0xbfe   :  { %v1623_v40 = vmul.bf16 1069105081, %v1620_v37  ;;  %2460 = vmatprep.subr.bf16.mxu0 %v1641_v39 }
 0xbff   :  { %2461 = vmatpush3.bf16.msra.mxu0 %v1641_v39 }
 0xc00   :  { %2601 = vpow.bf16 %v1623_v40  ;;  %2462 = vmatprep.subr.bf16.mxu0 %v1652_v46 }
 0xc01   :  { %2603 = vpow.bf16 %v1626_v38 }
 0xc03   :  { %2463 = vmatpush3.bf16.msra.mxu0 %v1652_v46 }
 0xc04   :  { %2468 = vmatprep.subr.bf16.mxu0 %v2678_v30 }
 0xc0b   :  { %v2602_v2 = vpop.eup %2601 }
 0xc0c   :  { %v2604_v11 = vpop.eup %2603  ;;  %2464 = vmatprep.mubr.msk.bf16.mxu0 %vm305_vm7, %v2602_v2  ;;  %v1629_v13 = vunpack.c.h.bf16 %v2602_v2  ;;  %v1628_v19 = vunpack.c.l.bf16 %v2602_v2 }
 0xc0d   :  { %2465 = vmatmul.mubr.msk.bf16.vlgmr.msra.gmra.mrb[24].mxu0 %vm305_vm7, %v2604_v11  ;;  %v1630_v26 = vunpack.c.l.bf16 %v2604_v11 }
 0xc0e   :  { %v1634_v1 = vsel %vm305_vm7, %v1629_v13, 0.0  ;;  %v1631_v47 = vsel %vm305_vm7, %v1628_v19, 0.0  ;;  %2472 = vmatprep.mubr.msk.bf16.mxu0 %vm2679_vm2, %v2678_v30  ;;  %v2555_v19 = vld [vmem:[%s3407_s5] sm:$0xff]  }
 0xc0f   :  { %1635 = vadd.xlane.f32.xlu0 %v1634_v1  ;;  %1632 = vadd.xlane.f32.xlu1 %v1631_v47  ;;  %v1637_v48 = vsel %vm312_vm6, %v1630_v26, 0.0 }
 0xc10   :  { %2469 = vmatpush3.bf16.msra.mxu0 %v2555_v19 }
 0xc11   :  { %2470 = vmatprep.subr.bf16.mxu0 %v2678_v30 }
 0xc13   :  { %1452 = vadd.xlane.f32.xlu0 %v1451_v42  ;;  %1266 = vadd.xlane.f32.xlu1 %v1265_v49 }
 0xc17   :  { %331 = vadd.xlane.f32.xlu0 %v330_v52  ;;  %1638 = vadd.xlane.f32.xlu1 %v1637_v48 }
 0xc1b   :  { %337 = vadd.xlane.f32.xlu0 %v336_v63  ;;  %334 = vadd.xlane.f32.xlu1 %v333_v21 }
 0xc1f   :  { %1089 = vadd.xlane.f32.xlu0 %v1088_v4  ;;  %1086 = vadd.xlane.f32.xlu1 %v1085_v12 }
 0xc23   :  { %1092 = vadd.xlane.f32.xlu1 %v1091_v60 }
 0xc2b   :  { %v510_v15 = vpop.xlane.xlu1 %509 }
 0xc2c   :  { %2605 = vrcp.f32 %v510_v15 }
 0xc2e   :  { %v513_v16 = vpop.xlane.xlu0 %512 }
 0xc2f   :  { %2607 = vrcp.f32 %v513_v16  ;;  %v701_v43 = vpop.xlane.xlu1 %700 }
 0xc32   :  { %v698_v17 = vpop.xlane.xlu0 %697 }
 0xc33   :  { %2609 = vrcp.f32 %v698_v17  ;;  %v889_v50 = vpop.xlane.xlu1 %888 }
 0xc34   :  { %2611 = vrcp.f32 %v701_v43 }
 0xc36   :  { %v2606_v18 = vpop.eup %2605  ;;  %v886_v20 = vpop.xlane.xlu0 %885 }
 0xc37   :  { %2613 = vrcp.f32 %v886_v20  ;;  %v1261_v24 = vpop.xlane.xlu1 %1260  ;;  %v582_v51 = vmul.f32 %v2606_v18, %v2965_v28 }
 0xc38   :  { %2615 = vrcp.f32 %v889_v50 }
 0xc39   :  { %v2608_v29 = vpop.eup %2607  ;;  %588 = vrot.lane.b32.xlu0 %v582_v51, %s2692_s18 }
 0xc3a   :  { %v516_v34 = vpop.xlane.xlu0 %515  ;;  %v583_v36 = vmul.f32 %v2608_v29, %v2967_v31 }
 0xc3b   :  { %2617 = vrcp.f32 %v516_v34  ;;  %v704_v45 = vpop.xlane.xlu1 %703 }
 0xc3c   :  { %590 = vrot.lane.b32.xlu1 %v583_v36, %s2692_s18  ;;  %2619 = vrcp.f32 %v1261_v24 }
 0xc3d   :  { %v2610_v37 = vpop.eup %2609 }
 0xc3e   :  { %v1264_v38 = vpop.xlane.xlu0 %1263  ;;  %v770_v39 = vmul.f32 %v2610_v37, %v2971_v33  ;;  %v2612_v40 = vpop.eup %2611 }
 0xc3f   :  { %2621 = vrcp.f32 %v1264_v38  ;;  %v1450_v46 = vpop.xlane.xlu1 %1449  ;;  %v771_v31 = vmul.f32 %v2612_v40, %v2973_v35 }
 0xc40   :  { %776 = vrot.lane.b32.xlu1 %v770_v39, %s2693_s19  ;;  %2623 = vrcp.f32 %v704_v45 }
 0xc41   :  { %v2614_v28 = vpop.eup %2613 }
 0xc42   :  { %v1447_v2 = vpop.xlane.xlu0 %1446  ;;  %v958_v11 = vmul.f32 %v2614_v28, %v3010_v7  ;;  %v2616_v13 = vpop.eup %2615  ;;  %v2556_v7 = vld [vmem:[%s3407_s5 + $0x8] sm:$0xff]  }
 0xc43   :  { %2625 = vrcp.f32 %v1447_v2  ;;  %v959_v47 = vmul.f32 %v2616_v13, %v3012_v9  ;;  %2471 = vmatpush3.bf16.msra.mxu0 %v2556_v7 }
 0xc44   :  { %778 = vrot.lane.b32.xlu1 %v771_v31, %s2693_s19  ;;  %964 = vrot.lane.b32.xlu0 %v958_v11, %s2694_s3  ;;  %2627 = vrcp.f32 %v1450_v46 }
 0xc45   :  { %v2618_v33 = vpop.eup %2617  ;;  %2500 = vmatprep.subr.bf16.mxu0 %v2678_v30 }
 0xc46   :  { %v892_v1 = vpop.xlane.xlu0 %891  ;;  %v584_v35 = vmul.f32 %v2618_v33, %v2963_v27  ;;  %v2620_v41 = vpop.eup %2619 }
 0xc47   :  { %2629 = vrcp.f32 %v892_v1  ;;  %v1333_v42 = vmul.f32 %v2620_v41, %v3082_v55 }
 0xc48   :  { %966 = vrot.lane.b32.xlu1 %v959_v47, %s2694_s3  ;;  %592 = vrot.lane.b32.xlu0 %v584_v35, %s2692_s18 }
 0xc49   :  { %v2622_v0 = vpop.eup %2621 }
 0xc4a   :  { %v1334_v9 = vmul.f32 %v2622_v0, %v3084_v58  ;;  %v2624_v27 = vpop.eup %2623 }
 0xc4b   :  { %v772_v14 = vmul.f32 %v2624_v27, %v2969_v32 }
 0xc4c   :  { %1339 = vrot.lane.b32.xlu1 %v1333_v42, %s2692_s18  ;;  %1341 = vrot.lane.b32.xlu0 %v1334_v9, %s2692_s18 }
 0xc4d   :  { %v2626_v49 = vpop.eup %2625 }
 0xc4e   :  { %v1519_v26 = vmul.f32 %v2626_v49, %v3119_v5  ;;  %v2628_v52 = vpop.eup %2627 }
 0xc4f   :  { %v1520_v58 = vmul.f32 %v2628_v52, %v3121_v8 }
 0xc50   :  { %780 = vrot.lane.b32.xlu1 %v772_v14, %s2693_s19  ;;  %1525 = vrot.lane.b32.xlu0 %v1519_v26, %s2693_s19 }
 0xc51   :  { %v2630_v55 = vpop.eup %2629 }
 0xc52   :  { %v960_v48 = vmul.f32 %v2630_v55, %v3008_v6 }
 0xc54   :  { %1527 = vrot.lane.b32.xlu1 %v1520_v58, %s2693_s19  ;;  %968 = vrot.lane.b32.xlu0 %v960_v48, %s2694_s3 }
 0xc9c   :  { %v3215_v44 = vpop.xlane.xlu1 %1632  ;;  %v3217_v56 = vpop.xlane.xlu0 %1635 }
 0xca0   :  { %v3219_v32 = vpop.xlane.xlu1 %1266  ;;  %v3221_v5 = vpop.xlane.xlu0 %1452 }
 0xca4   :  { %v3223_v63 = vpop.xlane.xlu1 %1638  ;;  %v332_v21 = vpop.xlane.xlu0 %331 }
 0xca5   :  { %2631 = vrcp.f32 %v332_v21 }
 0xca8   :  { %v335_v53 = vpop.xlane.xlu1 %334  ;;  %v338_v8 = vpop.xlane.xlu0 %337 }
 0xca9   :  { %2633 = vrcp.f32 %v335_v53 }
 0xcaa   :  { %2635 = vrcp.f32 %v338_v8  ;;  %v2674_v8 = vld [vmem:[%s3402_s0 + $0x8] sm:$0xff] }
 0xcac   :  { %v1087_v6 = vpop.xlane.xlu1 %1086  ;;  %v1090_v10 = vpop.xlane.xlu0 %1089 }
 0xcad   :  { %2637 = vrcp.f32 %v1087_v6 }
 0xcae   :  { %2639 = vrcp.f32 %v1090_v10 }
 0xcaf   :  { %v2632_v4 = vpop.eup %2631 }
 0xcb0   :  { %v1093_v12 = vpop.xlane.xlu1 %1092  ;;  %v407_v61 = vmul.f32 %v2632_v4, %v2959_v23  ;;  %v589_v60 = vpop.permute.xlu0 %588 }
 0xcb1   :  { %2641 = vrcp.f32 %v1093_v12 }
 0xcb2   :  { %410 = vst.msk [vmem:[#allocation2] sm:$0xff] %vm241_vm3, %v407_v61  ;;  %2643 = vrcp.f32 %v3215_v44 }
 0xcb3   :  { %v2634_v15 = vpop.eup %2633  ;;  %598 = vst.msk [vmem:[#allocation2] sm:$0xff] %vm597_vm8, %v589_v60  ;;  %2645 = vrcp.f32 %v3217_v56  ;;  %v2221_v56 = vld [vmem:[%s3408_s6] ss:$0 sm:$0xff] }
 0xcb4   :  { %v2636_v16 = vpop.eup %2635  ;;  %v408_v43 = vmul.f32 %v2634_v15, %v2961_v25  ;;  %v591_v17 = vpop.permute.xlu1 %590  ;;  %2647 = vrcp.f32 %v3219_v32  ;;  %v2673_v32 = vld [vmem:[%s3402_s0] sm:$0xff] }
 0xcb5   :  { %v409_v50 = vmul.f32 %v2636_v16, %v2957_v22  ;;  %2649 = vrcp.f32 %v3221_v5 }
 0xcb6   :  { %411 = vst.msk [vmem:[#allocation2 + $0x8] sm:$0xff] %vm241_vm3, %v408_v43  ;;  %v965_v18 = vpop.permute.xlu0 %964  ;;  %2651 = vrcp.f32 %v3223_v63 }
 0xcb7   :  { %v2638_v20 = vpop.eup %2637  ;;  %599 = vst.msk [vmem:[#allocation2 + $0x8] sm:$0xff] %vm597_vm8, %v591_v17 }
 0xcb8   :  { %413 = vst.msk [vmem:[#allocation2 + $0x10] sm:$0x1] %vm412_vm9, %v409_v50  ;;  %v2640_v23 = vpop.eup %2639  ;;  %v777_v24 = vpop.permute.xlu1 %776  ;;  %v1159_v51 = vmul.f32 %v2638_v20, %v3044_v57  ;;  %v2675_v50 = vld [vmem:[%s3402_s0 + $0x10] sm:$0xff] }
 0xcb9   :  { %786 = vst.msk [vmem:[#allocation2] sm:$0xff] %vm785_vm10, %v777_v24  ;;  %v1160_v25 = vmul.f32 %v2640_v23, %v3046_v62 }
 0xcba   :  { %974 = vst.msk [vmem:[#allocation2] sm:$0xff] %vm973_vm11, %v965_v18  ;;  %v593_v22 = vpop.permute.xlu0 %592 }
 0xcbb   :  { %1162 = vst.msk [vmem:[#allocation2 + $0x11] sm:$0xff] %vm241_vm3, %v1159_v51  ;;  %v2642_v29 = vpop.eup %2641  ;;  %1163 = vst.msk [vmem:[#allocation2 + $0x19] sm:$0xff] %vm241_vm3, %v1160_v25 }
 0xcbc   :  { %601 = vst.msk [vmem:[#allocation2 + $0x10] sm:$0x1] %vm600_vm12, %v593_v22  ;;  %v779_v34 = vpop.permute.xlu1 %778  ;;  %v1161_v36 = vmul.f32 %v2642_v29, %v3042_v59  ;;  %v2644_v31 = vpop.eup %2643  ;;  %v2676_v22 = vld [vmem:[%s3402_s0 + $0x18] sm:$0xff] }
 0xcbd   :  { %787 = vst.msk [vmem:[#allocation2 + $0x8] sm:$0xff] %vm785_vm10, %v779_v34  ;;  %v2646_v13 = vpop.eup %2645 }
 0xcbe   :  { %v1342_v57 = vpop.permute.xlu0 %1341  ;;  %1164 = vst.msk [vmem:[#allocation2 + $0x21] sm:$0x1] %vm412_vm9, %v1161_v36  ;;  %v2648_v1 = vpop.eup %2647 }
 0xcbf   :  { %1349 = vst.msk [vmem:[#allocation2 + $0x19] sm:$0xff] %vm597_vm8, %v1342_v57  ;;  %v2650_v7 = vpop.eup %2649  ;;  %v1335_v41 = vmul.f32 %v2648_v1, %v3080_v54 }
 0xcc0   :  { %v967_v62 = vpop.permute.xlu1 %966  ;;  %v1521_v0 = vmul.f32 %v2650_v7, %v3117_v3  ;;  %v2652_v42 = vpop.eup %2651 }
 0xcc1   :  { %975 = vst.msk [vmem:[#allocation2 + $0x8] sm:$0xff] %vm973_vm11, %v967_v62  ;;  %v1723_v59 = vld [vmem:[#allocation2] sm:$0xff] }
 0xcc2   :  { %v1526_v45 = vpop.permute.xlu0 %1525 }
 0xcc4   :  { %v1340_v37 = vpop.permute.xlu1 %1339 }
 0xcc5   :  { %1348 = vst.msk [vmem:[#allocation2 + $0x11] sm:$0xff] %vm597_vm8, %v1340_v37 }
 0xcc6   :  { %1534 = vst.msk [vmem:[#allocation2 + $0x11] sm:$0xff] %vm785_vm10, %v1526_v45  ;;  %v969_v40 = vpop.permute.xlu0 %968 }
 0xcc8   :  { %v781_v38 = vpop.permute.xlu1 %780  ;;  %v1724_v39 = vld [vmem:[#allocation2 + $0x8] sm:$0xff] }
 0xcc9   :  { %789 = vst.msk [vmem:[#allocation2 + $0x10] sm:$0x1] %vm788_vm13, %v781_v38  ;;  %v1728_v28 = vpack.c.bf16 %v1724_v39, %v1723_v59  ;;  %v2677_v38 = vld [vmem:[%s3402_s0 + $0x20] sm:$0x3] }
 0xcca   :  { %977 = vst.msk [vmem:[#allocation2 + $0x10] sm:$0x1] %vm976_vm14, %v969_v40 }
 0xccb   :  { %2473 = vmatmul.mubr.msk.bf16.vlgmr.msra.gmra.mrb[28].mxu0 %vm52_vm0, %v1728_v28 }
 0xccc   :  { %v1528_v46 = vpop.permute.xlu1 %1527  ;;  %2476 = vmatprep.mubr.msk.bf16.mxu0 %vm2679_vm2, %v2678_v30 }
 0xccd   :  { %1535 = vst.msk [vmem:[#allocation2 + $0x19] sm:$0xff] %vm785_vm10, %v1528_v46 }
 0xce0   :  { %v2466_v2 = vpop.f32.mrb[24].mxu0 }
 0xce1   :  { %v1688_v11 = vpop.f32.mrb[25].mxu0  ;;  %v1707_v9 = vmul.f32 %v2652_v42, %v2466_v2 }
 0xce2   :  { %v1705_v19 = vmul.f32 %v2644_v31, %v1688_v11  ;;  %v2467_v33 = vpop.f32.mrb[26].mxu0 }
 0xce3   :  { %v1691_v47 = vpop.f32.mrb[27].mxu0  ;;  %v2558_v33 = vld [vmem:[%s3409_s9 + $0x8] sm:$0xff]  }
 0xce4   :  { %v1706_v35 = vmul.f32 %v2646_v13, %v1691_v47  ;;  %1711 = vrot.lane.b32.xlu1 %v1705_v19, %s2694_s3  ;;  %v2557_v19 = vld [vmem:[%s3409_s9] sm:$0xff]  }
 0xce5   :  { %2485 = vmatpush3.bf16.msra.mxu1 %v2557_v19 }
 0xce6   :  { %1713 = vrot.lane.b32.xlu0 %v1706_v35, %s2694_s3  ;;  %2486 = vmatprep.subr.bf16.mxu1 %v2678_v30 }
 0xce8   :  { %1343 = vrot.lane.b32.xlu1 %v1335_v41, %s2692_s18 }
 0xce9   :  { %2487 = vmatpush3.bf16.msra.mxu1 %v2558_v33 }
 0xcea   :  { %1529 = vrot.lane.b32.xlu0 %v1521_v0, %s2693_s19 }
 0xcec   :  { %1715 = vrot.lane.b32.xlu1 %v1707_v9, %s2694_s3 }
 0xd56   :  { %v1712_v27 = vpop.permute.xlu1 %1711 }
 0xd57   :  { %1720 = vst.msk [vmem:[#allocation2 + $0x11] sm:$0xff] %vm973_vm11, %v1712_v27 }
 0xd58   :  { %v1714_v49 = vpop.permute.xlu0 %1713 }
 0xd59   :  { %1721 = vst.msk [vmem:[#allocation2 + $0x19] sm:$0xff] %vm973_vm11, %v1714_v49 }
 0xd5a   :  { %v1344_v14 = vpop.permute.xlu1 %1343 }
 0xd5b   :  { %1350 = vst.msk [vmem:[#allocation2 + $0x21] sm:$0x1] %vm600_vm12, %v1344_v14 }
 0xd5c   :  { %v1530_v54 = vpop.permute.xlu0 %1529 }
 0xd5d   :  { %1536 = vst.msk [vmem:[#allocation2 + $0x21] sm:$0x1] %vm788_vm13, %v1530_v54 }
 0xd5e   :  { %v1716_v26 = vpop.permute.xlu1 %1715  ;;  %v1725_v3 = vld [vmem:[#allocation2 + $0x10] sm:$0xff] }
 0xd5f   :  { %1722 = vst.msk [vmem:[#allocation2 + $0x21] sm:$0x1] %vm976_vm14, %v1716_v26 }
 0xd60   :  { %v1726_v52 = vld [vmem:[#allocation2 + $0x18] sm:$0xff] }
 0xd61   :  { %v1729_v55 = vpack.c.bf16 %v1726_v52, %v1725_v3 }
 0xd63   :  { %2477 = vmatmul.mubr.msk.bf16.gmra.mrb[32].mxu0 %vm52_vm0, %v1729_v55 }
 0xd64   :  { %2480 = vmatprep.mubr.msk.bf16.mxu0 %vm2679_vm2, %v2678_v30 }
 0xd66   :  { %v1727_v58 = vld [vmem:[#allocation2 + $0x20] sm:$0x3] }
 0xd67   :  { %v1730_v48 = vpack.c.bf16 %v1727_v58, %v1727_v58 }
 0xd6b   :  { %2481 = vmatmul.mubr.msk.bf16.gmra.mrb[36].mxu0 %vm52_vm0, %v1730_v48 }
 0xd6c   :  { %2508 = vmatprep.mubr.msk.bf16.mxu0 %vm2679_vm2, %v2678_v30 }
 0xd9e   :  { %v1790_v44 = vpop.f32.mrb[28].mxu0 }
 0xd9f   :  { %v1812_v5 = vadd.f32 %v2673_v32, %v1790_v44  ;;  %v2474_v63 = vpop.f32.mrb[29].mxu0 }
 0xda0   :  { %v1793_v21 = vpop.f32.mrb[30].mxu0 }
 0xda1   :  { %v3282_v53 = vadd.f32 %v2221_v56, %v1812_v5  ;;  %v1813_v6 = vadd.f32 %v2674_v8, %v1793_v21  ;;  %v2475_v10 = vpop.f32.mrb[31].mxu0  ;;  %v2222_v21 = vld [vmem:[%s3410_s7] ss:$0 sm:$0xff] }
 0xda3   :  { %v3287_v4 = vadd.f32 %v2221_v56, %v1813_v6  ;;  %v1831_v12 = vsel %vm52_vm0, %v3282_v53, 0.0 }
 0xda4   :  { %1832 = vadd.xlane.f32.xlu0 %v1831_v12  ;;  %v2223_v12 = vld [vmem:[%s3411_s8] ss:$0 sm:$0xff] }
 0xda5   :  { %v1834_v61 = vsel %vm52_vm0, %v3287_v4, 0.0 }
 0xda6   :  { %1835 = vadd.xlane.f32.xlu1 %v1834_v61 }
 0xe31   :  { %v1833_v60 = vpop.xlane.xlu0 %1832 }
 0xe32   :  { %v1846_v15 = vmul.f32 0.03125, %v1833_v60 }
 0xe33   :  { %v1836_v23 = vpop.xlane.xlu1 %1835 }
 0xe34   :  { %v3294_v16 = vsub.f32 %v3282_v53, %v1846_v15  ;;  %v1847_v36 = vmul.f32 0.03125, %v1836_v23 }
 0xe36   :  { %v1798_v43 = vpop.f32.mrb[32].mxu0  ;;  %v1856_v17 = vmul.f32 %v3294_v16, %v3294_v16  ;;  %v1852_v37 = vsub.f32 %v3287_v4, %v1847_v36 }
 0xe37   :  { %v1814_v18 = vadd.f32 %v2675_v50, %v1798_v43  ;;  %v2478_v20 = vpop.f32.mrb[33].mxu0  ;;  %v2561_v50 = vld [vmem:[%s3412_s11 + $0x10] sm:$0xff]  }
 0xe38   :  { %v1801_v24 = vpop.f32.mrb[34].mxu0  ;;  %v1861_v51 = vsel %vm52_vm0, %v1856_v17, 0.0  ;;  %v1857_v11 = vmul.f32 %v1852_v37, %v1852_v37  ;;  %v2560_v17 = vld [vmem:[%s3412_s11 + $0x8] sm:$0xff]  }
 0xe39   :  { %v3302_v25 = vadd.f32 %v2221_v56, %v1814_v18  ;;  %v1815_v29 = vadd.f32 %v2676_v22, %v1801_v24  ;;  %v2479_v34 = vpop.f32.mrb[35].mxu0  ;;  %1862 = vadd.xlane.f32.xlu1 %v1861_v51  ;;  %v2562_v18 = vld [vmem:[%s3412_s11 + $0x18] sm:$0xff]  }
 0xe3a   :  { %v1864_v13 = vsel %vm52_vm0, %v1857_v11, 0.0 }
 0xe3b   :  { %v3307_v57 = vadd.f32 %v2221_v56, %v1815_v29  ;;  %v1837_v62 = vsel %vm52_vm0, %v3302_v25, 0.0 }
 0xe3c   :  { %1838 = vadd.xlane.f32.xlu0 %v1837_v62 }
 0xe3d   :  { %v1840_v40 = vsel %vm52_vm0, %v3307_v57, 0.0 }
 0xe3e   :  { %v1806_v45 = vpop.f32.mrb[36].mxu0 }
 0xe3f   :  { %v1816_v59 = vadd.f32 %v2677_v38, %v1806_v45  ;;  %v2482_v39 = vpop.f32.mrb[37].mxu0 }
 0xe40   :  { %1841 = vadd.xlane.f32.xlu0 %v1840_v40  ;;  %v1809_v28 = vpop.f32.mrb[38].mxu0 }
 0xe41   :  { %v3317_v46 = vadd.f32 %v2221_v56, %v1816_v59  ;;  %v2483_v2 = vpop.f32.mrb[39].mxu0 }
 0xe43   :  { %v1843_v31 = vsel %vm65_vm1, %v3317_v46, 0.0 }
 0xe44   :  { %1844 = vadd.xlane.f32.xlu0 %v1843_v31 }
 0xe48   :  { %1865 = vadd.xlane.f32.xlu0 %v1864_v13 }
 0xec6   :  { %v1863_v1 = vpop.xlane.xlu1 %1862 }
 0xec7   :  { %v1876_v7 = vmul.f32 0.03125, %v1863_v1 }
 0xec9   :  { %v1839_v47 = vpop.xlane.xlu0 %1838  ;;  %v1881_v27 = vadd.f32 1e-05, %v1876_v7 }
 0xeca   :  { %v1848_v35 = vmul.f32 0.03125, %v1839_v47  ;;  %v2224_v47 = vld [vmem:[%s3413_s10] ss:$0 sm:$0xff] }
 0xecb   :  { %2653 = vrsqrt.f32 %v1881_v27 }
 0xecc   :  { %v1853_v41 = vsub.f32 %v3302_v25, %v1848_v35 }
 0xecd   :  { %v1842_v0 = vpop.xlane.xlu0 %1841 }
 0xece   :  { %v1849_v42 = vmul.f32 0.03125, %v1842_v0  ;;  %v1858_v9 = vmul.f32 %v1853_v41, %v1853_v41 }
 0xed0   :  { %v1854_v49 = vsub.f32 %v3307_v57, %v1849_v42  ;;  %v1867_v14 = vsel %vm52_vm0, %v1858_v9, 0.0 }
 0xed1   :  { %1868 = vadd.xlane.f32.xlu1 %v1867_v14  ;;  %v1845_v54 = vpop.xlane.xlu0 %1844 }
 0xed2   :  { %v1850_v26 = vmul.f32 0.03125, %v1845_v54  ;;  %v1859_v3 = vmul.f32 %v1854_v49, %v1854_v49 }
 0xed4   :  { %v1855_v52 = vsub.f32 %v3317_v46, %v1850_v26  ;;  %v1870_v55 = vsel %vm52_vm0, %v1859_v3, 0.0 }
 0xed5   :  { %1871 = vadd.xlane.f32.xlu0 %v1870_v55  ;;  %v1866_v58 = vpop.xlane.xlu0 %1865  ;;  %v2654_v5 = vpop.eup %2653 }
 0xed6   :  { %v1877_v48 = vmul.f32 0.03125, %v1866_v58  ;;  %v1860_v44 = vmul.f32 %v1855_v52, %v1855_v52  ;;  %v1891_v63 = vmul.f32 %v2654_v5, %v3294_v16  ;;  %v2559_v16 = vld [vmem:[%s3412_s11] sm:$0xff]  }
 0xed7   :  { %2501 = vmatpush3.bf16.msra.mxu0 %v2559_v16 }
 0xed8   :  { %v1882_v56 = vadd.f32 1e-05, %v1877_v48  ;;  %v1873_v32 = vsel %vm65_vm1, %v1860_v44, 0.0  ;;  %v1902_v6 = vmul.f32 %v2222_v21, %v1891_v63  ;;  %2502 = vmatprep.subr.bf16.mxu0 %v2678_v30 }
 0xed9   :  { %1874 = vadd.xlane.f32.xlu1 %v1873_v32 }
 0xeda   :  { %2655 = vrsqrt.f32 %v1882_v56  ;;  %v1913_v60 = vadd.f32 %v2223_v12, %v1902_v6 }
 0xedb   :  { %2503 = vmatpush3.bf16.msra.mxu0 %v2560_v17 }
 0xedc   :  { %2504 = vmatprep.subr.bf16.mxu0 %v2678_v30 }
 0xedf   :  { %2505 = vmatpush3.bf16.msra.mxu0 %v2561_v50 }
 0xee0   :  { %2506 = vmatprep.subr.bf16.mxu0 %v2678_v30 }
 0xee3   :  { %2507 = vmatpush3.bf16.msra.mxu0 %v2562_v18 }
 0xee4   :  { %v2656_v8 = vpop.eup %2655 }
 0xee5   :  { %v1892_v10 = vmul.f32 %v2656_v8, %v1852_v37 }
 0xee7   :  { %v1903_v61 = vmul.f32 %v2222_v21, %v1892_v10 }
 0xee9   :  { %v1914_v15 = vadd.f32 %v2223_v12, %v1903_v61 }
 0xeeb   :  { %v1918_v43 = vpack.c.bf16 %v1914_v15, %v1913_v60 }
 0xeed   :  { %2489 = vmatmul.mubr.msk.bf16.vlgmr.msra.gmra.mrb[48].mxu1 %vm52_vm0, %v1918_v43 }
 0xeee   :  { %2492 = vmatprep.mubr.msk.bf16.mxu1 %vm2679_vm2, %v2678_v30 }
 0xf5e   :  { %v1869_v20 = vpop.xlane.xlu1 %1868 }
 0xf5f   :  { %v1878_v23 = vmul.f32 0.03125, %v1869_v20 }
 0xf61   :  { %v1883_v24 = vadd.f32 1e-05, %v1878_v23 }
 0xf62   :  { %v1872_v51 = vpop.xlane.xlu0 %1871 }
 0xf63   :  { %2657 = vrsqrt.f32 %v1883_v24  ;;  %v1879_v22 = vmul.f32 0.03125, %v1872_v51 }
 0xf65   :  { %v1884_v29 = vadd.f32 1e-05, %v1879_v22 }
 0xf66   :  { %v1875_v34 = vpop.xlane.xlu1 %1874 }
 0xf67   :  { %2659 = vrsqrt.f32 %v1884_v29  ;;  %v1880_v36 = vmul.f32 0.03125, %v1875_v34 }
 0xf69   :  { %v1885_v62 = vadd.f32 1e-05, %v1880_v36 }
 0xf6b   :  { %2661 = vrsqrt.f32 %v1885_v62 }
 0xf6d   :  { %v2658_v45 = vpop.eup %2657 }
 0xf6e   :  { %v1893_v37 = vmul.f32 %v2658_v45, %v1853_v41 }
 0xf70   :  { %v1904_v39 = vmul.f32 %v2222_v21, %v1893_v37 }
 0xf71   :  { %v2660_v38 = vpop.eup %2659 }
 0xf72   :  { %v1894_v59 = vmul.f32 %v2660_v38, %v1854_v49  ;;  %v1915_v31 = vadd.f32 %v2223_v12, %v1904_v39 }
 0xf74   :  { %v1905_v40 = vmul.f32 %v2222_v21, %v1894_v59 }
 0xf75   :  { %v2662_v28 = vpop.eup %2661 }
 0xf76   :  { %v1895_v2 = vmul.f32 %v2662_v28, %v1855_v52  ;;  %v1916_v11 = vadd.f32 %v2223_v12, %v1905_v40 }
 0xf78   :  { %v1919_v13 = vpack.c.bf16 %v1916_v11, %v1915_v31  ;;  %v1906_v19 = vmul.f32 %v2222_v21, %v1895_v2 }
 0xf7a   :  { %2493 = vmatmul.mubr.msk.bf16.gmra.mrb[52].mxu1 %vm52_vm0, %v1919_v13  ;;  %v1917_v33 = vadd.f32 %v2223_v12, %v1906_v19 }
 0xf7b   :  { %2496 = vmatprep.mubr.msk.bf16.mxu1 %vm2679_vm2, %v2678_v30 }
 0xf7c   :  { %v1920_v1 = vpack.c.bf16 %v1917_v33, %v1917_v33 }
 0xf82   :  { %2497 = vmatmul.mubr.msk.bf16.gmra.mrb[56].mxu1 %vm52_vm0, %v1920_v1 }
 0xfc0   :  { %v1987_v35 = vpop.f32.mrb[48].mxu1 }
 0xfc1   :  { %v1988_v7 = vadd.f32 %v2224_v47, %v1987_v35  ;;  %v2490_v41 = vpop.f32.mrb[49].mxu1 }
 0xfc2   :  { %v1990_v0 = vpop.f32.mrb[50].mxu1 }
 0xfc3   :  { %v2014_v42 = vmul.f32 0.044715, %v1988_v7  ;;  %v1991_v9 = vadd.f32 %v2224_v47, %v1990_v0  ;;  %v2491_v27 = vpop.f32.mrb[51].mxu1  ;;  %v2009_v5 = vmul.f32 0.5, %v1988_v7 }
 0xfc5   :  { %v2019_v49 = vmul.f32 %v2014_v42, %v1988_v7  ;;  %v2015_v14 = vmul.f32 0.044715, %v1991_v9  ;;  %v2010_v63 = vmul.f32 0.5, %v1991_v9 }
 0xfc7   :  { %v2024_v54 = vmul.f32 %v2019_v49, %v1988_v7  ;;  %v2020_v26 = vmul.f32 %v2015_v14, %v1991_v9  ;;  %v2230_v49 = vld [vmem:[%s3414_s12] ss:$0 sm:$0xff] }
 0xfc9   :  { %v2029_v3 = vadd.f32 %v2024_v54, %v1988_v7  ;;  %v2025_v52 = vmul.f32 %v2020_v26, %v1991_v9 }
 0xfcb   :  { %v2034_v55 = vmul.f32 0.7978846, %v2029_v3  ;;  %v2030_v58 = vadd.f32 %v2025_v52, %v1991_v9 }
 0xfcd   :  { %2663 = vtanh.f32 %v2034_v55  ;;  %v2035_v48 = vmul.f32 0.7978846, %v2030_v58 }
 0xfcf   :  { %2665 = vtanh.f32 %v2035_v48 }
 0xfd7   :  { %v2664_v44 = vpop.eup %2663 }
 0xfd8   :  { %v2044_v56 = vadd.f32 1.0, %v2664_v44 }
 0xfd9   :  { %v2666_v32 = vpop.eup %2665 }
 0xfda   :  { %v2045_v21 = vadd.f32 1.0, %v2666_v32  ;;  %v2049_v8 = vmul.f32 %v2044_v56, %v2009_v5 }
 0xfdc   :  { %v2050_v6 = vmul.f32 %v2045_v21, %v2010_v63 }
 0xfde   :  { %v2054_v10 = vpack.c.bf16 %v2050_v6, %v2049_v8 }
 0xfe0   :  { %2509 = vmatmul.mubr.msk.bf16.vlgmr.msra.gmra.mrb[40].mxu0 %vm2096_vm15, %v2054_v10 }
 0xfe1   :  { %2512 = vmatprep.mubr.msk.bf16.mxu0 %vm2679_vm2, %v2678_v30 }
0x104d   :  { %v1995_v12 = vpop.f32.mrb[52].mxu1 }
0x104e   :  { %v1996_v61 = vadd.f32 %v2224_v47, %v1995_v12  ;;  %v2494_v60 = vpop.f32.mrb[53].mxu1 }
0x104f   :  { %v1998_v15 = vpop.f32.mrb[54].mxu1 }
0x1050   :  { %v2016_v43 = vmul.f32 0.044715, %v1996_v61  ;;  %v1999_v16 = vadd.f32 %v2224_v47, %v1998_v15  ;;  %v2495_v17 = vpop.f32.mrb[55].mxu1  ;;  %v2011_v19 = vmul.f32 0.5, %v1996_v61 }
0x1052   :  { %v2021_v50 = vmul.f32 %v2016_v43, %v1996_v61  ;;  %v2017_v18 = vmul.f32 0.044715, %v1999_v16  ;;  %v2012_v33 = vmul.f32 0.5, %v1999_v16 }
0x1054   :  { %v2026_v20 = vmul.f32 %v2021_v50, %v1996_v61  ;;  %v2022_v23 = vmul.f32 %v2017_v18, %v1999_v16 }
0x1055   :  { %v2003_v24 = vpop.f32.mrb[56].mxu1 }
0x1056   :  { %v2031_v51 = vadd.f32 %v2026_v20, %v1996_v61  ;;  %v2027_v22 = vmul.f32 %v2022_v23, %v1999_v16  ;;  %v2004_v29 = vadd.f32 %v2224_v47, %v2003_v24  ;;  %v2498_v34 = vpop.f32.mrb[57].mxu1 }
0x1057   :  { %v2006_v36 = vpop.f32.mrb[58].mxu1 }
0x1058   :  { %v2036_v62 = vmul.f32 0.7978846, %v2031_v51  ;;  %v2032_v45 = vadd.f32 %v2027_v22, %v1999_v16  ;;  %v2018_v37 = vmul.f32 0.044715, %v2004_v29  ;;  %v2499_v38 = vpop.f32.mrb[59].mxu1  ;;  %v2013_v0 = vmul.f32 0.5, %v2004_v29 }
0x105a   :  { %2667 = vtanh.f32 %v2036_v62  ;;  %v2037_v59 = vmul.f32 0.7978846, %v2032_v45  ;;  %v2023_v39 = vmul.f32 %v2018_v37, %v2004_v29 }
0x105c   :  { %2669 = vtanh.f32 %v2037_v59  ;;  %v2028_v40 = vmul.f32 %v2023_v39, %v2004_v29 }
0x105e   :  { %v2033_v28 = vadd.f32 %v2028_v40, %v2004_v29 }
0x1060   :  { %v2038_v2 = vmul.f32 0.7978846, %v2033_v28 }
0x1062   :  { %2671 = vtanh.f32 %v2038_v2 }
0x1064   :  { %v2668_v31 = vpop.eup %2667 }
0x1065   :  { %v2046_v11 = vadd.f32 1.0, %v2668_v31 }
0x1066   :  { %v2670_v13 = vpop.eup %2669 }
0x1067   :  { %v2047_v1 = vadd.f32 1.0, %v2670_v13  ;;  %v2051_v47 = vmul.f32 %v2046_v11, %v2011_v19 }
0x1069   :  { %v2052_v35 = vmul.f32 %v2047_v1, %v2012_v33 }
0x106b   :  { %v2055_v7 = vpack.c.bf16 %v2052_v35, %v2051_v47 }
0x106c   :  { %v2672_v41 = vpop.eup %2671 }
0x106d   :  { %2513 = vmatmul.mubr.msk.bf16.gmra.mrb[44].mxu0 %vm2096_vm15, %v2055_v7  ;;  %v2048_v42 = vadd.f32 1.0, %v2672_v41 }
0x106e   :  { %2516 = vmatprep.mubr.msk.bf16.mxu0 %vm2679_vm2, %v2678_v30 }
0x106f   :  { %v2053_v9 = vmul.f32 %v2048_v42, %v2013_v0 }
0x1071   :  { %v2056_v27 = vpack.c.bf16 %v2053_v9, %v2053_v9 }
0x1075   :  { %2517 = vmatmul.mubr.msk.bf16.gmra.mrb[48].mxu0 %vm2096_vm15, %v2056_v27 }
0x10b3   :  { %v2140_v14 = vpop.f32.mrb[40].mxu0 }
0x10b4   :  { %v2141_v54 = vadd.f32 %v2230_v49, %v2140_v14  ;;  %v2510_v26 = vpop.f32.mrb[41].mxu0 }
0x10b5   :  { %v2143_v3 = vpop.f32.mrb[42].mxu0 }
0x10b6   :  { %v2162_v52 = vadd.f32 %v2141_v54, %v3282_v53  ;;  %v2144_v55 = vadd.f32 %v2230_v49, %v2143_v3  ;;  %v2511_v58 = vpop.f32.mrb[43].mxu0 }
0x10b8   :  { %2167 = vst.msk [vmem:[%s3415_s13] sm:$0xff] %vm52_vm0, %v2162_v52  ;;  %v2163_v30 = vadd.f32 %v2144_v55, %v3287_v4 }
0x10ba   :  { %2168 = vst.msk [vmem:[%s3415_s13 + $0x8] sm:$0xff] %vm52_vm0, %v2163_v30 }
0x1140   :  { %v2148_v48 = vpop.f32.mrb[44].mxu0 }
0x1141   :  { %v2149_v44 = vadd.f32 %v2230_v49, %v2148_v48  ;;  %v2514_v56 = vpop.f32.mrb[45].mxu0 }
0x1142   :  { %v2151_v32 = vpop.f32.mrb[46].mxu0 }
0x1143   :  { %v2164_v53 = vadd.f32 %v2149_v44, %v3302_v25  ;;  %v2152_v5 = vadd.f32 %v2230_v49, %v2151_v32  ;;  %v2515_v63 = vpop.f32.mrb[47].mxu0 }
0x1145   :  { %2169 = vst.msk [vmem:[%s3415_s13 + $0x10] sm:$0xff] %vm52_vm0, %v2164_v53  ;;  %v2165_v4 = vadd.f32 %v2152_v5, %v3307_v57 }
0x1147   :  { %2170 = vst.msk [vmem:[%s3415_s13 + $0x18] sm:$0xff] %vm52_vm0, %v2165_v4 }
0x1148   :  { %v2156_v21 = vpop.f32.mrb[48].mxu0 }
0x1149   :  { %v2157_v8 = vadd.f32 %v2230_v49, %v2156_v21  ;;  %v2518_v6 = vpop.f32.mrb[49].mxu0 }
0x114a   :  { %v2159_v10 = vpop.f32.mrb[50].mxu0 }
0x114b   :  { %v2166_v25 = vadd.f32 %v2157_v8, %v3317_v46  ;;  %v2519_v12 = vpop.f32.mrb[51].mxu0 }
0x114d   :  { %2171 = vst.msk [vmem:[%s3415_s13 + $0x20] sm:$0x3] %vm65_vm1, %v2166_v25 }

// kernel: clip_forward.9
= control target key start
LH: loop header
LB: loop body
LE: loop exit
PB: predicated region body
PF: predicated region fallthrough
CT: control target
= control target key end

     0   :  { %vm49_vm0 = vcmask 261120   ;;  %v1685_v15 = vmov 0.0   ;;  %vm1686_vm1 = vmmov 0   ;;  %s1689_s20 = smov 104   ;;  %s1690_s21 = smov 80   ;;  %vm165_vm2 = vcmask 64512   ;;  %s2054_s0 = inlined_call_operand.vmem [shape: f32[16,32], index: 0, kind: input, shape index: {}]   ;;  %s2055_s3 = inlined_call_operand.vmem [shape: bf16[32,96], index: 3, kind: input, shape index: {}]   ;;  %s2056_s1 = inlined_call_operand.vmem [shape: f32[1,32], index: 1, kind: input, shape index: {}]   ;;  %s2057_s2 = inlined_call_operand.vmem [shape: f32[1,32], index: 2, kind: input, shape index: {}]   ;;  %s2058_s4 = inlined_call_operand.vmem [shape: f32[1,96], index: 4, kind: input, shape index: {}]   ;;  %s2059_s5 = inlined_call_operand.vmem [shape: bf16[32,32], index: 5, kind: input, shape index: {}]   ;;  %s2060_s6 = inlined_call_operand.vmem [shape: f32[1,32], index: 6, kind: input, shape index: {}]   ;;  %s2061_s9 = inlined_call_operand.vmem [shape: bf16[32,64], index: 9, kind: input, shape index: {}]   ;;  %s2062_s7 = inlined_call_operand.vmem [shape: f32[1,32], index: 7, kind: input, shape index: {}]   ;;  %s2063_s8 = inlined_call_operand.vmem [shape: f32[1,32], index: 8, kind: input, shape index: {}]   ;;  %s2064_s11 = inlined_call_operand.vmem [shape: bf16[64,32], index: 11, kind: input, shape index: {}]   ;;  %s2065_s10 = inlined_call_operand.vmem [shape: f32[1,64], index: 10, kind: input, shape index: {}]   ;;  %s2066_s12 = inlined_call_operand.vmem [shape: f32[1,32], index: 12, kind: input, shape index: {}]   ;;  %s2067_s13 = inlined_call_operand.vmem [shape: f32[16,32], index: 13, kind: output, shape index: {}]  }
   0x1   :  { %v1774_v0 = vld [vmem:[%s2054_s0] sm:$0xff]  ;;  %v1779_v1 = vld [vmem:[%s2054_s0 + $0x8] sm:$0xff]  ;;  %1483 = vmatprep.subr.bf16.mxu0 %v1685_v15  ;;  %1491 = vmatprep.subr.bf16.mxu1 %v1685_v15  ;;  %s1692_s22 = smov 56   ;;  %s1693_s23 = smov 48   ;;  %vm230_vm3 = vcmask 1043456   ;;  %vm394_vm4 = vcmask 130112  }
   0x2   :  { %v50_v2 = vsel %vm49_vm0, %v1774_v0, 0.0  ;;  %v53_v3 = vsel %vm49_vm0, %v1779_v1, 0.0  ;;  %v1631_v14 = vld [vmem:[%s2055_s3] sm:$0xff]   ;;  %v1632_v16 = vld [vmem:[%s2055_s3 + $0x8] sm:$0xff]   ;;  %1487 = vmatprep.mubr.msk.bf16.mxu0 %vm1686_vm1, %v1685_v15  ;;  %1493 = vmatprep.mubr.msk.bf16.mxu1 %vm1686_vm1, %v1685_v15  ;;  %s1694_s24 = smov 112   ;;  %s1695_s25 = smov 64  }
   0x3   :  { %51 = vadd.xlane.f32.xlu0 %v50_v2  ;;  %1484 = vmatpush3.bf16.msra.mxu0 %v1631_v14  ;;  %v1399_v25 = vld [vmem:[%s2056_s1] ss:$0 sm:$0xff]  ;;  %s1687_s1 = smov 96   ;;  %s1696_s26 = smov 88   ;;  %vm513_vm5 = vcmask 195712   ;;  %vm632_vm6 = vcmask 261312  }
   0x4   :  { %1485 = vmatprep.subr.bf16.mxu0 %v1685_v15  ;;  %v1400_v29 = vld [vmem:[%s2057_s2] ss:$0 sm:$0xff]  ;;  %s1688_s2 = smov 120   ;;  %s1697_s27 = smov 40   ;;  %vm1346_vm7 = vcmask 523264  }
   0x5   :  { %v1401_v34 = vld [vmem:[%s2058_s4] ss:$0 sm:$0xff]  ;;  %s1691_s4 = smov 72   ;;  %s1698_s28 = smov 8  }
   0x6   :  { %s1699_s0 = smov 16   ;;  %s1700_s29 = smov 24  }
   0x7   :  { %54 = vadd.xlane.f32.xlu0 %v53_v3  ;;  %1486 = vmatpush3.bf16.msra.mxu0 %v1632_v16 }
   0x8   :  { %1497 = vmatprep.subr.bf16.mxu0 %v1685_v15 }
  0x90   :  { %v52_v4 = vpop.xlane.xlu0 %51 }
  0x91   :  { %v57_v5 = vmul.f32 0.03125, %v52_v4 }
  0x93   :  { %v59_v6 = vsub.f32 %v1774_v0, %v57_v5 }
  0x94   :  { %v55_v7 = vpop.xlane.xlu0 %54 }
  0x95   :  { %v58_v8 = vmul.f32 0.03125, %v55_v7  ;;  %v61_v9 = vmul.f32 %v59_v6, %v59_v6 }
  0x97   :  { %v60_v10 = vsub.f32 %v1779_v1, %v58_v8  ;;  %v63_v11 = vsel %vm49_vm0, %v61_v9, 0.0 }
  0x98   :  { %64 = vadd.xlane.f32.xlu1 %v63_v11 }
  0x99   :  { %v62_v12 = vmul.f32 %v60_v10, %v60_v10 }
  0x9b   :  { %v66_v13 = vsel %vm49_vm0, %v62_v12, 0.0 }
  0x9c   :  { %67 = vadd.xlane.f32.xlu1 %v66_v13 }
 0x125   :  { %v65_v17 = vpop.xlane.xlu1 %64 }
 0x126   :  { %v69_v18 = vmul.f32 0.03125, %v65_v17 }
 0x128   :  { %v71_v19 = vadd.f32 1e-05, %v69_v18 }
 0x129   :  { %v68_v20 = vpop.xlane.xlu1 %67 }
 0x12a   :  { %1641 = vrsqrt.f32 %v71_v19  ;;  %v70_v21 = vmul.f32 0.03125, %v68_v20 }
 0x12c   :  { %v72_v22 = vadd.f32 1e-05, %v70_v21 }
 0x12e   :  { %1643 = vrsqrt.f32 %v72_v22 }
 0x134   :  { %v1642_v23 = vpop.eup %1641 }
 0x135   :  { %v75_v24 = vmul.f32 %v1642_v23, %v59_v6 }
 0x137   :  { %v83_v28 = vmul.f32 %v1399_v25, %v75_v24 }
 0x138   :  { %v1644_v26 = vpop.eup %1643 }
 0x139   :  { %v76_v27 = vmul.f32 %v1644_v26, %v60_v10  ;;  %v91_v31 = vadd.f32 %v1400_v29, %v83_v28 }
 0x13b   :  { %v84_v30 = vmul.f32 %v1399_v25, %v76_v27 }
 0x13d   :  { %v92_v32 = vadd.f32 %v1400_v29, %v84_v30 }
 0x13f   :  { %v93_v33 = vpack.c.bf16 %v92_v32, %v91_v31 }
 0x141   :  { %1488 = vmatmul.mubr.msk.bf16.vlgmr.msra.gmra.mrb[0].mxu0 %vm49_vm0, %v93_v33 }
 0x142   :  { %1499 = vmatprep.mubr.msk.bf16.mxu0 %vm1686_vm1, %v1685_v15 }
 0x214   :  { %v154_v35 = vpop.f32.mrb[0].mxu0 }
 0x215   :  { %v155_v36 = vadd.f32 %v1401_v34, %v154_v35  ;;  %v1489_v37 = vpop.f32.mrb[1].mxu0 }
 0x216   :  { %v157_v38 = vpop.f32.mrb[2].mxu0 }
 0x217   :  { %v1815_v39 = vpack.c.bf16 %v155_v36, %v155_v36  ;;  %v1490_v40 = vpop.f32.mrb[3].mxu0  ;;  %v158_v41 = vadd.f32 %v1401_v34, %v157_v38 }
 0x219   :  { %279 = vrot.lane.b32.xlu1 %v1815_v39, %s1687_s1  ;;  %163 = vrot.lane.b32.xlu0 %v1815_v39, %s1688_s2  ;;  %v1823_v42 = vpack.c.bf16 %v158_v41, %v158_v41 }
 0x21d   :  { %277 = vrot.lane.b32.xlu1 %v1815_v39, %s1689_s20  ;;  %396 = vrot.lane.b32.xlu0 %v1815_v39, %s1690_s21 }
 0x221   :  { %398 = vrot.lane.b32.xlu1 %v1815_v39, %s1691_s4  ;;  %515 = vrot.lane.b32.xlu0 %v1815_v39, %s1692_s22 }
 0x225   :  { %517 = vrot.lane.b32.xlu1 %v1815_v39, %s1693_s23  ;;  %750 = vrot.lane.b32.xlu0 %v1823_v42, %s1687_s1 }
 0x229   :  { %868 = vrot.lane.b32.xlu0 %v1823_v42, %s1691_s4  ;;  %636 = vrot.lane.b32.xlu1 %v1823_v42, %s1688_s2 }
 0x22d   :  { %986 = vrot.lane.b32.xlu0 %v1823_v42, %s1693_s23  ;;  %748 = vrot.lane.b32.xlu1 %v1823_v42, %s1689_s20 }
 0x231   :  { %225 = vrot.lane.b32.xlu0 %v1815_v39, %s1694_s24  ;;  %866 = vrot.lane.b32.xlu1 %v1823_v42, %s1690_s21 }
 0x235   :  { %459 = vrot.lane.b32.xlu0 %v1815_v39, %s1695_s25  ;;  %984 = vrot.lane.b32.xlu1 %v1823_v42, %s1692_s22 }
 0x239   :  { %340 = vrot.lane.b32.xlu1 %v1815_v39, %s1696_s26 }
 0x28b   :  { %v164_v43 = vpop.permute.xlu0 %163  ;;  %v280_v45 = vpop.permute.xlu1 %279 }
 0x28c   :  { %v170_v44 = vsel %vm165_vm2, %v164_v43, 0  ;;  %v285_v49 = vsel %vm165_vm2, %v280_v45, 0 }
 0x28d   :  { %1492 = vmatpush3.bf16.xpose.msra.mxu1 %v170_v44 }
 0x28e   :  { %1503 = vmatprep.subr.bf16.mxu1 %v1685_v15 }
 0x28f   :  { %v397_v46 = vpop.permute.xlu0 %396  ;;  %v278_v47 = vpop.permute.xlu1 %277 }
 0x293   :  { %v516_v48 = vpop.permute.xlu0 %515  ;;  %v399_v51 = vpop.permute.xlu1 %398 }
 0x294   :  { %1494 = vmatmul.mubr.msk.bf16.vlgmr.msra.gmra.mrb[0].mxu1 %vm165_vm2, %v1815_v39  ;;  %v404_v53 = vsel %vm165_vm2, %v399_v51, 0 }
 0x295   :  { %1504 = vmatpush3.bf16.xpose.msra.mxu1 %v285_v49  ;;  %1505 = vmatprep.mubr.msk.bf16.mxu1 %vm1686_vm1, %v1685_v15 }
 0x296   :  { %1515 = vmatprep.subr.bf16.mxu1 %v1685_v15 }
 0x297   :  { %v751_v50 = vpop.permute.xlu0 %750  ;;  %v518_v55 = vpop.permute.xlu1 %517 }
 0x298   :  { %v523_v57 = vsel %vm165_vm2, %v518_v55, 0  ;;  %v756_v61 = vsel %vm165_vm2, %v751_v50, 0 }
 0x29b   :  { %v869_v52 = vpop.permute.xlu0 %868  ;;  %v637_v59 = vpop.permute.xlu1 %636 }
 0x29c   :  { %1506 = vmatmul.mubr.msk.bf16.vlgmr.msra.gmra.mrb[4].mxu1 %vm165_vm2, %v278_v47  ;;  %v642_v60 = vsel %vm165_vm2, %v637_v59, 0  ;;  %v874_v63 = vsel %vm165_vm2, %v869_v52, 0 }
 0x29d   :  { %1516 = vmatpush3.bf16.xpose.msra.mxu1 %v404_v53  ;;  %1517 = vmatprep.mubr.msk.bf16.mxu1 %vm1686_vm1, %v1685_v15 }
 0x29e   :  { %1527 = vmatprep.subr.bf16.mxu1 %v1685_v15 }
 0x29f   :  { %v987_v54 = vpop.permute.xlu0 %986  ;;  %v749_v62 = vpop.permute.xlu1 %748 }
 0x2a0   :  { %v992_v3 = vsel %vm165_vm2, %v987_v54, 0 }
 0x2a3   :  { %v226_v56 = vpop.permute.xlu0 %225  ;;  %v867_v2 = vpop.permute.xlu1 %866 }
 0x2a4   :  { %v232_v58 = vsel %vm230_vm3, %v226_v56, 0  ;;  %1518 = vmatmul.mubr.msk.bf16.vlgmr.msra.gmra.mrb[8].mxu1 %vm165_vm2, %v397_v46 }
 0x2a5   :  { %1498 = vmatpush3.bf16.msra.mxu0 %v232_v58  ;;  %1528 = vmatpush3.bf16.xpose.msra.mxu1 %v523_v57 }
 0x2a6   :  { %1529 = vmatprep.mubr.msk.bf16.mxu1 %vm1686_vm1, %v1685_v15  ;;  %1539 = vmatprep.subr.bf16.mxu1 %v1685_v15 }
 0x2a7   :  { %1509 = vmatprep.subr.bf16.mxu0 %v1685_v15  ;;  %v985_v4 = vpop.permute.xlu1 %984  ;;  %v460_v55 = vpop.permute.xlu0 %459 }
 0x2ab   :  { %v341_v59 = vpop.permute.xlu1 %340 }
 0x2ac   :  { %1530 = vmatmul.mubr.msk.bf16.vlgmr.msra.gmra.mrb[12].mxu1 %vm165_vm2, %v516_v48 }
 0x2ad   :  { %1540 = vmatpush3.bf16.xpose.msra.mxu1 %v642_v60  ;;  %1541 = vmatprep.mubr.msk.bf16.mxu1 %vm1686_vm1, %v1685_v15 }
 0x2ae   :  { %1551 = vmatprep.subr.bf16.mxu1 %v1685_v15 }
 0x2b4   :  { %1542 = vmatmul.mubr.msk.bf16.vlgmr.msra.gmra.mrb[16].mxu1 %vm165_vm2, %v1823_v42 }
 0x2b5   :  { %1552 = vmatpush3.bf16.xpose.msra.mxu1 %v756_v61  ;;  %1553 = vmatprep.mubr.msk.bf16.mxu1 %vm1686_vm1, %v1685_v15 }
 0x2b6   :  { %1563 = vmatprep.subr.bf16.mxu1 %v1685_v15 }
 0x2bc   :  { %1554 = vmatmul.mubr.msk.bf16.vlgmr.msra.gmra.mrb[20].mxu1 %vm165_vm2, %v749_v62 }
 0x2bd   :  { %1564 = vmatpush3.bf16.xpose.msra.mxu1 %v874_v63  ;;  %1565 = vmatprep.mubr.msk.bf16.mxu1 %vm1686_vm1, %v1685_v15 }
 0x2be   :  { %1575 = vmatprep.subr.bf16.mxu1 %v1685_v15 }
 0x2c4   :  { %1566 = vmatmul.mubr.msk.bf16.vlgmr.msra.gmra.mrb[24].mxu1 %vm165_vm2, %v867_v2 }
 0x2c5   :  { %1576 = vmatpush3.bf16.xpose.msra.mxu1 %v992_v3  ;;  %1577 = vmatprep.mubr.msk.bf16.mxu1 %vm1686_vm1, %v1685_v15 }
 0x2c6   :  { %1587 = vmatprep.subr.bf16.mxu1 %v1685_v15 }
 0x2cc   :  { %1578 = vmatmul.mubr.msk.bf16.vlgmr.msra.gmra.mrb[28].mxu1 %vm165_vm2, %v985_v4 }
 0x2cd   :  { %1591 = vmatprep.mubr.msk.bf16.mxu1 %vm1686_vm1, %v1685_v15 }
 0x367   :  { %v206_v5 = vpop.f32.mrb[0].mxu1 }
 0x368   :  { %v1883_v6 = vmul.f32 0.35355338, %v206_v5  ;;  %v1495_v7 = vpop.f32.mrb[1].mxu1 }
 0x369   :  { %v209_v8 = vpop.f32.mrb[2].mxu1  ;;  %v346_v7 = vsel %vm230_vm3, %v341_v59, 0 }
 0x36a   :  { %v1496_v9 = vpop.f32.mrb[3].mxu1  ;;  %v213_v10 = vsel %vm165_vm2, %v1883_v6, -inf }
 0x36b   :  { %214 = vmax.xlane.f32.xlu0 %v213_v10 }
 0x36f   :  { %v321_v11 = vpop.f32.mrb[4].mxu1 }
 0x370   :  { %v327_v12 = vmul.f32 0.35355338, %v321_v11  ;;  %v1507_v13 = vpop.f32.mrb[5].mxu1  ;;  %v465_v11 = vsel %vm230_vm3, %v460_v55, 0 }
 0x371   :  { %v324_v14 = vpop.f32.mrb[6].mxu1 }
 0x372   :  { %v1508_v16 = vpop.f32.mrb[7].mxu1  ;;  %v328_v17 = vsel %vm165_vm2, %v327_v12, -inf }
 0x373   :  { %329 = vmax.xlane.f32.xlu1 %v328_v17 }
 0x377   :  { %v440_v18 = vpop.f32.mrb[8].mxu1 }
 0x378   :  { %v446_v19 = vmul.f32 0.35355338, %v440_v18  ;;  %v1519_v20 = vpop.f32.mrb[9].mxu1 }
 0x379   :  { %v443_v21 = vpop.f32.mrb[10].mxu1 }
 0x37a   :  { %v1520_v22 = vpop.f32.mrb[11].mxu1  ;;  %v447_v23 = vsel %vm165_vm2, %v446_v19, -inf }
 0x37b   :  { %448 = vmax.xlane.f32.xlu0 %v447_v23 }
 0x37f   :  { %v559_v24 = vpop.f32.mrb[12].mxu1 }
 0x380   :  { %v1889_v25 = vmul.f32 0.35355338, %v559_v24  ;;  %v1531_v26 = vpop.f32.mrb[13].mxu1 }
 0x381   :  { %v562_v27 = vpop.f32.mrb[14].mxu1 }
 0x382   :  { %v1532_v28 = vpop.f32.mrb[15].mxu1  ;;  %v566_v29 = vsel %vm165_vm2, %v1889_v25, -inf }
 0x383   :  { %567 = vmax.xlane.f32.xlu0 %v566_v29 }
 0x384   :  { %697 = vrot.lane.b32.xlu1 %v1823_v42, %s1694_s24 }
 0x387   :  { %v678_v30 = vpop.f32.mrb[16].mxu1 }
 0x388   :  { %v1543_v31 = vpop.f32.mrb[17].mxu1  ;;  %v1896_v48 = vmul.f32 0.35355338, %v678_v30 }
 0x389   :  { %v681_v32 = vpop.f32.mrb[18].mxu1 }
 0x38a   :  { %v1544_v33 = vpop.f32.mrb[19].mxu1  ;;  %v685_v50 = vsel %vm165_vm2, %v1896_v48, -inf }
 0x38f   :  { %v792_v34 = vpop.f32.mrb[20].mxu1 }
 0x390   :  { %v1555_v35 = vpop.f32.mrb[21].mxu1  ;;  %v1898_v49 = vmul.f32 0.35355338, %v792_v34 }
 0x391   :  { %v795_v36 = vpop.f32.mrb[22].mxu1 }
 0x392   :  { %v1556_v37 = vpop.f32.mrb[23].mxu1  ;;  %v799_v51 = vsel %vm165_vm2, %v1898_v49, -inf }
 0x397   :  { %v910_v38 = vpop.f32.mrb[24].mxu1 }
 0x398   :  { %v1567_v40 = vpop.f32.mrb[25].mxu1  ;;  %v1904_v52 = vmul.f32 0.35355338, %v910_v38 }
 0x399   :  { %578 = vrot.lane.b32.xlu0 %v1815_v39, %s1697_s27  ;;  %v913_v41 = vpop.f32.mrb[26].mxu1 }
 0x39a   :  { %v1568_v43 = vpop.f32.mrb[27].mxu1  ;;  %v917_v39 = vsel %vm165_vm2, %v1904_v52, -inf }
 0x39f   :  { %v1028_v44 = vpop.f32.mrb[28].mxu1 }
 0x3a0   :  { %v1579_v45 = vpop.f32.mrb[29].mxu1  ;;  %v1912_v53 = vmul.f32 0.35355338, %v1028_v44 }
 0x3a1   :  { %v1031_v46 = vpop.f32.mrb[30].mxu1 }
 0x3a2   :  { %v1580_v47 = vpop.f32.mrb[31].mxu1  ;;  %v1035_v54 = vsel %vm165_vm2, %v1912_v53, -inf }
 0x3a8   :  { %686 = vmax.xlane.f32.xlu1 %v685_v50 }
 0x3ac   :  { %800 = vmax.xlane.f32.xlu1 %v799_v51 }
 0x3b8   :  { %918 = vmax.xlane.f32.xlu0 %v917_v39 }
 0x3bd   :  { %811 = vrot.lane.b32.xlu1 %v1823_v42, %s1696_s26 }
 0x3ce   :  { %929 = vrot.lane.b32.xlu0 %v1823_v42, %s1695_s25 }
 0x3e1   :  { %1036 = vmax.xlane.f32.xlu1 %v1035_v54 }
 0x3f2   :  { %1047 = vrot.lane.b32.xlu1 %v1823_v42, %s1697_s27 }
 0x3f8   :  { %v215_v56 = vpop.xlane.xlu0 %214 }
 0x3f9   :  { %v216_v57 = vsub.f32 %v1883_v6, %v215_v56 }
 0x3fb   :  { %v217_v58 = vpack.c.bf16 %v216_v57, %v216_v57 }
 0x3fd   :  { %v219_v60 = vmul.bf16 1069105081, %v217_v58 }
 0x3ff   :  { %1645 = vpow.bf16 %v219_v60 }
 0x400   :  { %v330_v61 = vpop.xlane.xlu1 %329 }
 0x401   :  { %v331_v62 = vsub.f32 %v327_v12, %v330_v61 }
 0x403   :  { %v332_v63 = vpack.c.bf16 %v331_v62, %v331_v62 }
 0x404   :  { %v698_v22 = vpop.permute.xlu1 %697 }
 0x405   :  { %v334_v2 = vmul.bf16 1069105081, %v332_v63  ;;  %v703_v24 = vsel %vm230_vm3, %v698_v22, 0 }
 0x407   :  { %1647 = vpow.bf16 %v334_v2 }
 0x408   :  { %v449_v3 = vpop.xlane.xlu0 %448 }
 0x409   :  { %v450_v4 = vsub.f32 %v446_v19, %v449_v3 }
 0x40a   :  { %v1918_v5 = vpop.eup %1645 }
 0x40b   :  { %v451_v42 = vpack.c.bf16 %v450_v4, %v450_v4  ;;  %1500 = vmatmul.mubr.msk.bf16.vlgmr.msra.gmra.mrb[4].mxu0 %vm165_vm2, %v1918_v5 }
 0x40c   :  { %1510 = vmatpush3.bf16.msra.mxu0 %v346_v7  ;;  %1511 = vmatprep.mubr.msk.bf16.mxu0 %vm1686_vm1, %v1685_v15 }
 0x40d   :  { %v453_v6 = vmul.bf16 1069105081, %v451_v42  ;;  %1521 = vmatprep.subr.bf16.mxu0 %v1685_v15 }
 0x40f   :  { %1649 = vpow.bf16 %v453_v6 }
 0x410   :  { %v568_v8 = vpop.xlane.xlu0 %567 }
 0x411   :  { %v569_v9 = vsub.f32 %v1889_v25, %v568_v8 }
 0x412   :  { %v1648_v10 = vpop.eup %1647 }
 0x413   :  { %v570_v12 = vpack.c.bf16 %v569_v9, %v569_v9  ;;  %1512 = vmatmul.mubr.msk.bf16.vlgmr.msra.gmra.mrb[8].mxu0 %vm165_vm2, %v1648_v10  ;;  %v336_v13 = vunpack.c.l.bf16 %v1648_v10 }
 0x414   :  { %1522 = vmatpush3.bf16.msra.mxu0 %v465_v11  ;;  %1523 = vmatprep.mubr.msk.bf16.mxu0 %vm1686_vm1, %v1685_v15  ;;  %v579_v17 = vpop.permute.xlu0 %578 }
 0x415   :  { %v572_v14 = vmul.bf16 1069105081, %v570_v12  ;;  %v337_v16 = vsel %vm165_vm2, %v336_v13, 0.0  ;;  %1533 = vmatprep.subr.bf16.mxu0 %v1685_v15  ;;  %v584_v19 = vsel %vm230_vm3, %v579_v17, 0 }
 0x416   :  { %338 = vadd.xlane.f32.xlu0 %v337_v16 }
 0x417   :  { %1651 = vpow.bf16 %v572_v14 }
 0x41a   :  { %v1650_v18 = vpop.eup %1649 }
 0x41b   :  { %1524 = vmatmul.mubr.msk.bf16.vlgmr.msra.gmra.mrb[12].mxu0 %vm165_vm2, %v1650_v18  ;;  %v455_v20 = vunpack.c.l.bf16 %v1650_v18 }
 0x41c   :  { %1534 = vmatpush3.bf16.msra.mxu0 %v584_v19  ;;  %1535 = vmatprep.mubr.msk.bf16.mxu0 %vm1686_vm1, %v1685_v15 }
 0x41d   :  { %v456_v21 = vsel %vm165_vm2, %v455_v20, 0.0  ;;  %1545 = vmatprep.subr.bf16.mxu0 %v1685_v15 }
 0x41e   :  { %457 = vadd.xlane.f32.xlu0 %v456_v21 }
 0x422   :  { %v1652_v23 = vpop.eup %1651 }
 0x423   :  { %1536 = vmatmul.mubr.msk.bf16.vlgmr.msra.gmra.mrb[16].mxu0 %vm165_vm2, %v1652_v23  ;;  %v574_v50 = vunpack.c.l.bf16 %v1652_v23 }
 0x424   :  { %1546 = vmatpush3.bf16.msra.mxu0 %v703_v24  ;;  %1547 = vmatprep.mubr.msk.bf16.mxu0 %vm1686_vm1, %v1685_v15 }
 0x425   :  { %1557 = vmatprep.subr.bf16.mxu0 %v1685_v15  ;;  %v575_v51 = vsel %vm165_vm2, %v574_v50, 0.0 }
 0x435   :  { %v687_v25 = vpop.xlane.xlu1 %686 }
 0x436   :  { %v688_v26 = vsub.f32 %v1896_v48, %v687_v25 }
 0x438   :  { %v689_v27 = vpack.c.bf16 %v688_v26, %v688_v26 }
 0x439   :  { %v801_v28 = vpop.xlane.xlu1 %800 }
 0x43a   :  { %v691_v29 = vmul.bf16 1069105081, %v689_v27  ;;  %v802_v30 = vsub.f32 %v1898_v49, %v801_v28 }
 0x43c   :  { %1653 = vpow.bf16 %v691_v29  ;;  %v803_v31 = vpack.c.bf16 %v802_v30, %v802_v30 }
 0x43d   :  { %v812_v33 = vpop.permute.xlu1 %811 }
 0x43e   :  { %v805_v32 = vmul.bf16 1069105081, %v803_v31  ;;  %v817_v37 = vsel %vm230_vm3, %v812_v33, 0 }
 0x440   :  { %1655 = vpow.bf16 %v805_v32 }
 0x445   :  { %v919_v34 = vpop.xlane.xlu0 %918 }
 0x446   :  { %v920_v35 = vsub.f32 %v1904_v52, %v919_v34  ;;  %v221_v52 = vunpack.c.l.bf16 %v1918_v5 }
 0x447   :  { %v1654_v36 = vpop.eup %1653 }
 0x448   :  { %v921_v38 = vpack.c.bf16 %v920_v35, %v920_v35  ;;  %1548 = vmatmul.mubr.msk.bf16.vlgmr.msra.gmra.mrb[20].mxu0 %vm165_vm2, %v1654_v36  ;;  %v222_v39 = vsel %vm165_vm2, %v221_v52, 0.0  ;;  %v693_v63 = vunpack.c.l.bf16 %v1654_v36 }
 0x449   :  { %1558 = vmatpush3.bf16.msra.mxu0 %v817_v37  ;;  %1559 = vmatprep.mubr.msk.bf16.mxu0 %vm1686_vm1, %v1685_v15  ;;  %v930_v44 = vpop.permute.xlu0 %929 }
 0x44a   :  { %v923_v40 = vmul.bf16 1069105081, %v921_v38  ;;  %1569 = vmatprep.subr.bf16.mxu0 %v1685_v15  ;;  %v935_v46 = vsel %vm230_vm3, %v930_v44, 0 }
 0x44b   :  { %v1656_v41 = vpop.eup %1655 }
 0x44c   :  { %1657 = vpow.bf16 %v923_v40  ;;  %v807_v43 = vunpack.c.l.bf16 %v1656_v41 }
 0x44e   :  { %v808_v45 = vsel %vm165_vm2, %v807_v43, 0.0 }
 0x44f   :  { %809 = vadd.xlane.f32.xlu1 %v808_v45 }
 0x450   :  { %1560 = vmatmul.mubr.msk.bf16.vlgmr.msra.gmra.mrb[24].mxu0 %vm165_vm2, %v1656_v41 }
 0x451   :  { %1570 = vmatpush3.bf16.msra.mxu0 %v935_v46  ;;  %1571 = vmatprep.mubr.msk.bf16.mxu0 %vm1686_vm1, %v1685_v15 }
 0x452   :  { %1581 = vmatprep.subr.bf16.mxu0 %v1685_v15 }
 0x457   :  { %v1658_v47 = vpop.eup %1657 }
 0x458   :  { %1572 = vmatmul.mubr.msk.bf16.vlgmr.msra.gmra.mrb[28].mxu0 %vm165_vm2, %v1658_v47  ;;  %v925_v48 = vunpack.c.l.bf16 %v1658_v47 }
 0x459   :  { %1583 = vmatprep.mubr.msk.bf16.mxu0 %vm1686_vm1, %v1685_v15 }
 0x45a   :  { %v926_v49 = vsel %vm165_vm2, %v925_v48, 0.0 }
 0x45b   :  { %927 = vadd.xlane.f32.xlu0 %v926_v49 }
 0x45f   :  { %576 = vadd.xlane.f32.xlu0 %v575_v51 }
 0x463   :  { %223 = vadd.xlane.f32.xlu0 %v222_v39 }
 0x46e   :  { %v1037_v54 = vpop.xlane.xlu1 %1036 }
 0x46f   :  { %v1038_v55 = vsub.f32 %v1912_v53, %v1037_v54  ;;  %v694_v53 = vsel %vm165_vm2, %v693_v63, 0.0  ;;  %v1633_v54 = vld [vmem:[%s2059_s5] sm:$0xff]  }
 0x470   :  { %1588 = vmatpush3.bf16.msra.mxu1 %v1633_v54 }
 0x471   :  { %v1039_v56 = vpack.c.bf16 %v1038_v55, %v1038_v55  ;;  %v1634_v55 = vld [vmem:[%s2059_s5 + $0x8] sm:$0xff]   ;;  %1589 = vmatprep.subr.bf16.mxu1 %v1685_v15 }
 0x472   :  { %v1048_v57 = vpop.permute.xlu1 %1047 }
 0x473   :  { %v1041_v58 = vmul.bf16 1069105081, %v1039_v56  ;;  %v1053_v59 = vsel %vm230_vm3, %v1048_v57, 0 }
 0x474   :  { %1582 = vmatpush3.bf16.msra.mxu0 %v1053_v59  ;;  %1590 = vmatpush3.bf16.msra.mxu1 %v1634_v55 }
 0x475   :  { %1659 = vpow.bf16 %v1041_v58  ;;  %1595 = vmatprep.subr.bf16.mxu0 %v1685_v15  ;;  %1603 = vmatprep.subr.bf16.mxu1 %v1685_v15 }
 0x480   :  { %v1660_v60 = vpop.eup %1659 }
 0x481   :  { %1584 = vmatmul.mubr.msk.bf16.vlgmr.msra.gmra.mrb[32].mxu0 %vm165_vm2, %v1660_v60  ;;  %v1043_v61 = vunpack.c.l.bf16 %v1660_v60 }
 0x482   :  { %1599 = vmatprep.mubr.msk.bf16.mxu0 %vm1686_vm1, %v1685_v15 }
 0x483   :  { %v1044_v62 = vsel %vm165_vm2, %v1043_v61, 0.0 }
 0x484   :  { %1045 = vadd.xlane.f32.xlu1 %v1044_v62 }
 0x488   :  { %695 = vadd.xlane.f32.xlu1 %v694_v53 }
 0x4a3   :  { %v339_v2 = vpop.xlane.xlu0 %338 }
 0x4a4   :  { %1661 = vrcp.f32 %v339_v2 }
 0x4ab   :  { %v458_v7 = vpop.xlane.xlu0 %457 }
 0x4ac   :  { %1663 = vrcp.f32 %v458_v7 }
 0x4ae   :  { %v1662_v6 = vpop.eup %1661 }
 0x4b6   :  { %v1664_v16 = vpop.eup %1663 }
 0x4dc   :  { %v810_v31 = vpop.xlane.xlu1 %809 }
 0x4de   :  { %v268_v3 = vpop.f32.mrb[4].mxu0 }
 0x4df   :  { %v1501_v4 = vpop.f32.mrb[5].mxu0 }
 0x4e0   :  { %v271_v5 = vpop.f32.mrb[6].mxu0 }
 0x4e1   :  { %v1502_v42 = vpop.f32.mrb[7].mxu0 }
 0x4e6   :  { %v382_v8 = vpop.f32.mrb[8].mxu0 }
 0x4e7   :  { %v389_v9 = vmul.f32 %v1662_v6, %v382_v8  ;;  %v1513_v10 = vpop.f32.mrb[9].mxu0  ;;  %v1424_v8 = vld [vmem:[%s2060_s6] ss:$0 sm:$0xff] }
 0x4e8   :  { %v928_v11 = vpop.xlane.xlu0 %927  ;;  %v385_v12 = vpop.f32.mrb[10].mxu0 }
 0x4e9   :  { %391 = vrot.lane.b32.xlu0 %v389_v9, %s1698_s28  ;;  %v1514_v13 = vpop.f32.mrb[11].mxu0 }
 0x4ec   :  { %v577_v14 = vpop.xlane.xlu0 %576 }
 0x4ed   :  { %1665 = vrcp.f32 %v577_v14 }
 0x4ee   :  { %v501_v17 = vpop.f32.mrb[12].mxu0 }
 0x4ef   :  { %v508_v18 = vmul.f32 %v1664_v16, %v501_v17  ;;  %v1525_v19 = vpop.f32.mrb[13].mxu0 }
 0x4f0   :  { %v224_v20 = vpop.xlane.xlu0 %223  ;;  %v504_v21 = vpop.f32.mrb[14].mxu0 }
 0x4f1   :  { %1667 = vrcp.f32 %v224_v20  ;;  %510 = vrot.lane.b32.xlu1 %v508_v18, %s1699_s0  ;;  %v1526_v22 = vpop.f32.mrb[15].mxu0 }
 0x4f6   :  { %v620_v23 = vpop.f32.mrb[16].mxu0 }
 0x4f7   :  { %v1666_v24 = vpop.eup %1665  ;;  %v1537_v25 = vpop.f32.mrb[17].mxu0 }
 0x4f8   :  { %v627_v26 = vmul.f32 %v1666_v24, %v620_v23  ;;  %v623_v27 = vpop.f32.mrb[18].mxu0 }
 0x4f9   :  { %v1538_v28 = vpop.f32.mrb[19].mxu0  ;;  %v1635_v27 = vld [vmem:[%s2061_s9] sm:$0xff]  }
 0x4fa   :  { %629 = vrot.lane.b32.xlu0 %v627_v26, %s1700_s29  ;;  %1596 = vmatpush3.bf16.msra.mxu0 %v1635_v27  ;;  %v1636_v28 = vld [vmem:[%s2061_s9 + $0x8] sm:$0xff]  }
 0x4fb   :  { %v1668_v29 = vpop.eup %1667  ;;  %1597 = vmatprep.subr.bf16.mxu0 %v1685_v15 }
 0x4fc   :  { %v275_v30 = vmul.f32 %v1668_v29, %v268_v3 }
 0x4fe   :  { %276 = vst.msk [vmem:[#allocation2] sm:$0xff] %vm165_vm2, %v275_v30  ;;  %1598 = vmatpush3.bf16.msra.mxu0 %v1636_v28 }
 0x511   :  { %v1046_v32 = vpop.xlane.xlu1 %1045 }
 0x515   :  { %v696_v33 = vpop.xlane.xlu1 %695 }
 0x516   :  { %1669 = vrcp.f32 %v696_v33 }
 0x517   :  { %1671 = vrcp.f32 %v810_v31 }
 0x518   :  { %1673 = vrcp.f32 %v928_v11 }
 0x519   :  { %1675 = vrcp.f32 %v1046_v32 }
 0x51b   :  { %v739_v34 = vpop.f32.mrb[20].mxu0 }
 0x51c   :  { %v1549_v35 = vpop.f32.mrb[21].mxu0 }
 0x51d   :  { %v742_v36 = vpop.f32.mrb[22].mxu0 }
 0x51e   :  { %v1550_v37 = vpop.f32.mrb[23].mxu0 }
 0x51f   :  { %v1425_v37 = vld [vmem:[%s2062_s7] ss:$0 sm:$0xff] }
 0x520   :  { %v1670_v38 = vpop.eup %1669 }
 0x521   :  { %v746_v40 = vmul.f32 %v1670_v38, %v739_v34  ;;  %v1672_v41 = vpop.eup %1671 }
 0x522   :  { %v1674_v48 = vpop.eup %1673 }
 0x523   :  { %747 = vst.msk [vmem:[#allocation2 + $0x8] sm:$0xff] %vm165_vm2, %v746_v40  ;;  %v853_v43 = vpop.f32.mrb[24].mxu0  ;;  %v1676_v56 = vpop.eup %1675 }
 0x524   :  { %v860_v44 = vmul.f32 %v1672_v41, %v853_v43  ;;  %v1561_v45 = vpop.f32.mrb[25].mxu0  ;;  %v1426_v43 = vld [vmem:[%s2063_s8] ss:$0 sm:$0xff] }
 0x525   :  { %v856_v46 = vpop.f32.mrb[26].mxu0 }
 0x526   :  { %862 = vrot.lane.b32.xlu1 %v860_v44, %s1698_s28  ;;  %v1562_v47 = vpop.f32.mrb[27].mxu0 }
 0x52b   :  { %v971_v49 = vpop.f32.mrb[28].mxu0 }
 0x52c   :  { %v978_v50 = vmul.f32 %v1674_v48, %v971_v49  ;;  %v1573_v51 = vpop.f32.mrb[29].mxu0  ;;  %v1637_v48 = vld [vmem:[%s2064_s11] sm:$0xff]   ;;  %v1638_v49 = vld [vmem:[%s2064_s11 + $0x8] sm:$0xff]  }
 0x52d   :  { %v974_v52 = vpop.f32.mrb[30].mxu0  ;;  %v1640_v51 = vld [vmem:[%s2064_s11 + $0x18] sm:$0xff]  }
 0x52e   :  { %980 = vrot.lane.b32.xlu1 %v978_v50, %s1699_s0  ;;  %v1574_v39 = vpop.f32.mrb[31].mxu0  ;;  %v1639_v50 = vld [vmem:[%s2064_s11 + $0x10] sm:$0xff]   ;;  %v1427_v52 = vld [vmem:[%s2065_s10] ss:$0 sm:$0xff] }
 0x554   :  { %v1089_v57 = vpop.f32.mrb[32].mxu0 }
 0x555   :  { %v1096_v58 = vmul.f32 %v1676_v56, %v1089_v57  ;;  %v1585_v59 = vpop.f32.mrb[33].mxu0 }
 0x556   :  { %v1092_v60 = vpop.f32.mrb[34].mxu0 }
 0x557   :  { %1098 = vrot.lane.b32.xlu1 %v1096_v58, %s1700_s29  ;;  %v1586_v61 = vpop.f32.mrb[35].mxu0 }
 0x55b   :  { %v392_v62 = vpop.permute.xlu0 %391 }
 0x55c   :  { %395 = vst.msk [vmem:[#allocation2] sm:$0xff] %vm394_vm4, %v392_v62 }
 0x563   :  { %v511_v63 = vpop.permute.xlu1 %510 }
 0x564   :  { %514 = vst.msk [vmem:[#allocation2] sm:$0xff] %vm513_vm5, %v511_v63 }
 0x56c   :  { %v630_v53 = vpop.permute.xlu0 %629 }
 0x56d   :  { %633 = vst.msk [vmem:[#allocation2] sm:$0xff] %vm632_vm6, %v630_v53 }
 0x574   :  { %v1102_v5 = vld [vmem:[#allocation2] sm:$0xff] }
 0x598   :  { %v863_v2 = vpop.permute.xlu1 %862 }
 0x599   :  { %865 = vst.msk [vmem:[#allocation2 + $0x8] sm:$0xff] %vm394_vm4, %v863_v2 }
 0x5a0   :  { %v981_v3 = vpop.permute.xlu1 %980 }
 0x5a1   :  { %983 = vst.msk [vmem:[#allocation2 + $0x8] sm:$0xff] %vm513_vm5, %v981_v3 }
 0x5c9   :  { %v1099_v4 = vpop.permute.xlu1 %1098 }
 0x5ca   :  { %1101 = vst.msk [vmem:[#allocation2 + $0x8] sm:$0xff] %vm632_vm6, %v1099_v4 }
 0x5d1   :  { %v1103_v7 = vld [vmem:[#allocation2 + $0x8] sm:$0xff] }
 0x5d2   :  { %v1104_v42 = vpack.c.bf16 %v1103_v7, %v1102_v5 }
 0x5d4   :  { %1592 = vmatmul.mubr.msk.bf16.vlgmr.msra.gmra.mrb[32].mxu1 %vm49_vm0, %v1104_v42 }
 0x5d5   :  { %1611 = vmatprep.mubr.msk.bf16.mxu1 %vm1686_vm1, %v1685_v15  ;;  %1604 = vmatpush3.bf16.msra.mxu1 %v1637_v48 }
 0x5d6   :  { %1605 = vmatprep.subr.bf16.mxu1 %v1685_v15 }
 0x5d9   :  { %1606 = vmatpush3.bf16.msra.mxu1 %v1638_v49 }
 0x5da   :  { %1607 = vmatprep.subr.bf16.mxu1 %v1685_v15 }
 0x5dd   :  { %1608 = vmatpush3.bf16.msra.mxu1 %v1639_v50 }
 0x5de   :  { %1609 = vmatprep.subr.bf16.mxu1 %v1685_v15 }
 0x5e1   :  { %1610 = vmatpush3.bf16.msra.mxu1 %v1640_v51 }
 0x6a7   :  { %v1158_v6 = vpop.f32.mrb[32].mxu1 }
 0x6a8   :  { %v1165_v9 = vadd.f32 %v1158_v6, %v1774_v0  ;;  %v1593_v10 = vpop.f32.mrb[33].mxu1 }
 0x6a9   :  { %v1161_v11 = vpop.f32.mrb[34].mxu1 }
 0x6aa   :  { %v1996_v12 = vadd.f32 %v1424_v8, %v1165_v9  ;;  %v1166_v13 = vadd.f32 %v1161_v11, %v1779_v1  ;;  %v1594_v14 = vpop.f32.mrb[35].mxu1 }
 0x6ab   :  { %v1431_v14 = vld [vmem:[%s2066_s12] ss:$0 sm:$0xff] }
 0x6ac   :  { %v1999_v16 = vadd.f32 %v1424_v8, %v1166_v13  ;;  %v1178_v17 = vsel %vm49_vm0, %v1996_v12, 0.0 }
 0x6ad   :  { %1179 = vadd.xlane.f32.xlu0 %v1178_v17 }
 0x6ae   :  { %v1181_v18 = vsel %vm49_vm0, %v1999_v16, 0.0 }
 0x6af   :  { %1182 = vadd.xlane.f32.xlu1 %v1181_v18 }
 0x73a   :  { %v1180_v19 = vpop.xlane.xlu0 %1179 }
 0x73b   :  { %v1184_v20 = vmul.f32 0.03125, %v1180_v19 }
 0x73c   :  { %v1183_v0 = vpop.xlane.xlu1 %1182 }
 0x73d   :  { %v1186_v21 = vsub.f32 %v1996_v12, %v1184_v20  ;;  %v1185_v22 = vmul.f32 0.03125, %v1183_v0 }
 0x73f   :  { %v1187_v23 = vsub.f32 %v1999_v16, %v1185_v22  ;;  %v1188_v1 = vmul.f32 %v1186_v21, %v1186_v21 }
 0x741   :  { %v1190_v24 = vsel %vm49_vm0, %v1188_v1, 0.0  ;;  %v1189_v25 = vmul.f32 %v1187_v23, %v1187_v23 }
 0x742   :  { %1191 = vadd.xlane.f32.xlu0 %v1190_v24 }
 0x743   :  { %v1193_v26 = vsel %vm49_vm0, %v1189_v25, 0.0 }
 0x746   :  { %1194 = vadd.xlane.f32.xlu0 %v1193_v26 }
 0x7cf   :  { %v1192_v29 = vpop.xlane.xlu0 %1191 }
 0x7d0   :  { %v1196_v30 = vmul.f32 0.03125, %v1192_v29 }
 0x7d2   :  { %v1198_v31 = vadd.f32 1e-05, %v1196_v30 }
 0x7d3   :  { %v1195_v32 = vpop.xlane.xlu0 %1194 }
 0x7d4   :  { %1677 = vrsqrt.f32 %v1198_v31  ;;  %v1197_v33 = vmul.f32 0.03125, %v1195_v32 }
 0x7d6   :  { %v1199_v34 = vadd.f32 1e-05, %v1197_v33 }
 0x7d8   :  { %1679 = vrsqrt.f32 %v1199_v34 }
 0x7de   :  { %v1678_v35 = vpop.eup %1677 }
 0x7df   :  { %v1202_v36 = vmul.f32 %v1678_v35, %v1186_v21 }
 0x7e1   :  { %v1210_v40 = vmul.f32 %v1425_v37, %v1202_v36 }
 0x7e2   :  { %v1680_v38 = vpop.eup %1679 }
 0x7e3   :  { %v1203_v41 = vmul.f32 %v1680_v38, %v1187_v23  ;;  %v1218_v45 = vadd.f32 %v1426_v43, %v1210_v40 }
 0x7e5   :  { %v1211_v44 = vmul.f32 %v1425_v37, %v1203_v41 }
 0x7e7   :  { %v1219_v46 = vadd.f32 %v1426_v43, %v1211_v44 }
 0x7e9   :  { %v1220_v47 = vpack.c.bf16 %v1219_v46, %v1218_v45 }
 0x7eb   :  { %1600 = vmatmul.mubr.msk.bf16.vlgmr.msra.gmra.mrb[36].mxu0 %vm49_vm0, %v1220_v47 }
 0x8be   :  { %v1281_v39 = vpop.f32.mrb[36].mxu0 }
 0x8bf   :  { %v1282_v54 = vadd.f32 %v1427_v52, %v1281_v39  ;;  %v1601_v55 = vpop.f32.mrb[37].mxu0 }
 0x8c0   :  { %v1284_v56 = vpop.f32.mrb[38].mxu0 }
 0x8c1   :  { %v1290_v57 = vmul.f32 0.044715, %v1282_v54  ;;  %v1285_v58 = vadd.f32 %v1427_v52, %v1284_v56  ;;  %v1602_v59 = vpop.f32.mrb[39].mxu0  ;;  %v1288_v6 = vmul.f32 0.5, %v1282_v54 }
 0x8c3   :  { %v1292_v60 = vmul.f32 %v1290_v57, %v1282_v54  ;;  %v1291_v61 = vmul.f32 0.044715, %v1285_v58  ;;  %v1289_v8 = vmul.f32 0.5, %v1285_v58 }
 0x8c5   :  { %v1294_v62 = vmul.f32 %v1292_v60, %v1282_v54  ;;  %v1293_v63 = vmul.f32 %v1291_v61, %v1285_v58 }
 0x8c7   :  { %v1296_v53 = vadd.f32 %v1294_v62, %v1282_v54  ;;  %v1295_v2 = vmul.f32 %v1293_v63, %v1285_v58 }
 0x8c9   :  { %v1298_v3 = vmul.f32 0.7978846, %v1296_v53  ;;  %v1297_v15 = vadd.f32 %v1295_v2, %v1285_v58 }
 0x8cb   :  { %1681 = vtanh.f32 %v1298_v3  ;;  %v1299_v4 = vmul.f32 0.7978846, %v1297_v15 }
 0x8cd   :  { %1683 = vtanh.f32 %v1299_v4 }
 0x8d5   :  { %v1682_v5 = vpop.eup %1681 }
 0x8d6   :  { %v1302_v7 = vadd.f32 1.0, %v1682_v5 }
 0x8d7   :  { %v1684_v42 = vpop.eup %1683 }
 0x8d8   :  { %v1303_v9 = vadd.f32 1.0, %v1684_v42  ;;  %v1304_v10 = vmul.f32 %v1302_v7, %v1288_v6 }
 0x8da   :  { %v1305_v11 = vmul.f32 %v1303_v9, %v1289_v8 }
 0x8dc   :  { %v1306_v13 = vpack.c.bf16 %v1305_v11, %v1304_v10 }
 0x8de   :  { %1612 = vmatmul.mubr.msk.bf16.vlgmr.msra.gmra.mrb[36].mxu1 %vm1346_vm7, %v1306_v13 }
 0x9b1   :  { %v1384_v17 = vpop.f32.mrb[36].mxu1 }
 0x9b2   :  { %v1385_v18 = vadd.f32 %v1431_v14, %v1384_v17  ;;  %v1613_v19 = vpop.f32.mrb[37].mxu1 }
 0x9b3   :  { %v1387_v20 = vpop.f32.mrb[38].mxu1 }
 0x9b4   :  { %v1391_v0 = vadd.f32 %v1385_v18, %v1996_v12  ;;  %v1388_v21 = vadd.f32 %v1431_v14, %v1387_v20  ;;  %v1614_v22 = vpop.f32.mrb[39].mxu1 }
 0x9b6   :  { %1393 = vst.msk [vmem:[%s2067_s13] sm:$0xff] %vm49_vm0, %v1391_v0  ;;  %v1392_v23 = vadd.f32 %v1388_v21, %v1999_v16 }
 0x9b8   :  { %1394 = vst.msk [vmem:[%s2067_s13 + $0x8] sm:$0xff] %vm49_vm0, %v1392_v23 }

</bundles_post_ra>
